<compile_context>
chip_gen: v6e
topology: v6e:2x2x1
jax: 0.10.0
libtpu: 0.0.40
codegen_flags: <defaults>
</compile_context>

<pallas_src>
import jax
import jax.numpy as jnp
from jax.experimental import pallas as pl
from jax.experimental.pallas import tpu as pltpu

PRIMITIVES = ['MB6_3x3_se0.25', 'MB6_5x5_se0.25', 'MB3_3x3_se0.25', 'MB3_5x5_se0.25']
PRIM_CFG = {  # name -> (expand_ratio, depthwise kernel size)
    'MB6_3x3_se0.25': (6, 3),
    'MB6_5x5_se0.25': (6, 5),
    'MB3_3x3_se0.25': (3, 3),
    'MB3_5x5_se0.25': (3, 5),
}
SE_RATIO = 0.25
BN_EPS = 1e-5

LAYER_WEIGHT_NAMES = ('w_exp', 'b_exp', 'w_dw', 'b_dw', 'w_se1', 'b_se1',
                      'w_se2', 'b_se2', 'w_proj', 'b_proj')


# --------------------------------------------------------------------------
# One MBConv layer, computed fully in-registers/VMEM inside the fused kernel.
# x2d: (H*W, Cin) float32 value.  Returns (Ho*Wo, outc) float32 value.
# --------------------------------------------------------------------------
def _mbconv_apply(x2d, cfg, r, hpad_ref, pool_src_ref):
    H, W, Cin = cfg['H'], cfg['W'], cfg['Cin']
    mid, outc, k, stride = cfg['mid'], cfg['outc'], cfg['k'], cfg['stride']
    pad = k // 2
    Hp, Wp = H + 2 * pad, W + 2 * pad
    Ho = (H - 1) // stride + 1
    Wo = (W - 1) // stride + 1

    # ---- 1) expand 1x1 conv (BN scale pre-folded) + bias + SiLU ------------
    h = jnp.dot(x2d, r['w_exp'][...],
                preferred_element_type=jnp.float32) + r['b_exp'][...]
    h = h * jax.nn.sigmoid(h)                              # (H*W, mid)

    # ---- 2) halo-padded copy in VMEM: one interior store + halo strips -----
    hpad_ref[pad:pad + H, pad:pad + W, :] = h.reshape(H, W, mid)
    if pad > 0:
        hpad_ref[0:pad, :, :] = jnp.zeros((pad, Wp, mid), jnp.float32)
        hpad_ref[Hp - pad:Hp, :, :] = jnp.zeros((pad, Wp, mid), jnp.float32)
        hpad_ref[pad:pad + H, 0:pad, :] = jnp.zeros((H, pad, mid), jnp.float32)
        hpad_ref[pad:pad + H, Wp - pad:Wp, :] = jnp.zeros((H, pad, mid), jnp.float32)

    # ---- 3) depthwise kxk conv (+BN folded), stride applied directly -------
    w_dw = r['w_dw'][...]                                  # (k*k, mid)
    acc = jnp.zeros((Ho, Wo, mid), jnp.float32)
    if stride == 1:
        # k contiguous slab loads; kw selection done on the loaded value.
        for kh in range(k):
            slab = hpad_ref[kh:kh + Ho, :, :]              # (Ho, Wp, mid)
            for kw in range(k):
                t = kh * k + kw
                acc = acc + slab[:, kw:kw + Wo, :] * w_dw[t:t + 1, :]
    else:
        for kh in range(k):
            for kw in range(k):
                t = kh * k + kw
                tap = hpad_ref[pl.ds(kh, Ho, stride=stride),
                               pl.ds(kw, Wo, stride=stride), :]
                acc = acc + tap * w_dw[t:t + 1, :]
    d = acc + r['b_dw'][...]
    d = d * jax.nn.sigmoid(d)                              # SiLU, (Ho, Wo, mid)
    d2d = d.reshape(Ho * Wo, mid)

    # ---- 4) squeeze-excite gate: tiny FCs (cse=1-2) as VPU reductions ------
    s = jnp.mean(d2d, axis=0, keepdims=True)                              # (1, mid)
    h1 = jnp.sum(s * r['w_se1'][...], axis=1, keepdims=True) + r['b_se1'][...]
    h1 = h1 * jax.nn.sigmoid(h1)                                          # (cse, 1)
    g = jax.nn.sigmoid(jnp.sum(h1 * r['w_se2'][...], axis=0, keepdims=True)
                       + r['b_se2'][...])                                 # (1, mid)

    # ---- 5) shortcut: avgpool2x2 / 1x1 conv downsample / identity ----------
    if cfg['has_pool']:
        sc3 = 0.25 * (pool_src_ref[pl.ds(0, Ho, stride=2), pl.ds(0, Wo, stride=2), :]
                      + pool_src_ref[pl.ds(0, Ho, stride=2), pl.ds(1, Wo, stride=2), :]
                      + pool_src_ref[pl.ds(1, Ho, stride=2), pl.ds(0, Wo, stride=2), :]
                      + pool_src_ref[pl.ds(1, Ho, stride=2), pl.ds(1, Wo, stride=2), :])
        sc = sc3.astype(jnp.float32).reshape(Ho * Wo, Cin)
    else:
        sc = x2d
    if cfg['has_ds_conv']:
        sc = jnp.dot(sc, r['w_ds'][...],
                     preferred_element_type=jnp.float32) + r['b_ds'][...]

    # ---- 6) SE-gated project 1x1 (+BN folded) + residual, one matmul -------
    y = jnp.dot(d2d * g, r['w_proj'][...], preferred_element_type=jnp.float32)
    return y + r['b_proj'][...] + sc                       # (Ho*Wo, outc)


# --------------------------------------------------------------------------
# Fused whole-Block kernel builder (one pallas_call, grid over batch)
# --------------------------------------------------------------------------
def _make_block_kernel(layer_cfgs):
    n_layers = len(layer_cfgs)

    def kernel(*refs):
        it = iter(refs)
        x_ref = next(it)                                   # (H0, W0, Cin0)
        layer_refs = []
        for cfg in layer_cfgs:
            r = {name: next(it) for name in LAYER_WEIGHT_NAMES}
            if cfg['has_ds_conv']:
                r['w_ds'] = next(it)
                r['b_ds'] = next(it)
            layer_refs.append(r)
        o_ref = next(it)                                   # (Ho_L, Wo_L, outc_L)
        hpad_refs = [next(it) for _ in range(n_layers)]    # per-layer VMEM scratch

        cfg0 = layer_cfgs[0]
        h2d = x_ref[...].astype(jnp.float32).reshape(cfg0['H'] * cfg0['W'], cfg0['Cin'])
        for li, (cfg, r, hpad_ref) in enumerate(zip(layer_cfgs, layer_refs, hpad_refs)):
            pool_src = x_ref if (cfg['has_pool'] and li == 0) else None
            h2d = _mbconv_apply(h2d, cfg, r, hpad_ref, pool_src)

        cfgL = layer_cfgs[-1]
        HoL = (cfgL['H'] - 1) // cfgL['stride'] + 1
        WoL = (cfgL['W'] - 1) // cfgL['stride'] + 1
        o_ref[...] = h2d.reshape(HoL, WoL, cfgL['outc']).astype(o_ref.dtype)

    return kernel


def _bcast_spec(a):
    nd = a.ndim
    return pl.BlockSpec(a.shape, lambda n, _nd=nd: (0,) * _nd)


# --------------------------------------------------------------------------
# Block forward (PyTorch-compatible NCHW in / NCHW out)
# --------------------------------------------------------------------------
def block_forward(params, x_nchw, forward_list):
    assert len(forward_list) == len(params)
    x = jnp.transpose(x_nchw, (0, 2, 3, 1))        # NCHW -> NHWC (channels on lanes)
    N, H, W, Cin = x.shape

    args = [x]
    in_specs = [pl.BlockSpec((None, H, W, Cin), lambda n: (n, 0, 0, 0))]
    scratch = []
    layer_cfgs = []

    curH, curW, curC = H, W, Cin
    for li, (layer_p, idx) in enumerate(zip(params, forward_list)):
        p = layer_p['ops'][idx]
        ds = layer_p['downsample']
        stride = layer_p['stride']
        k = p['k']
        mid = p['w_exp'].shape[1]
        outc = p['w_proj'].shape[1]
        pad = k // 2
        Ho = (curH - 1) // stride + 1
        Wo = (curW - 1) // stride + 1
        has_pool = (stride == 2)
        has_ds_conv = (ds is not None) and ('w' in ds)
        if has_pool:
            # TODO(synk): odd H/W would need ceil_mode partial-window averaging.
            assert curH % 2 == 0 and curW % 2 == 0
            assert li == 0  # only the first MixOps layer of a Block has stride 2

        layer_cfgs.append(dict(H=curH, W=curW, Cin=curC, mid=mid, outc=outc,
                               k=k, stride=stride, has_pool=has_pool,
                               has_ds_conv=has_ds_conv))

        # Fold inference BatchNorm scale into the conv weights (wrapper-side, exact).
        w_exp = p['w_exp'] * p['s_exp']                                   # (Cin, mid)
        w_dw = (p['w_dw'] * p['s_dw'].reshape(1, 1, mid)).reshape(k * k, mid)
        w_proj = p['w_proj'] * p['s_proj']                                # (mid, outc)

        layer_args = [w_exp, p['b_exp'], w_dw, p['b_dw'],
                      p['w_se1'], p['b_se1'], p['w_se2'], p['b_se2'],
                      w_proj, p['b_proj']]
        if has_ds_conv:
            layer_args += [ds['w'] * ds['s'], ds['b']]
        for a in layer_args:
            args.append(a)
            in_specs.append(_bcast_spec(a))

        scratch.append(pltpu.VMEM((curH + 2 * pad, curW + 2 * pad, mid), jnp.float32))
        curH, curW, curC = Ho, Wo, outc

    kernel = _make_block_kernel(layer_cfgs)
    out = pl.pallas_call(
        kernel,
        out_shape=jax.ShapeDtypeStruct((N, curH, curW, curC), x.dtype),
        grid=(N,),
        in_specs=in_specs,
        out_specs=pl.BlockSpec((None, curH, curW, curC), lambda n: (n, 0, 0, 0)),
        scratch_shapes=scratch,
        compiler_params=pltpu.CompilerParams(dimension_semantics=("parallel",)),
    )(*args)
    return jnp.transpose(out, (0, 3, 1, 2))          # back to NCHW


# --------------------------------------------------------------------------
# Deterministic parameter construction (synthetic, in-script)
# --------------------------------------------------------------------------
def _fold_bn(key, c):
    kg, kb, km, kv = jax.random.split(key, 4)
    gamma = 1.0 + 0.1 * jax.random.normal(kg, (c,), jnp.float32)
    beta = 0.1 * jax.random.normal(kb, (c,), jnp.float32)
    mean = 0.1 * jax.random.normal(km, (c,), jnp.float32)
    var = 1.0 + 0.1 * jax.random.uniform(kv, (c,), jnp.float32)
    scale = gamma / jnp.sqrt(var + BN_EPS)
    bias = beta - mean * scale
    return scale.reshape(1, c), bias.reshape(1, c)


def _init_mbconv(key, inc, outc, k, expand):
    mid = inc * expand
    cse = max(1, int(inc * SE_RATIO))      # SE reduction from block input channels
    keys = jax.random.split(key, 10)
    p = {'k': k}
    p['w_exp'] = 0.1 * jax.random.normal(keys[0], (inc, mid), jnp.float32)
    p['s_exp'], p['b_exp'] = _fold_bn(keys[1], mid)
    p['w_dw'] = 0.1 * jax.random.normal(keys[2], (k, k, mid), jnp.float32)
    p['s_dw'], p['b_dw'] = _fold_bn(keys[3], mid)
    p['w_se1'] = 0.1 * jax.random.normal(keys[4], (cse, mid), jnp.float32)  # stored (cse, mid)
    p['b_se1'] = 0.01 * jax.random.normal(keys[5], (cse, 1), jnp.float32)
    p['w_se2'] = 0.1 * jax.random.normal(keys[6], (cse, mid), jnp.float32)
    p['b_se2'] = 0.01 * jax.random.normal(keys[7], (1, mid), jnp.float32)
    p['w_proj'] = 0.1 * jax.random.normal(keys[8], (mid, outc), jnp.float32)
    p['s_proj'], p['b_proj'] = _fold_bn(keys[9], outc)
    return p


def _init_downsample(key, inc, outc, stride):
    if inc == outc and stride != 2:
        return None
    p = {'stride': stride}
    if inc != outc:
        k1, k2 = jax.random.split(key)
        p['w'] = 0.1 * jax.random.normal(k1, (inc, outc), jnp.float32)
        p['s'], p['b'] = _fold_bn(k2, outc)
    return p


def _init_mixop(key, inc, outc, stride):
    keys = jax.random.split(key, len(PRIMITIVES) + 1)
    ops = []
    for i, prim in enumerate(PRIMITIVES):
        expand, k = PRIM_CFG[prim]
        ops.append(_init_mbconv(keys[i], inc, outc, k, expand))
    ds = _init_downsample(keys[-1], inc, outc, stride)   # shared across ops
    return {'ops': ops, 'downsample': ds, 'stride': stride}


def init_block_params(key, inc, hidden_outc, outc, stride, layers):
    keys = jax.random.split(key, layers)
    mixops = []
    if layers == 1:
        mixops.append(_init_mixop(keys[0], inc, outc, stride))
    else:
        for i in range(layers):
            if i == 0:
                mixops.append(_init_mixop(keys[i], inc, hidden_outc, stride))
            elif i == layers - 1:
                mixops.append(_init_mixop(keys[i], hidden_outc, outc, 1))
            else:
                mixops.append(_init_mixop(keys[i], hidden_outc, hidden_outc, 1))
    return mixops


if __name__ == "__main__":
    key = jax.random.PRNGKey(0)
    kx, kp = jax.random.split(key)

    # Block(inc=4, hidden_outc=8, outc=8, stride=2, layers=2)
    inc, hidden_outc, outc, stride, layers = 4, 8, 8, 2, 2
    x_nchw = jax.random.normal(kx, (2, inc, 16, 16), jnp.float32)   # PyTorch NCHW

    params = init_block_params(kp, inc, hidden_outc, outc, stride, layers)
    forward_list = [0, 3]   # layer0: MB6_3x3_se0.25, layer1: MB3_5x5_se0.25

    run = jax.jit(lambda inp: block_forward(params, inp, forward_list))
    out = jax.block_until_ready(run(x_nchw))
    assert out.shape == (2, outc, 8, 8), out.shape
    assert bool(jnp.all(jnp.isfinite(out)))
    print("KERNEL_OK")
</pallas_src>

<mosaic_0001>
module attributes {stable_mosaic.version = 11 : i64} {
  func.func @kernel(%arg0: i32, %arg1: memref<1x16x16x4xf32, #tpu.memory_space<vmem>>, %arg2: memref<4x24xf32, #tpu.memory_space<vmem>>, %arg3: memref<1x24xf32, #tpu.memory_space<vmem>>, %arg4: memref<9x24xf32, #tpu.memory_space<vmem>>, %arg5: memref<1x24xf32, #tpu.memory_space<vmem>>, %arg6: memref<1x24xf32, #tpu.memory_space<vmem>>, %arg7: memref<1x1xf32, #tpu.memory_space<vmem>>, %arg8: memref<1x24xf32, #tpu.memory_space<vmem>>, %arg9: memref<1x24xf32, #tpu.memory_space<vmem>>, %arg10: memref<24x8xf32, #tpu.memory_space<vmem>>, %arg11: memref<1x8xf32, #tpu.memory_space<vmem>>, %arg12: memref<4x8xf32, #tpu.memory_space<vmem>>, %arg13: memref<1x8xf32, #tpu.memory_space<vmem>>, %arg14: memref<8x24xf32, #tpu.memory_space<vmem>>, %arg15: memref<1x24xf32, #tpu.memory_space<vmem>>, %arg16: memref<25x24xf32, #tpu.memory_space<vmem>>, %arg17: memref<1x24xf32, #tpu.memory_space<vmem>>, %arg18: memref<2x24xf32, #tpu.memory_space<vmem>>, %arg19: memref<2x1xf32, #tpu.memory_space<vmem>>, %arg20: memref<2x24xf32, #tpu.memory_space<vmem>>, %arg21: memref<1x24xf32, #tpu.memory_space<vmem>>, %arg22: memref<24x8xf32, #tpu.memory_space<vmem>>, %arg23: memref<1x8xf32, #tpu.memory_space<vmem>>, %arg24: memref<1x8x8x8xf32, #tpu.memory_space<vmem>>, %arg25: memref<18x18x24xf32, #tpu.memory_space<vmem>>, %arg26: memref<12x12x24xf32, #tpu.memory_space<vmem>>) attributes {dimension_semantics = [#tpu.dimension_semantics<parallel>], iteration_bounds = array<i64: 2>, scalar_prefetch = 0 : i64, scratch_operands = 2 : i64, tpu.core_type = #tpu.core_type<tc>, window_params = [{transform_indices = @transform_0, window_bounds = array<i64: 1, 16, 16, 4>}, {pipeline_mode = #tpu.pipeline_mode<synchronous>, transform_indices = @transform_1, window_bounds = array<i64: 4, 24>}, {pipeline_mode = #tpu.pipeline_mode<synchronous>, transform_indices = @transform_2, window_bounds = array<i64: 1, 24>}, {pipeline_mode = #tpu.pipeline_mode<synchronous>, transform_indices = @transform_3, window_bounds = array<i64: 9, 24>}, {pipeline_mode = #tpu.pipeline_mode<synchronous>, transform_indices = @transform_4, window_bounds = array<i64: 1, 24>}, {pipeline_mode = #tpu.pipeline_mode<synchronous>, transform_indices = @transform_5, window_bounds = array<i64: 1, 24>}, {pipeline_mode = #tpu.pipeline_mode<synchronous>, transform_indices = @transform_6, window_bounds = array<i64: 1, 1>}, {pipeline_mode = #tpu.pipeline_mode<synchronous>, transform_indices = @transform_7, window_bounds = array<i64: 1, 24>}, {pipeline_mode = #tpu.pipeline_mode<synchronous>, transform_indices = @transform_8, window_bounds = array<i64: 1, 24>}, {pipeline_mode = #tpu.pipeline_mode<synchronous>, transform_indices = @transform_9, window_bounds = array<i64: 24, 8>}, {pipeline_mode = #tpu.pipeline_mode<synchronous>, transform_indices = @transform_10, window_bounds = array<i64: 1, 8>}, {pipeline_mode = #tpu.pipeline_mode<synchronous>, transform_indices = @transform_11, window_bounds = array<i64: 4, 8>}, {pipeline_mode = #tpu.pipeline_mode<synchronous>, transform_indices = @transform_12, window_bounds = array<i64: 1, 8>}, {pipeline_mode = #tpu.pipeline_mode<synchronous>, transform_indices = @transform_13, window_bounds = array<i64: 8, 24>}, {pipeline_mode = #tpu.pipeline_mode<synchronous>, transform_indices = @transform_14, window_bounds = array<i64: 1, 24>}, {pipeline_mode = #tpu.pipeline_mode<synchronous>, transform_indices = @transform_15, window_bounds = array<i64: 25, 24>}, {pipeline_mode = #tpu.pipeline_mode<synchronous>, transform_indices = @transform_16, window_bounds = array<i64: 1, 24>}, {pipeline_mode = #tpu.pipeline_mode<synchronous>, transform_indices = @transform_17, window_bounds = array<i64: 2, 24>}, {pipeline_mode = #tpu.pipeline_mode<synchronous>, transform_indices = @transform_18, window_bounds = array<i64: 2, 1>}, {pipeline_mode = #tpu.pipeline_mode<synchronous>, transform_indices = @transform_19, window_bounds = array<i64: 2, 24>}, {pipeline_mode = #tpu.pipeline_mode<synchronous>, transform_indices = @transform_20, window_bounds = array<i64: 1, 24>}, {pipeline_mode = #tpu.pipeline_mode<synchronous>, transform_indices = @transform_21, window_bounds = array<i64: 24, 8>}, {pipeline_mode = #tpu.pipeline_mode<synchronous>, transform_indices = @transform_22, window_bounds = array<i64: 1, 8>}, {transform_indices = @transform_23, window_bounds = array<i64: 1, 8, 8, 8>}]} {
    %c0 = arith.constant 0 : index
    %c0_0 = arith.constant 0 : index
    %c0_1 = arith.constant 0 : index
    %c0_2 = arith.constant 0 : index
    %0 = vector.load %arg1[%c0, %c0_0, %c0_1, %c0_2] : memref<1x16x16x4xf32, #tpu.memory_space<vmem>>, vector<1x16x16x4xf32>
    %1 = vector.shape_cast %0 : vector<1x16x16x4xf32> to vector<16x16x4xf32>
    %2 = vector.shape_cast %1 : vector<16x16x4xf32> to vector<256x4xf32>
    %c0_3 = arith.constant 0 : index
    %c0_4 = arith.constant 0 : index
    %3 = vector.load %arg2[%c0_3, %c0_4] : memref<4x24xf32, #tpu.memory_space<vmem>>, vector<4x24xf32>
    %cst = arith.constant dense<0.000000e+00> : vector<256x24xf32>
    %4 = tpu.matmul %2, %3, %cst {dimension_numbers = #tpu.dot_dimension_numbers<[1], [0], [0], [1], [0, 0, 1, 1], [], []>} : vector<256x4xf32>, vector<4x24xf32>, vector<256x24xf32> -> vector<256x24xf32>
    %c0_5 = arith.constant 0 : index
    %c0_6 = arith.constant 0 : index
    %5 = vector.load %arg3[%c0_5, %c0_6] : memref<1x24xf32, #tpu.memory_space<vmem>>, vector<1x24xf32>
    %6 = vector.broadcast %5 : vector<1x24xf32> to vector<256x24xf32>
    %7 = arith.addf %4, %6 : vector<256x24xf32>
    %8 = arith.negf %7 : vector<256x24xf32>
    %9 = math.exp %8 : vector<256x24xf32>
    %cst_7 = arith.constant 1.000000e+00 : f32
    %10 = vector.broadcast %cst_7 : f32 to vector<256x24xf32>
    %11 = arith.addf %10, %9 : vector<256x24xf32>
    %12 = arith.divf %10, %11 : vector<256x24xf32>
    %13 = arith.mulf %7, %12 : vector<256x24xf32>
    %14 = vector.shape_cast %13 : vector<256x24xf32> to vector<16x16x24xf32>
    %c1 = arith.constant 1 : index
    %c1_8 = arith.constant 1 : index
    %c0_9 = arith.constant 0 : index
    %15 = vector.load %arg25[%c1, %c1_8, %c0_9] : memref<18x18x24xf32, #tpu.memory_space<vmem>>, vector<16x16x24xf32>
    tpu.vector_store %arg25[%c1, %c1_8, %c0_9], %14 {strides = array<i32>} : memref<18x18x24xf32, #tpu.memory_space<vmem>>, vector<16x16x24xf32>,
    %cst_10 = arith.constant 0.000000e+00 : f32
    %16 = vector.broadcast %cst_10 : f32 to vector<1x18x24xf32>
    %c0_11 = arith.constant 0 : index
    %c0_12 = arith.constant 0 : index
    %c0_13 = arith.constant 0 : index
    %17 = vector.load %arg25[%c0_11, %c0_12, %c0_13] : memref<18x18x24xf32, #tpu.memory_space<vmem>>, vector<1x18x24xf32>
    tpu.vector_store %arg25[%c0_11, %c0_12, %c0_13], %16 {strides = array<i32>} : memref<18x18x24xf32, #tpu.memory_space<vmem>>, vector<1x18x24xf32>,
    %cst_14 = arith.constant 0.000000e+00 : f32
    %18 = vector.broadcast %cst_14 : f32 to vector<1x18x24xf32>
    %c17 = arith.constant 17 : index
    %c0_15 = arith.constant 0 : index
    %c0_16 = arith.constant 0 : index
    %19 = vector.load %arg25[%c17, %c0_15, %c0_16] : memref<18x18x24xf32, #tpu.memory_space<vmem>>, vector<1x18x24xf32>
    tpu.vector_store %arg25[%c17, %c0_15, %c0_16], %18 {strides = array<i32>} : memref<18x18x24xf32, #tpu.memory_space<vmem>>, vector<1x18x24xf32>,
    %cst_17 = arith.constant 0.000000e+00 : f32
    %20 = vector.broadcast %cst_17 : f32 to vector<16x1x24xf32>
    %c1_18 = arith.constant 1 : index
    %c0_19 = arith.constant 0 : index
    %c0_20 = arith.constant 0 : index
    %21 = vector.load %arg25[%c1_18, %c0_19, %c0_20] : memref<18x18x24xf32, #tpu.memory_space<vmem>>, vector<16x1x24xf32>
    tpu.vector_store %arg25[%c1_18, %c0_19, %c0_20], %20 {strides = array<i32>} : memref<18x18x24xf32, #tpu.memory_space<vmem>>, vector<16x1x24xf32>,
    %cst_21 = arith.constant 0.000000e+00 : f32
    %22 = vector.broadcast %cst_21 : f32 to vector<16x1x24xf32>
    %c1_22 = arith.constant 1 : index
    %c17_23 = arith.constant 17 : index
    %c0_24 = arith.constant 0 : index
    %23 = vector.load %arg25[%c1_22, %c17_23, %c0_24] : memref<18x18x24xf32, #tpu.memory_space<vmem>>, vector<16x1x24xf32>
    tpu.vector_store %arg25[%c1_22, %c17_23, %c0_24], %22 {strides = array<i32>} : memref<18x18x24xf32, #tpu.memory_space<vmem>>, vector<16x1x24xf32>,
    %c0_25 = arith.constant 0 : index
    %c0_26 = arith.constant 0 : index
    %24 = vector.load %arg4[%c0_25, %c0_26] : memref<9x24xf32, #tpu.memory_space<vmem>>, vector<9x24xf32>
    %cst_27 = arith.constant 0.000000e+00 : f32
    %25 = vector.broadcast %cst_27 : f32 to vector<8x8x24xf32>
    %c0_28 = arith.constant 0 : index
    %c0_29 = arith.constant 0 : index
    %c0_30 = arith.constant 0 : index
    %26 = tpu.strided_load %arg25[%c0_28, %c0_29, %c0_30] {strides = array<i32: 2, 2, 1>} : memref<18x18x24xf32, #tpu.memory_space<vmem>>, vector<8x8x24xf32>
    %27 = vector.extract_strided_slice %24 {offsets = [0, 0], sizes = [1, 24], strides = [1, 1]} : vector<9x24xf32> to vector<1x24xf32>
    %28 = vector.shape_cast %27 : vector<1x24xf32> to vector<1x1x24xf32>
    %29 = vector.broadcast %28 : vector<1x1x24xf32> to vector<8x8x24xf32>
    %30 = arith.mulf %26, %29 : vector<8x8x24xf32>
    %31 = arith.addf %25, %30 : vector<8x8x24xf32>
    %c0_31 = arith.constant 0 : index
    %c1_32 = arith.constant 1 : index
    %c0_33 = arith.constant 0 : index
    %32 = tpu.strided_load %arg25[%c0_31, %c1_32, %c0_33] {strides = array<i32: 2, 2, 1>} : memref<18x18x24xf32, #tpu.memory_space<vmem>>, vector<8x8x24xf32>
    %33 = vector.extract_strided_slice %24 {offsets = [1, 0], sizes = [1, 24], strides = [1, 1]} : vector<9x24xf32> to vector<1x24xf32>
    %34 = vector.shape_cast %33 : vector<1x24xf32> to vector<1x1x24xf32>
    %35 = vector.broadcast %34 : vector<1x1x24xf32> to vector<8x8x24xf32>
    %36 = arith.mulf %32, %35 : vector<8x8x24xf32>
    %37 = arith.addf %31, %36 : vector<8x8x24xf32>
    %c0_34 = arith.constant 0 : index
    %c2 = arith.constant 2 : index
    %c0_35 = arith.constant 0 : index
    %38 = tpu.strided_load %arg25[%c0_34, %c2, %c0_35] {strides = array<i32: 2, 2, 1>} : memref<18x18x24xf32, #tpu.memory_space<vmem>>, vector<8x8x24xf32>
    %39 = vector.extract_strided_slice %24 {offsets = [2, 0], sizes = [1, 24], strides = [1, 1]} : vector<9x24xf32> to vector<1x24xf32>
    %40 = vector.shape_cast %39 : vector<1x24xf32> to vector<1x1x24xf32>
    %41 = vector.broadcast %40 : vector<1x1x24xf32> to vector<8x8x24xf32>
    %42 = arith.mulf %38, %41 : vector<8x8x24xf32>
    %43 = arith.addf %37, %42 : vector<8x8x24xf32>
    %c1_36 = arith.constant 1 : index
    %c0_37 = arith.constant 0 : index
    %c0_38 = arith.constant 0 : index
    %44 = tpu.strided_load %arg25[%c1_36, %c0_37, %c0_38] {strides = array<i32: 2, 2, 1>} : memref<18x18x24xf32, #tpu.memory_space<vmem>>, vector<8x8x24xf32>
    %45 = vector.extract_strided_slice %24 {offsets = [3, 0], sizes = [1, 24], strides = [1, 1]} : vector<9x24xf32> to vector<1x24xf32>
    %46 = vector.shape_cast %45 : vector<1x24xf32> to vector<1x1x24xf32>
    %47 = vector.broadcast %46 : vector<1x1x24xf32> to vector<8x8x24xf32>
    %48 = arith.mulf %44, %47 : vector<8x8x24xf32>
    %49 = arith.addf %43, %48 : vector<8x8x24xf32>
    %c1_39 = arith.constant 1 : index
    %c1_40 = arith.constant 1 : index
    %c0_41 = arith.constant 0 : index
    %50 = tpu.strided_load %arg25[%c1_39, %c1_40, %c0_41] {strides = array<i32: 2, 2, 1>} : memref<18x18x24xf32, #tpu.memory_space<vmem>>, vector<8x8x24xf32>
    %51 = vector.extract_strided_slice %24 {offsets = [4, 0], sizes = [1, 24], strides = [1, 1]} : vector<9x24xf32> to vector<1x24xf32>
    %52 = vector.shape_cast %51 : vector<1x24xf32> to vector<1x1x24xf32>
    %53 = vector.broadcast %52 : vector<1x1x24xf32> to vector<8x8x24xf32>
    %54 = arith.mulf %50, %53 : vector<8x8x24xf32>
    %55 = arith.addf %49, %54 : vector<8x8x24xf32>
    %c1_42 = arith.constant 1 : index
    %c2_43 = arith.constant 2 : index
    %c0_44 = arith.constant 0 : index
    %56 = tpu.strided_load %arg25[%c1_42, %c2_43, %c0_44] {strides = array<i32: 2, 2, 1>} : memref<18x18x24xf32, #tpu.memory_space<vmem>>, vector<8x8x24xf32>
    %57 = vector.extract_strided_slice %24 {offsets = [5, 0], sizes = [1, 24], strides = [1, 1]} : vector<9x24xf32> to vector<1x24xf32>
    %58 = vector.shape_cast %57 : vector<1x24xf32> to vector<1x1x24xf32>
    %59 = vector.broadcast %58 : vector<1x1x24xf32> to vector<8x8x24xf32>
    %60 = arith.mulf %56, %59 : vector<8x8x24xf32>
    %61 = arith.addf %55, %60 : vector<8x8x24xf32>
    %c2_45 = arith.constant 2 : index
    %c0_46 = arith.constant 0 : index
    %c0_47 = arith.constant 0 : index
    %62 = tpu.strided_load %arg25[%c2_45, %c0_46, %c0_47] {strides = array<i32: 2, 2, 1>} : memref<18x18x24xf32, #tpu.memory_space<vmem>>, vector<8x8x24xf32>
    %63 = vector.extract_strided_slice %24 {offsets = [6, 0], sizes = [1, 24], strides = [1, 1]} : vector<9x24xf32> to vector<1x24xf32>
    %64 = vector.shape_cast %63 : vector<1x24xf32> to vector<1x1x24xf32>
    %65 = vector.broadcast %64 : vector<1x1x24xf32> to vector<8x8x24xf32>
    %66 = arith.mulf %62, %65 : vector<8x8x24xf32>
    %67 = arith.addf %61, %66 : vector<8x8x24xf32>
    %c2_48 = arith.constant 2 : index
    %c1_49 = arith.constant 1 : index
    %c0_50 = arith.constant 0 : index
    %68 = tpu.strided_load %arg25[%c2_48, %c1_49, %c0_50] {strides = array<i32: 2, 2, 1>} : memref<18x18x24xf32, #tpu.memory_space<vmem>>, vector<8x8x24xf32>
    %69 = vector.extract_strided_slice %24 {offsets = [7, 0], sizes = [1, 24], strides = [1, 1]} : vector<9x24xf32> to vector<1x24xf32>
    %70 = vector.shape_cast %69 : vector<1x24xf32> to vector<1x1x24xf32>
    %71 = vector.broadcast %70 : vector<1x1x24xf32> to vector<8x8x24xf32>
    %72 = arith.mulf %68, %71 : vector<8x8x24xf32>
    %73 = arith.addf %67, %72 : vector<8x8x24xf32>
    %c2_51 = arith.constant 2 : index
    %c2_52 = arith.constant 2 : index
    %c0_53 = arith.constant 0 : index
    %74 = tpu.strided_load %arg25[%c2_51, %c2_52, %c0_53] {strides = array<i32: 2, 2, 1>} : memref<18x18x24xf32, #tpu.memory_space<vmem>>, vector<8x8x24xf32>
    %75 = vector.extract_strided_slice %24 {offsets = [8, 0], sizes = [1, 24], strides = [1, 1]} : vector<9x24xf32> to vector<1x24xf32>
    %76 = vector.shape_cast %75 : vector<1x24xf32> to vector<1x1x24xf32>
    %77 = vector.broadcast %76 : vector<1x1x24xf32> to vector<8x8x24xf32>
    %78 = arith.mulf %74, %77 : vector<8x8x24xf32>
    %79 = arith.addf %73, %78 : vector<8x8x24xf32>
    %c0_54 = arith.constant 0 : index
    %c0_55 = arith.constant 0 : index
    %80 = vector.load %arg5[%c0_54, %c0_55] : memref<1x24xf32, #tpu.memory_space<vmem>>, vector<1x24xf32>
    %81 = vector.shape_cast %80 : vector<1x24xf32> to vector<1x1x24xf32>
    %82 = vector.broadcast %81 : vector<1x1x24xf32> to vector<8x8x24xf32>
    %83 = arith.addf %79, %82 : vector<8x8x24xf32>
    %84 = arith.negf %83 : vector<8x8x24xf32>
    %85 = math.exp %84 : vector<8x8x24xf32>
    %cst_56 = arith.constant 1.000000e+00 : f32
    %86 = vector.broadcast %cst_56 : f32 to vector<8x8x24xf32>
    %87 = arith.addf %86, %85 : vector<8x8x24xf32>
    %88 = arith.divf %86, %87 : vector<8x8x24xf32>
    %89 = arith.mulf %83, %88 : vector<8x8x24xf32>
    %90 = vector.shape_cast %89 : vector<8x8x24xf32> to vector<64x24xf32>
    %cst_57 = arith.constant dense<0.000000e+00> : vector<24xf32>
    %91 = vector.multi_reduction <add>, %90, %cst_57 [0] : vector<64x24xf32> to vector<24xf32>
    %92 = vector.shape_cast %91 : vector<24xf32> to vector<1x24xf32>
    %cst_58 = arith.constant 6.400000e+01 : f32
    %93 = vector.broadcast %cst_58 : f32 to vector<1x24xf32>
    %94 = arith.divf %92, %93 : vector<1x24xf32>
    %c0_59 = arith.constant 0 : index
    %c0_60 = arith.constant 0 : index
    %95 = vector.load %arg6[%c0_59, %c0_60] : memref<1x24xf32, #tpu.memory_space<vmem>>, vector<1x24xf32>
    %96 = arith.mulf %94, %95 : vector<1x24xf32>
    %cst_61 = arith.constant dense<0.000000e+00> : vector<1xf32>
    %97 = vector.multi_reduction <add>, %96, %cst_61 [1] : vector<1x24xf32> to vector<1xf32>
    %98 = vector.shape_cast %97 : vector<1xf32> to vector<1x1xf32>
    %c0_62 = arith.constant 0 : index
    %c0_63 = arith.constant 0 : index
    %99 = vector.load %arg7[%c0_62, %c0_63] : memref<1x1xf32, #tpu.memory_space<vmem>>, vector<1x1xf32>
    %100 = arith.addf %98, %99 : vector<1x1xf32>
    %101 = arith.negf %100 : vector<1x1xf32>
    %102 = math.exp %101 : vector<1x1xf32>
    %cst_64 = arith.constant 1.000000e+00 : f32
    %103 = vector.broadcast %cst_64 : f32 to vector<1x1xf32>
    %104 = arith.addf %103, %102 : vector<1x1xf32>
    %105 = arith.divf %103, %104 : vector<1x1xf32>
    %106 = arith.mulf %100, %105 : vector<1x1xf32>
    %c0_65 = arith.constant 0 : index
    %c0_66 = arith.constant 0 : index
    %107 = vector.load %arg8[%c0_65, %c0_66] : memref<1x24xf32, #tpu.memory_space<vmem>>, vector<1x24xf32>
    %108 = vector.broadcast %106 : vector<1x1xf32> to vector<1x24xf32>
    %109 = arith.mulf %108, %107 : vector<1x24xf32>
    %cst_67 = arith.constant dense<0.000000e+00> : vector<24xf32>
    %110 = vector.multi_reduction <add>, %109, %cst_67 [0] : vector<1x24xf32> to vector<24xf32>
    %111 = vector.shape_cast %110 : vector<24xf32> to vector<1x24xf32>
    %c0_68 = arith.constant 0 : index
    %c0_69 = arith.constant 0 : index
    %112 = vector.load %arg9[%c0_68, %c0_69] : memref<1x24xf32, #tpu.memory_space<vmem>>, vector<1x24xf32>
    %113 = arith.addf %111, %112 : vector<1x24xf32>
    %114 = arith.negf %113 : vector<1x24xf32>
    %115 = math.exp %114 : vector<1x24xf32>
    %cst_70 = arith.constant 1.000000e+00 : f32
    %116 = vector.broadcast %cst_70 : f32 to vector<1x24xf32>
    %117 = arith.addf %116, %115 : vector<1x24xf32>
    %118 = arith.divf %116, %117 : vector<1x24xf32>
    %c0_71 = arith.constant 0 : index
    %c0_72 = arith.constant 0 : index
    %c0_73 = arith.constant 0 : index
    %c0_74 = arith.constant 0 : index
    %119 = tpu.strided_load %arg1[%c0_71, %c0_72, %c0_73, %c0_74] {strides = array<i32: 1, 2, 2, 1>} : memref<1x16x16x4xf32, #tpu.memory_space<vmem>>, vector<1x8x8x4xf32>
    %120 = vector.shape_cast %119 : vector<1x8x8x4xf32> to vector<8x8x4xf32>
    %c0_75 = arith.constant 0 : index
    %c0_76 = arith.constant 0 : index
    %c1_77 = arith.constant 1 : index
    %c0_78 = arith.constant 0 : index
    %121 = tpu.strided_load %arg1[%c0_75, %c0_76, %c1_77, %c0_78] {strides = array<i32: 1, 2, 2, 1>} : memref<1x16x16x4xf32, #tpu.memory_space<vmem>>, vector<1x8x8x4xf32>
    %122 = vector.shape_cast %121 : vector<1x8x8x4xf32> to vector<8x8x4xf32>
    %123 = arith.addf %120, %122 : vector<8x8x4xf32>
    %c0_79 = arith.constant 0 : index
    %c1_80 = arith.constant 1 : index
    %c0_81 = arith.constant 0 : index
    %c0_82 = arith.constant 0 : index
    %124 = tpu.strided_load %arg1[%c0_79, %c1_80, %c0_81, %c0_82] {strides = array<i32: 1, 2, 2, 1>} : memref<1x16x16x4xf32, #tpu.memory_space<vmem>>, vector<1x8x8x4xf32>
    %125 = vector.shape_cast %124 : vector<1x8x8x4xf32> to vector<8x8x4xf32>
    %126 = arith.addf %123, %125 : vector<8x8x4xf32>
    %c0_83 = arith.constant 0 : index
    %c1_84 = arith.constant 1 : index
    %c1_85 = arith.constant 1 : index
    %c0_86 = arith.constant 0 : index
    %127 = tpu.strided_load %arg1[%c0_83, %c1_84, %c1_85, %c0_86] {strides = array<i32: 1, 2, 2, 1>} : memref<1x16x16x4xf32, #tpu.memory_space<vmem>>, vector<1x8x8x4xf32>
    %128 = vector.shape_cast %127 : vector<1x8x8x4xf32> to vector<8x8x4xf32>
    %129 = arith.addf %126, %128 : vector<8x8x4xf32>
    %cst_87 = arith.constant 2.500000e-01 : f32
    %130 = vector.broadcast %cst_87 : f32 to vector<8x8x4xf32>
    %131 = arith.mulf %130, %129 : vector<8x8x4xf32>
    %132 = vector.shape_cast %131 : vector<8x8x4xf32> to vector<64x4xf32>
    %c0_88 = arith.constant 0 : index
    %c0_89 = arith.constant 0 : index
    %133 = vector.load %arg12[%c0_88, %c0_89] : memref<4x8xf32, #tpu.memory_space<vmem>>, vector<4x8xf32>
    %cst_90 = arith.constant dense<0.000000e+00> : vector<64x8xf32>
    %134 = tpu.matmul %132, %133, %cst_90 {dimension_numbers = #tpu.dot_dimension_numbers<[1], [0], [0], [1], [0, 0, 1, 1], [], []>} : vector<64x4xf32>, vector<4x8xf32>, vector<64x8xf32> -> vector<64x8xf32>
    %c0_91 = arith.constant 0 : index
    %c0_92 = arith.constant 0 : index
    %135 = vector.load %arg13[%c0_91, %c0_92] : memref<1x8xf32, #tpu.memory_space<vmem>>, vector<1x8xf32>
    %136 = vector.broadcast %135 : vector<1x8xf32> to vector<64x8xf32>
    %137 = arith.addf %134, %136 : vector<64x8xf32>
    %138 = vector.broadcast %118 : vector<1x24xf32> to vector<64x24xf32>
    %139 = arith.mulf %90, %138 : vector<64x24xf32>
    %c0_93 = arith.constant 0 : index
    %c0_94 = arith.constant 0 : index
    %140 = vector.load %arg10[%c0_93, %c0_94] : memref<24x8xf32, #tpu.memory_space<vmem>>, vector<24x8xf32>
    %cst_95 = arith.constant dense<0.000000e+00> : vector<64x8xf32>
    %141 = tpu.matmul %139, %140, %cst_95 {dimension_numbers = #tpu.dot_dimension_numbers<[1], [0], [0], [1], [0, 0, 1, 1], [], []>} : vector<64x24xf32>, vector<24x8xf32>, vector<64x8xf32> -> vector<64x8xf32>
    %c0_96 = arith.constant 0 : index
    %c0_97 = arith.constant 0 : index
    %142 = vector.load %arg11[%c0_96, %c0_97] : memref<1x8xf32, #tpu.memory_space<vmem>>, vector<1x8xf32>
    %143 = vector.broadcast %142 : vector<1x8xf32> to vector<64x8xf32>
    %144 = arith.addf %141, %143 : vector<64x8xf32>
    %145 = arith.addf %144, %137 : vector<64x8xf32>
    %c0_98 = arith.constant 0 : index
    %c0_99 = arith.constant 0 : index
    %146 = vector.load %arg14[%c0_98, %c0_99] : memref<8x24xf32, #tpu.memory_space<vmem>>, vector<8x24xf32>
    %cst_100 = arith.constant dense<0.000000e+00> : vector<64x24xf32>
    %147 = tpu.matmul %145, %146, %cst_100 {dimension_numbers = #tpu.dot_dimension_numbers<[1], [0], [0], [1], [0, 0, 1, 1], [], []>} : vector<64x8xf32>, vector<8x24xf32>, vector<64x24xf32> -> vector<64x24xf32>
    %c0_101 = arith.constant 0 : index
    %c0_102 = arith.constant 0 : index
    %148 = vector.load %arg15[%c0_101, %c0_102] : memref<1x24xf32, #tpu.memory_space<vmem>>, vector<1x24xf32>
    %149 = vector.broadcast %148 : vector<1x24xf32> to vector<64x24xf32>
    %150 = arith.addf %147, %149 : vector<64x24xf32>
    %151 = arith.negf %150 : vector<64x24xf32>
    %152 = math.exp %151 : vector<64x24xf32>
    %cst_103 = arith.constant 1.000000e+00 : f32
    %153 = vector.broadcast %cst_103 : f32 to vector<64x24xf32>
    %154 = arith.addf %153, %152 : vector<64x24xf32>
    %155 = arith.divf %153, %154 : vector<64x24xf32>
    %156 = arith.mulf %150, %155 : vector<64x24xf32>
    %157 = vector.shape_cast %156 : vector<64x24xf32> to vector<8x8x24xf32>
    %c2_104 = arith.constant 2 : index
    %c2_105 = arith.constant 2 : index
    %c0_106 = arith.constant 0 : index
    %158 = vector.load %arg26[%c2_104, %c2_105, %c0_106] : memref<12x12x24xf32, #tpu.memory_space<vmem>>, vector<8x8x24xf32>
    tpu.vector_store %arg26[%c2_104, %c2_105, %c0_106], %157 {strides = array<i32>} : memref<12x12x24xf32, #tpu.memory_space<vmem>>, vector<8x8x24xf32>,
    %cst_107 = arith.constant 0.000000e+00 : f32
    %159 = vector.broadcast %cst_107 : f32 to vector<2x12x24xf32>
    %c0_108 = arith.constant 0 : index
    %c0_109 = arith.constant 0 : index
    %c0_110 = arith.constant 0 : index
    %160 = vector.load %arg26[%c0_108, %c0_109, %c0_110] : memref<12x12x24xf32, #tpu.memory_space<vmem>>, vector<2x12x24xf32>
    tpu.vector_store %arg26[%c0_108, %c0_109, %c0_110], %159 {strides = array<i32>} : memref<12x12x24xf32, #tpu.memory_space<vmem>>, vector<2x12x24xf32>,
    %cst_111 = arith.constant 0.000000e+00 : f32
    %161 = vector.broadcast %cst_111 : f32 to vector<2x12x24xf32>
    %c10 = arith.constant 10 : index
    %c0_112 = arith.constant 0 : index
    %c0_113 = arith.constant 0 : index
    %162 = vector.load %arg26[%c10, %c0_112, %c0_113] : memref<12x12x24xf32, #tpu.memory_space<vmem>>, vector<2x12x24xf32>
    tpu.vector_store %arg26[%c10, %c0_112, %c0_113], %161 {strides = array<i32>} : memref<12x12x24xf32, #tpu.memory_space<vmem>>, vector<2x12x24xf32>,
    %cst_114 = arith.constant 0.000000e+00 : f32
    %163 = vector.broadcast %cst_114 : f32 to vector<8x2x24xf32>
    %c2_115 = arith.constant 2 : index
    %c0_116 = arith.constant 0 : index
    %c0_117 = arith.constant 0 : index
    %164 = vector.load %arg26[%c2_115, %c0_116, %c0_117] : memref<12x12x24xf32, #tpu.memory_space<vmem>>, vector<8x2x24xf32>
    tpu.vector_store %arg26[%c2_115, %c0_116, %c0_117], %163 {strides = array<i32>} : memref<12x12x24xf32, #tpu.memory_space<vmem>>, vector<8x2x24xf32>,
    %cst_118 = arith.constant 0.000000e+00 : f32
    %165 = vector.broadcast %cst_118 : f32 to vector<8x2x24xf32>
    %c2_119 = arith.constant 2 : index
    %c10_120 = arith.constant 10 : index
    %c0_121 = arith.constant 0 : index
    %166 = vector.load %arg26[%c2_119, %c10_120, %c0_121] : memref<12x12x24xf32, #tpu.memory_space<vmem>>, vector<8x2x24xf32>
    tpu.vector_store %arg26[%c2_119, %c10_120, %c0_121], %165 {strides = array<i32>} : memref<12x12x24xf32, #tpu.memory_space<vmem>>, vector<8x2x24xf32>,
    %c0_122 = arith.constant 0 : index
    %c0_123 = arith.constant 0 : index
    %167 = vector.load %arg16[%c0_122, %c0_123] : memref<25x24xf32, #tpu.memory_space<vmem>>, vector<25x24xf32>
    %cst_124 = arith.constant 0.000000e+00 : f32
    %168 = vector.broadcast %cst_124 : f32 to vector<8x8x24xf32>
    %c0_125 = arith.constant 0 : index
    %c0_126 = arith.constant 0 : index
    %c0_127 = arith.constant 0 : index
    %169 = vector.load %arg26[%c0_125, %c0_126, %c0_127] : memref<12x12x24xf32, #tpu.memory_space<vmem>>, vector<8x12x24xf32>
    %170 = vector.extract_strided_slice %169 {offsets = [0, 0, 0], sizes = [8, 8, 24], strides = [1, 1, 1]} : vector<8x12x24xf32> to vector<8x8x24xf32>
    %171 = vector.extract_strided_slice %167 {offsets = [0, 0], sizes = [1, 24], strides = [1, 1]} : vector<25x24xf32> to vector<1x24xf32>
    %172 = vector.shape_cast %171 : vector<1x24xf32> to vector<1x1x24xf32>
    %173 = vector.broadcast %172 : vector<1x1x24xf32> to vector<8x8x24xf32>
    %174 = arith.mulf %170, %173 : vector<8x8x24xf32>
    %175 = arith.addf %168, %174 : vector<8x8x24xf32>
    %176 = vector.extract_strided_slice %169 {offsets = [0, 1, 0], sizes = [8, 8, 24], strides = [1, 1, 1]} : vector<8x12x24xf32> to vector<8x8x24xf32>
    %177 = vector.extract_strided_slice %167 {offsets = [1, 0], sizes = [1, 24], strides = [1, 1]} : vector<25x24xf32> to vector<1x24xf32>
    %178 = vector.shape_cast %177 : vector<1x24xf32> to vector<1x1x24xf32>
    %179 = vector.broadcast %178 : vector<1x1x24xf32> to vector<8x8x24xf32>
    %180 = arith.mulf %176, %179 : vector<8x8x24xf32>
    %181 = arith.addf %175, %180 : vector<8x8x24xf32>
    %182 = vector.extract_strided_slice %169 {offsets = [0, 2, 0], sizes = [8, 8, 24], strides = [1, 1, 1]} : vector<8x12x24xf32> to vector<8x8x24xf32>
    %183 = vector.extract_strided_slice %167 {offsets = [2, 0], sizes = [1, 24], strides = [1, 1]} : vector<25x24xf32> to vector<1x24xf32>
    %184 = vector.shape_cast %183 : vector<1x24xf32> to vector<1x1x24xf32>
    %185 = vector.broadcast %184 : vector<1x1x24xf32> to vector<8x8x24xf32>
    %186 = arith.mulf %182, %185 : vector<8x8x24xf32>
    %187 = arith.addf %181, %186 : vector<8x8x24xf32>
    %188 = vector.extract_strided_slice %169 {offsets = [0, 3, 0], sizes = [8, 8, 24], strides = [1, 1, 1]} : vector<8x12x24xf32> to vector<8x8x24xf32>
    %189 = vector.extract_strided_slice %167 {offsets = [3, 0], sizes = [1, 24], strides = [1, 1]} : vector<25x24xf32> to vector<1x24xf32>
    %190 = vector.shape_cast %189 : vector<1x24xf32> to vector<1x1x24xf32>
    %191 = vector.broadcast %190 : vector<1x1x24xf32> to vector<8x8x24xf32>
    %192 = arith.mulf %188, %191 : vector<8x8x24xf32>
    %193 = arith.addf %187, %192 : vector<8x8x24xf32>
    %194 = vector.extract_strided_slice %169 {offsets = [0, 4, 0], sizes = [8, 8, 24], strides = [1, 1, 1]} : vector<8x12x24xf32> to vector<8x8x24xf32>
    %195 = vector.extract_strided_slice %167 {offsets = [4, 0], sizes = [1, 24], strides = [1, 1]} : vector<25x24xf32> to vector<1x24xf32>
    %196 = vector.shape_cast %195 : vector<1x24xf32> to vector<1x1x24xf32>
    %197 = vector.broadcast %196 : vector<1x1x24xf32> to vector<8x8x24xf32>
    %198 = arith.mulf %194, %197 : vector<8x8x24xf32>
    %199 = arith.addf %193, %198 : vector<8x8x24xf32>
    %c1_128 = arith.constant 1 : index
    %c0_129 = arith.constant 0 : index
    %c0_130 = arith.constant 0 : index
    %200 = vector.load %arg26[%c1_128, %c0_129, %c0_130] : memref<12x12x24xf32, #tpu.memory_space<vmem>>, vector<8x12x24xf32>
    %201 = vector.extract_strided_slice %200 {offsets = [0, 0, 0], sizes = [8, 8, 24], strides = [1, 1, 1]} : vector<8x12x24xf32> to vector<8x8x24xf32>
    %202 = vector.extract_strided_slice %167 {offsets = [5, 0], sizes = [1, 24], strides = [1, 1]} : vector<25x24xf32> to vector<1x24xf32>
    %203 = vector.shape_cast %202 : vector<1x24xf32> to vector<1x1x24xf32>
    %204 = vector.broadcast %203 : vector<1x1x24xf32> to vector<8x8x24xf32>
    %205 = arith.mulf %201, %204 : vector<8x8x24xf32>
    %206 = arith.addf %199, %205 : vector<8x8x24xf32>
    %207 = vector.extract_strided_slice %200 {offsets = [0, 1, 0], sizes = [8, 8, 24], strides = [1, 1, 1]} : vector<8x12x24xf32> to vector<8x8x24xf32>
    %208 = vector.extract_strided_slice %167 {offsets = [6, 0], sizes = [1, 24], strides = [1, 1]} : vector<25x24xf32> to vector<1x24xf32>
    %209 = vector.shape_cast %208 : vector<1x24xf32> to vector<1x1x24xf32>
    %210 = vector.broadcast %209 : vector<1x1x24xf32> to vector<8x8x24xf32>
    %211 = arith.mulf %207, %210 : vector<8x8x24xf32>
    %212 = arith.addf %206, %211 : vector<8x8x24xf32>
    %213 = vector.extract_strided_slice %200 {offsets = [0, 2, 0], sizes = [8, 8, 24], strides = [1, 1, 1]} : vector<8x12x24xf32> to vector<8x8x24xf32>
    %214 = vector.extract_strided_slice %167 {offsets = [7, 0], sizes = [1, 24], strides = [1, 1]} : vector<25x24xf32> to vector<1x24xf32>
    %215 = vector.shape_cast %214 : vector<1x24xf32> to vector<1x1x24xf32>
    %216 = vector.broadcast %215 : vector<1x1x24xf32> to vector<8x8x24xf32>
    %217 = arith.mulf %213, %216 : vector<8x8x24xf32>
    %218 = arith.addf %212, %217 : vector<8x8x24xf32>
    %219 = vector.extract_strided_slice %200 {offsets = [0, 3, 0], sizes = [8, 8, 24], strides = [1, 1, 1]} : vector<8x12x24xf32> to vector<8x8x24xf32>
    %220 = vector.extract_strided_slice %167 {offsets = [8, 0], sizes = [1, 24], strides = [1, 1]} : vector<25x24xf32> to vector<1x24xf32>
    %221 = vector.shape_cast %220 : vector<1x24xf32> to vector<1x1x24xf32>
    %222 = vector.broadcast %221 : vector<1x1x24xf32> to vector<8x8x24xf32>
    %223 = arith.mulf %219, %222 : vector<8x8x24xf32>
    %224 = arith.addf %218, %223 : vector<8x8x24xf32>
    %225 = vector.extract_strided_slice %200 {offsets = [0, 4, 0], sizes = [8, 8, 24], strides = [1, 1, 1]} : vector<8x12x24xf32> to vector<8x8x24xf32>
    %226 = vector.extract_strided_slice %167 {offsets = [9, 0], sizes = [1, 24], strides = [1, 1]} : vector<25x24xf32> to vector<1x24xf32>
    %227 = vector.shape_cast %226 : vector<1x24xf32> to vector<1x1x24xf32>
    %228 = vector.broadcast %227 : vector<1x1x24xf32> to vector<8x8x24xf32>
    %229 = arith.mulf %225, %228 : vector<8x8x24xf32>
    %230 = arith.addf %224, %229 : vector<8x8x24xf32>
    %c2_131 = arith.constant 2 : index
    %c0_132 = arith.constant 0 : index
    %c0_133 = arith.constant 0 : index
    %231 = vector.load %arg26[%c2_131, %c0_132, %c0_133] : memref<12x12x24xf32, #tpu.memory_space<vmem>>, vector<8x12x24xf32>
    %232 = vector.extract_strided_slice %231 {offsets = [0, 0, 0], sizes = [8, 8, 24], strides = [1, 1, 1]} : vector<8x12x24xf32> to vector<8x8x24xf32>
    %233 = vector.extract_strided_slice %167 {offsets = [10, 0], sizes = [1, 24], strides = [1, 1]} : vector<25x24xf32> to vector<1x24xf32>
    %234 = vector.shape_cast %233 : vector<1x24xf32> to vector<1x1x24xf32>
    %235 = vector.broadcast %234 : vector<1x1x24xf32> to vector<8x8x24xf32>
    %236 = arith.mulf %232, %235 : vector<8x8x24xf32>
    %237 = arith.addf %230, %236 : vector<8x8x24xf32>
    %238 = vector.extract_strided_slice %231 {offsets = [0, 1, 0], sizes = [8, 8, 24], strides = [1, 1, 1]} : vector<8x12x24xf32> to vector<8x8x24xf32>
    %239 = vector.extract_strided_slice %167 {offsets = [11, 0], sizes = [1, 24], strides = [1, 1]} : vector<25x24xf32> to vector<1x24xf32>
    %240 = vector.shape_cast %239 : vector<1x24xf32> to vector<1x1x24xf32>
    %241 = vector.broadcast %240 : vector<1x1x24xf32> to vector<8x8x24xf32>
    %242 = arith.mulf %238, %241 : vector<8x8x24xf32>
    %243 = arith.addf %237, %242 : vector<8x8x24xf32>
    %244 = vector.extract_strided_slice %231 {offsets = [0, 2, 0], sizes = [8, 8, 24], strides = [1, 1, 1]} : vector<8x12x24xf32> to vector<8x8x24xf32>
    %245 = vector.extract_strided_slice %167 {offsets = [12, 0], sizes = [1, 24], strides = [1, 1]} : vector<25x24xf32> to vector<1x24xf32>
    %246 = vector.shape_cast %245 : vector<1x24xf32> to vector<1x1x24xf32>
    %247 = vector.broadcast %246 : vector<1x1x24xf32> to vector<8x8x24xf32>
    %248 = arith.mulf %244, %247 : vector<8x8x24xf32>
    %249 = arith.addf %243, %248 : vector<8x8x24xf32>
    %250 = vector.extract_strided_slice %231 {offsets = [0, 3, 0], sizes = [8, 8, 24], strides = [1, 1, 1]} : vector<8x12x24xf32> to vector<8x8x24xf32>
    %251 = vector.extract_strided_slice %167 {offsets = [13, 0], sizes = [1, 24], strides = [1, 1]} : vector<25x24xf32> to vector<1x24xf32>
    %252 = vector.shape_cast %251 : vector<1x24xf32> to vector<1x1x24xf32>
    %253 = vector.broadcast %252 : vector<1x1x24xf32> to vector<8x8x24xf32>
    %254 = arith.mulf %250, %253 : vector<8x8x24xf32>
    %255 = arith.addf %249, %254 : vector<8x8x24xf32>
    %256 = vector.extract_strided_slice %231 {offsets = [0, 4, 0], sizes = [8, 8, 24], strides = [1, 1, 1]} : vector<8x12x24xf32> to vector<8x8x24xf32>
    %257 = vector.extract_strided_slice %167 {offsets = [14, 0], sizes = [1, 24], strides = [1, 1]} : vector<25x24xf32> to vector<1x24xf32>
    %258 = vector.shape_cast %257 : vector<1x24xf32> to vector<1x1x24xf32>
    %259 = vector.broadcast %258 : vector<1x1x24xf32> to vector<8x8x24xf32>
    %260 = arith.mulf %256, %259 : vector<8x8x24xf32>
    %261 = arith.addf %255, %260 : vector<8x8x24xf32>
    %c3 = arith.constant 3 : index
    %c0_134 = arith.constant 0 : index
    %c0_135 = arith.constant 0 : index
    %262 = vector.load %arg26[%c3, %c0_134, %c0_135] : memref<12x12x24xf32, #tpu.memory_space<vmem>>, vector<8x12x24xf32>
    %263 = vector.extract_strided_slice %262 {offsets = [0, 0, 0], sizes = [8, 8, 24], strides = [1, 1, 1]} : vector<8x12x24xf32> to vector<8x8x24xf32>
    %264 = vector.extract_strided_slice %167 {offsets = [15, 0], sizes = [1, 24], strides = [1, 1]} : vector<25x24xf32> to vector<1x24xf32>
    %265 = vector.shape_cast %264 : vector<1x24xf32> to vector<1x1x24xf32>
    %266 = vector.broadcast %265 : vector<1x1x24xf32> to vector<8x8x24xf32>
    %267 = arith.mulf %263, %266 : vector<8x8x24xf32>
    %268 = arith.addf %261, %267 : vector<8x8x24xf32>
    %269 = vector.extract_strided_slice %262 {offsets = [0, 1, 0], sizes = [8, 8, 24], strides = [1, 1, 1]} : vector<8x12x24xf32> to vector<8x8x24xf32>
    %270 = vector.extract_strided_slice %167 {offsets = [16, 0], sizes = [1, 24], strides = [1, 1]} : vector<25x24xf32> to vector<1x24xf32>
    %271 = vector.shape_cast %270 : vector<1x24xf32> to vector<1x1x24xf32>
    %272 = vector.broadcast %271 : vector<1x1x24xf32> to vector<8x8x24xf32>
    %273 = arith.mulf %269, %272 : vector<8x8x24xf32>
    %274 = arith.addf %268, %273 : vector<8x8x24xf32>
    %275 = vector.extract_strided_slice %262 {offsets = [0, 2, 0], sizes = [8, 8, 24], strides = [1, 1, 1]} : vector<8x12x24xf32> to vector<8x8x24xf32>
    %276 = vector.extract_strided_slice %167 {offsets = [17, 0], sizes = [1, 24], strides = [1, 1]} : vector<25x24xf32> to vector<1x24xf32>
    %277 = vector.shape_cast %276 : vector<1x24xf32> to vector<1x1x24xf32>
    %278 = vector.broadcast %277 : vector<1x1x24xf32> to vector<8x8x24xf32>
    %279 = arith.mulf %275, %278 : vector<8x8x24xf32>
    %280 = arith.addf %274, %279 : vector<8x8x24xf32>
    %281 = vector.extract_strided_slice %262 {offsets = [0, 3, 0], sizes = [8, 8, 24], strides = [1, 1, 1]} : vector<8x12x24xf32> to vector<8x8x24xf32>
    %282 = vector.extract_strided_slice %167 {offsets = [18, 0], sizes = [1, 24], strides = [1, 1]} : vector<25x24xf32> to vector<1x24xf32>
    %283 = vector.shape_cast %282 : vector<1x24xf32> to vector<1x1x24xf32>
    %284 = vector.broadcast %283 : vector<1x1x24xf32> to vector<8x8x24xf32>
    %285 = arith.mulf %281, %284 : vector<8x8x24xf32>
    %286 = arith.addf %280, %285 : vector<8x8x24xf32>
    %287 = vector.extract_strided_slice %262 {offsets = [0, 4, 0], sizes = [8, 8, 24], strides = [1, 1, 1]} : vector<8x12x24xf32> to vector<8x8x24xf32>
    %288 = vector.extract_strided_slice %167 {offsets = [19, 0], sizes = [1, 24], strides = [1, 1]} : vector<25x24xf32> to vector<1x24xf32>
    %289 = vector.shape_cast %288 : vector<1x24xf32> to vector<1x1x24xf32>
    %290 = vector.broadcast %289 : vector<1x1x24xf32> to vector<8x8x24xf32>
    %291 = arith.mulf %287, %290 : vector<8x8x24xf32>
    %292 = arith.addf %286, %291 : vector<8x8x24xf32>
    %c4 = arith.constant 4 : index
    %c0_136 = arith.constant 0 : index
    %c0_137 = arith.constant 0 : index
    %293 = vector.load %arg26[%c4, %c0_136, %c0_137] : memref<12x12x24xf32, #tpu.memory_space<vmem>>, vector<8x12x24xf32>
    %294 = vector.extract_strided_slice %293 {offsets = [0, 0, 0], sizes = [8, 8, 24], strides = [1, 1, 1]} : vector<8x12x24xf32> to vector<8x8x24xf32>
    %295 = vector.extract_strided_slice %167 {offsets = [20, 0], sizes = [1, 24], strides = [1, 1]} : vector<25x24xf32> to vector<1x24xf32>
    %296 = vector.shape_cast %295 : vector<1x24xf32> to vector<1x1x24xf32>
    %297 = vector.broadcast %296 : vector<1x1x24xf32> to vector<8x8x24xf32>
    %298 = arith.mulf %294, %297 : vector<8x8x24xf32>
    %299 = arith.addf %292, %298 : vector<8x8x24xf32>
    %300 = vector.extract_strided_slice %293 {offsets = [0, 1, 0], sizes = [8, 8, 24], strides = [1, 1, 1]} : vector<8x12x24xf32> to vector<8x8x24xf32>
    %301 = vector.extract_strided_slice %167 {offsets = [21, 0], sizes = [1, 24], strides = [1, 1]} : vector<25x24xf32> to vector<1x24xf32>
    %302 = vector.shape_cast %301 : vector<1x24xf32> to vector<1x1x24xf32>
    %303 = vector.broadcast %302 : vector<1x1x24xf32> to vector<8x8x24xf32>
    %304 = arith.mulf %300, %303 : vector<8x8x24xf32>
    %305 = arith.addf %299, %304 : vector<8x8x24xf32>
    %306 = vector.extract_strided_slice %293 {offsets = [0, 2, 0], sizes = [8, 8, 24], strides = [1, 1, 1]} : vector<8x12x24xf32> to vector<8x8x24xf32>
    %307 = vector.extract_strided_slice %167 {offsets = [22, 0], sizes = [1, 24], strides = [1, 1]} : vector<25x24xf32> to vector<1x24xf32>
    %308 = vector.shape_cast %307 : vector<1x24xf32> to vector<1x1x24xf32>
    %309 = vector.broadcast %308 : vector<1x1x24xf32> to vector<8x8x24xf32>
    %310 = arith.mulf %306, %309 : vector<8x8x24xf32>
    %311 = arith.addf %305, %310 : vector<8x8x24xf32>
    %312 = vector.extract_strided_slice %293 {offsets = [0, 3, 0], sizes = [8, 8, 24], strides = [1, 1, 1]} : vector<8x12x24xf32> to vector<8x8x24xf32>
    %313 = vector.extract_strided_slice %167 {offsets = [23, 0], sizes = [1, 24], strides = [1, 1]} : vector<25x24xf32> to vector<1x24xf32>
    %314 = vector.shape_cast %313 : vector<1x24xf32> to vector<1x1x24xf32>
    %315 = vector.broadcast %314 : vector<1x1x24xf32> to vector<8x8x24xf32>
    %316 = arith.mulf %312, %315 : vector<8x8x24xf32>
    %317 = arith.addf %311, %316 : vector<8x8x24xf32>
    %318 = vector.extract_strided_slice %293 {offsets = [0, 4, 0], sizes = [8, 8, 24], strides = [1, 1, 1]} : vector<8x12x24xf32> to vector<8x8x24xf32>
    %319 = vector.extract_strided_slice %167 {offsets = [24, 0], sizes = [1, 24], strides = [1, 1]} : vector<25x24xf32> to vector<1x24xf32>
    %320 = vector.shape_cast %319 : vector<1x24xf32> to vector<1x1x24xf32>
    %321 = vector.broadcast %320 : vector<1x1x24xf32> to vector<8x8x24xf32>
    %322 = arith.mulf %318, %321 : vector<8x8x24xf32>
    %323 = arith.addf %317, %322 : vector<8x8x24xf32>
    %c0_138 = arith.constant 0 : index
    %c0_139 = arith.constant 0 : index
    %324 = vector.load %arg17[%c0_138, %c0_139] : memref<1x24xf32, #tpu.memory_space<vmem>>, vector<1x24xf32>
    %325 = vector.shape_cast %324 : vector<1x24xf32> to vector<1x1x24xf32>
    %326 = vector.broadcast %325 : vector<1x1x24xf32> to vector<8x8x24xf32>
    %327 = arith.addf %323, %326 : vector<8x8x24xf32>
    %328 = arith.negf %327 : vector<8x8x24xf32>
    %329 = math.exp %328 : vector<8x8x24xf32>
    %cst_140 = arith.constant 1.000000e+00 : f32
    %330 = vector.broadcast %cst_140 : f32 to vector<8x8x24xf32>
    %331 = arith.addf %330, %329 : vector<8x8x24xf32>
    %332 = arith.divf %330, %331 : vector<8x8x24xf32>
    %333 = arith.mulf %327, %332 : vector<8x8x24xf32>
    %334 = vector.shape_cast %333 : vector<8x8x24xf32> to vector<64x24xf32>
    %cst_141 = arith.constant dense<0.000000e+00> : vector<24xf32>
    %335 = vector.multi_reduction <add>, %334, %cst_141 [0] : vector<64x24xf32> to vector<24xf32>
    %336 = vector.shape_cast %335 : vector<24xf32> to vector<1x24xf32>
    %cst_142 = arith.constant 6.400000e+01 : f32
    %337 = vector.broadcast %cst_142 : f32 to vector<1x24xf32>
    %338 = arith.divf %336, %337 : vector<1x24xf32>
    %c0_143 = arith.constant 0 : index
    %c0_144 = arith.constant 0 : index
    %339 = vector.load %arg18[%c0_143, %c0_144] : memref<2x24xf32, #tpu.memory_space<vmem>>, vector<2x24xf32>
    %340 = vector.broadcast %338 : vector<1x24xf32> to vector<2x24xf32>
    %341 = arith.mulf %340, %339 : vector<2x24xf32>
    %cst_145 = arith.constant dense<0.000000e+00> : vector<2xf32>
    %342 = vector.multi_reduction <add>, %341, %cst_145 [1] : vector<2x24xf32> to vector<2xf32>
    %343 = vector.shape_cast %342 : vector<2xf32> to vector<2x1xf32>
    %c0_146 = arith.constant 0 : index
    %c0_147 = arith.constant 0 : index
    %344 = vector.load %arg19[%c0_146, %c0_147] : memref<2x1xf32, #tpu.memory_space<vmem>>, vector<2x1xf32>
    %345 = arith.addf %343, %344 : vector<2x1xf32>
    %346 = arith.negf %345 : vector<2x1xf32>
    %347 = math.exp %346 : vector<2x1xf32>
    %cst_148 = arith.constant 1.000000e+00 : f32
    %348 = vector.broadcast %cst_148 : f32 to vector<2x1xf32>
    %349 = arith.addf %348, %347 : vector<2x1xf32>
    %350 = arith.divf %348, %349 : vector<2x1xf32>
    %351 = arith.mulf %345, %350 : vector<2x1xf32>
    %c0_149 = arith.constant 0 : index
    %c0_150 = arith.constant 0 : index
    %352 = vector.load %arg20[%c0_149, %c0_150] : memref<2x24xf32, #tpu.memory_space<vmem>>, vector<2x24xf32>
    %353 = vector.broadcast %351 : vector<2x1xf32> to vector<2x24xf32>
    %354 = arith.mulf %353, %352 : vector<2x24xf32>
    %cst_151 = arith.constant dense<0.000000e+00> : vector<24xf32>
    %355 = vector.multi_reduction <add>, %354, %cst_151 [0] : vector<2x24xf32> to vector<24xf32>
    %356 = vector.shape_cast %355 : vector<24xf32> to vector<1x24xf32>
    %c0_152 = arith.constant 0 : index
    %c0_153 = arith.constant 0 : index
    %357 = vector.load %arg21[%c0_152, %c0_153] : memref<1x24xf32, #tpu.memory_space<vmem>>, vector<1x24xf32>
    %358 = arith.addf %356, %357 : vector<1x24xf32>
    %359 = arith.negf %358 : vector<1x24xf32>
    %360 = math.exp %359 : vector<1x24xf32>
    %cst_154 = arith.constant 1.000000e+00 : f32
    %361 = vector.broadcast %cst_154 : f32 to vector<1x24xf32>
    %362 = arith.addf %361, %360 : vector<1x24xf32>
    %363 = arith.divf %361, %362 : vector<1x24xf32>
    %364 = vector.broadcast %363 : vector<1x24xf32> to vector<64x24xf32>
    %365 = arith.mulf %334, %364 : vector<64x24xf32>
    %c0_155 = arith.constant 0 : index
    %c0_156 = arith.constant 0 : index
    %366 = vector.load %arg22[%c0_155, %c0_156] : memref<24x8xf32, #tpu.memory_space<vmem>>, vector<24x8xf32>
    %cst_157 = arith.constant dense<0.000000e+00> : vector<64x8xf32>
    %367 = tpu.matmul %365, %366, %cst_157 {dimension_numbers = #tpu.dot_dimension_numbers<[1], [0], [0], [1], [0, 0, 1, 1], [], []>} : vector<64x24xf32>, vector<24x8xf32>, vector<64x8xf32> -> vector<64x8xf32>
    %c0_158 = arith.constant 0 : index
    %c0_159 = arith.constant 0 : index
    %368 = vector.load %arg23[%c0_158, %c0_159] : memref<1x8xf32, #tpu.memory_space<vmem>>, vector<1x8xf32>
    %369 = vector.broadcast %368 : vector<1x8xf32> to vector<64x8xf32>
    %370 = arith.addf %367, %369 : vector<64x8xf32>
    %371 = arith.addf %370, %145 : vector<64x8xf32>
    %372 = vector.shape_cast %371 : vector<64x8xf32> to vector<8x8x8xf32>
    %c0_160 = arith.constant 0 : index
    %c0_161 = arith.constant 0 : index
    %c0_162 = arith.constant 0 : index
    %c0_163 = arith.constant 0 : index
    %373 = vector.load %arg24[%c0_160, %c0_161, %c0_162, %c0_163] : memref<1x8x8x8xf32, #tpu.memory_space<vmem>>, vector<1x8x8x8xf32>
    %374 = vector.shape_cast %373 : vector<1x8x8x8xf32> to vector<8x8x8xf32>
    %375 = vector.shape_cast %372 : vector<8x8x8xf32> to vector<1x8x8x8xf32>
    tpu.vector_store %arg24[%c0_160, %c0_161, %c0_162, %c0_163], %375 {strides = array<i32>} : memref<1x8x8x8xf32, #tpu.memory_space<vmem>>, vector<1x8x8x8xf32>,
    return
  }
  func.func @transform_0(%arg0: i32) -> (i32, i32, i32, i32) {
    %c0_i32 = arith.constant 0 : i32
    %c0_i32_0 = arith.constant 0 : i32
    %c0_i32_1 = arith.constant 0 : i32
    %c0_i32_2 = arith.constant 0 : i32
    return %arg0, %c0_i32, %c0_i32_0, %c0_i32_1 : i32, i32, i32, i32
  }
  func.func @transform_1(%arg0: i32) -> (i32, i32) {
    %c0_i32 = arith.constant 0 : i32
    %c0_i32_0 = arith.constant 0 : i32
    %c0_i32_1 = arith.constant 0 : i32
    return %c0_i32, %c0_i32_0 : i32, i32
  }
  func.func @transform_2(%arg0: i32) -> (i32, i32) {
    %c0_i32 = arith.constant 0 : i32
    %c0_i32_0 = arith.constant 0 : i32
    %c0_i32_1 = arith.constant 0 : i32
    return %c0_i32, %c0_i32_0 : i32, i32
  }
  func.func @transform_3(%arg0: i32) -> (i32, i32) {
    %c0_i32 = arith.constant 0 : i32
    %c0_i32_0 = arith.constant 0 : i32
    %c0_i32_1 = arith.constant 0 : i32
    return %c0_i32, %c0_i32_0 : i32, i32
  }
  func.func @transform_4(%arg0: i32) -> (i32, i32) {
    %c0_i32 = arith.constant 0 : i32
    %c0_i32_0 = arith.constant 0 : i32
    %c0_i32_1 = arith.constant 0 : i32
    return %c0_i32, %c0_i32_0 : i32, i32
  }
  func.func @transform_5(%arg0: i32) -> (i32, i32) {
    %c0_i32 = arith.constant 0 : i32
    %c0_i32_0 = arith.constant 0 : i32
    %c0_i32_1 = arith.constant 0 : i32
    return %c0_i32, %c0_i32_0 : i32, i32
  }
  func.func @transform_6(%arg0: i32) -> (i32, i32) {
    %c0_i32 = arith.constant 0 : i32
    %c0_i32_0 = arith.constant 0 : i32
    %c0_i32_1 = arith.constant 0 : i32
    return %c0_i32, %c0_i32_0 : i32, i32
  }
  func.func @transform_7(%arg0: i32) -> (i32, i32) {
    %c0_i32 = arith.constant 0 : i32
    %c0_i32_0 = arith.constant 0 : i32
    %c0_i32_1 = arith.constant 0 : i32
    return %c0_i32, %c0_i32_0 : i32, i32
  }
  func.func @transform_8(%arg0: i32) -> (i32, i32) {
    %c0_i32 = arith.constant 0 : i32
    %c0_i32_0 = arith.constant 0 : i32
    %c0_i32_1 = arith.constant 0 : i32
    return %c0_i32, %c0_i32_0 : i32, i32
  }
  func.func @transform_9(%arg0: i32) -> (i32, i32) {
    %c0_i32 = arith.constant 0 : i32
    %c0_i32_0 = arith.constant 0 : i32
    %c0_i32_1 = arith.constant 0 : i32
    return %c0_i32, %c0_i32_0 : i32, i32
  }
  func.func @transform_10(%arg0: i32) -> (i32, i32) {
    %c0_i32 = arith.constant 0 : i32
    %c0_i32_0 = arith.constant 0 : i32
    %c0_i32_1 = arith.constant 0 : i32
    return %c0_i32, %c0_i32_0 : i32, i32
  }
  func.func @transform_11(%arg0: i32) -> (i32, i32) {
    %c0_i32 = arith.constant 0 : i32
    %c0_i32_0 = arith.constant 0 : i32
    %c0_i32_1 = arith.constant 0 : i32
    return %c0_i32, %c0_i32_0 : i32, i32
  }
  func.func @transform_12(%arg0: i32) -> (i32, i32) {
    %c0_i32 = arith.constant 0 : i32
    %c0_i32_0 = arith.constant 0 : i32
    %c0_i32_1 = arith.constant 0 : i32
    return %c0_i32, %c0_i32_0 : i32, i32
  }
  func.func @transform_13(%arg0: i32) -> (i32, i32) {
    %c0_i32 = arith.constant 0 : i32
    %c0_i32_0 = arith.constant 0 : i32
    %c0_i32_1 = arith.constant 0 : i32
    return %c0_i32, %c0_i32_0 : i32, i32
  }
  func.func @transform_14(%arg0: i32) -> (i32, i32) {
    %c0_i32 = arith.constant 0 : i32
    %c0_i32_0 = arith.constant 0 : i32
    %c0_i32_1 = arith.constant 0 : i32
    return %c0_i32, %c0_i32_0 : i32, i32
  }
  func.func @transform_15(%arg0: i32) -> (i32, i32) {
    %c0_i32 = arith.constant 0 : i32
    %c0_i32_0 = arith.constant 0 : i32
    %c0_i32_1 = arith.constant 0 : i32
    return %c0_i32, %c0_i32_0 : i32, i32
  }
  func.func @transform_16(%arg0: i32) -> (i32, i32) {
    %c0_i32 = arith.constant 0 : i32
    %c0_i32_0 = arith.constant 0 : i32
    %c0_i32_1 = arith.constant 0 : i32
    return %c0_i32, %c0_i32_0 : i32, i32
  }
  func.func @transform_17(%arg0: i32) -> (i32, i32) {
    %c0_i32 = arith.constant 0 : i32
    %c0_i32_0 = arith.constant 0 : i32
    %c0_i32_1 = arith.constant 0 : i32
    return %c0_i32, %c0_i32_0 : i32, i32
  }
  func.func @transform_18(%arg0: i32) -> (i32, i32) {
    %c0_i32 = arith.constant 0 : i32
    %c0_i32_0 = arith.constant 0 : i32
    %c0_i32_1 = arith.constant 0 : i32
    return %c0_i32, %c0_i32_0 : i32, i32
  }
  func.func @transform_19(%arg0: i32) -> (i32, i32) {
    %c0_i32 = arith.constant 0 : i32
    %c0_i32_0 = arith.constant 0 : i32
    %c0_i32_1 = arith.constant 0 : i32
    return %c0_i32, %c0_i32_0 : i32, i32
  }
  func.func @transform_20(%arg0: i32) -> (i32, i32) {
    %c0_i32 = arith.constant 0 : i32
    %c0_i32_0 = arith.constant 0 : i32
    %c0_i32_1 = arith.constant 0 : i32
    return %c0_i32, %c0_i32_0 : i32, i32
  }
  func.func @transform_21(%arg0: i32) -> (i32, i32) {
    %c0_i32 = arith.constant 0 : i32
    %c0_i32_0 = arith.constant 0 : i32
    %c0_i32_1 = arith.constant 0 : i32
    return %c0_i32, %c0_i32_0 : i32, i32
  }
  func.func @transform_22(%arg0: i32) -> (i32, i32) {
    %c0_i32 = arith.constant 0 : i32
    %c0_i32_0 = arith.constant 0 : i32
    %c0_i32_1 = arith.constant 0 : i32
    return %c0_i32, %c0_i32_0 : i32, i32
  }
  func.func @transform_23(%arg0: i32) -> (i32, i32, i32, i32) {
    %c0_i32 = arith.constant 0 : i32
    %c0_i32_0 = arith.constant 0 : i32
    %c0_i32_1 = arith.constant 0 : i32
    %c0_i32_2 = arith.constant 0 : i32
    return %arg0, %c0_i32, %c0_i32_0, %c0_i32_1 : i32, i32, i32, i32
  }
}

</mosaic_0001>

<bundles_post_ra>
// kernel: _lambda_.1
= control target key start
LH: loop header
LB: loop body
LE: loop exit
PB: predicated region body
PF: predicated region fallthrough
CT: control target
= control target key end

     0   :  { %s5329_s25 = smov 0   ;;  %s7479_s0 = inlined_call_operand.vmem [shape: f32[2,16,16,4], index: 0, kind: input, shape index: {}]   ;;  %s7480_s1 = inlined_call_operand.vmem [shape: f32[4,24], index: 1, kind: input, shape index: {}]   ;;  %s7481_s2 = inlined_call_operand.vmem [shape: f32[1,24], index: 2, kind: input, shape index: {}]   ;;  %s7482_s3 = inlined_call_operand.vmem [shape: f32[9,24], index: 3, kind: input, shape index: {}]   ;;  %s7483_s4 = inlined_call_operand.vmem [shape: f32[1,24], index: 4, kind: input, shape index: {}]   ;;  %s7484_s5 = inlined_call_operand.vmem [shape: f32[1,24], index: 5, kind: input, shape index: {}]   ;;  %s7485_s6 = inlined_call_operand.<no memory space> [shape: f32[1,1], index: 6, kind: input, shape index: {}]   ;;  %s7486_s7 = inlined_call_operand.vmem [shape: f32[1,24], index: 7, kind: input, shape index: {}]   ;;  %s7487_s8 = inlined_call_operand.vmem [shape: f32[1,24], index: 8, kind: input, shape index: {}]   ;;  %s7488_s9 = inlined_call_operand.vmem [shape: f32[24,8], index: 9, kind: input, shape index: {}]   ;;  %s7489_s10 = inlined_call_operand.vmem [shape: f32[1,8], index: 10, kind: input, shape index: {}]   ;;  %s7490_s11 = inlined_call_operand.vmem [shape: f32[4,8], index: 11, kind: input, shape index: {}]   ;;  %s7491_s12 = inlined_call_operand.vmem [shape: f32[1,8], index: 12, kind: input, shape index: {}]   ;;  %s7492_s13 = inlined_call_operand.vmem [shape: f32[8,24], index: 13, kind: input, shape index: {}]   ;;  %s7493_s14 = inlined_call_operand.vmem [shape: f32[1,24], index: 14, kind: input, shape index: {}]   ;;  %s7494_s15 = inlined_call_operand.vmem [shape: f32[25,24], index: 15, kind: input, shape index: {}]   ;;  %s7495_s16 = inlined_call_operand.vmem [shape: f32[1,24], index: 16, kind: input, shape index: {}]   ;;  %s7496_s17 = inlined_call_operand.vmem [shape: f32[2,24], index: 17, kind: input, shape index: {}]   ;;  %s7497_s18 = inlined_call_operand.vmem [shape: f32[2,1], index: 18, kind: input, shape index: {}]   ;;  %s7498_s19 = inlined_call_operand.vmem [shape: f32[2,24], index: 19, kind: input, shape index: {}]   ;;  %s7499_s20 = inlined_call_operand.vmem [shape: f32[1,24], index: 20, kind: input, shape index: {}]   ;;  %s7500_s21 = inlined_call_operand.vmem [shape: f32[24,8], index: 21, kind: input, shape index: {}]   ;;  %s7501_s22 = inlined_call_operand.vmem [shape: f32[1,8], index: 22, kind: input, shape index: {}]   ;;  %s7502_s23 = inlined_call_operand.vmem [shape: f32[2,8,8,8], index: 23, kind: output, shape index: {}]  }
   0x1   :  { %7553 = sst [smem:[#allocation56_spill]] %s7479_s0 }
   0x2   :  { %7554 = sst [smem:[#allocation57_spill]] %s7480_s1 }
   0x3   :  { %7555 = sst [smem:[#allocation58_spill]] %s7481_s2 }
   0x4   :  { %7556 = sst [smem:[#allocation59_spill]] %s7482_s3 }
   0x5   :  { %7557 = sst [smem:[#allocation60_spill]] %s7483_s4 }
   0x6   :  { %7558 = sst [smem:[#allocation61_spill]] %s7484_s5 }
   0x7   :  { %7559 = sst [smem:[#allocation62_spill]] %s7485_s6 }
   0x8   :  { %7560 = sst [smem:[#allocation63_spill]] %s7486_s7 }
   0x9   :  { %s7561_s24 = sld [smem:[#allocation62_spill]] }
   0xf   :  { %v28_v0 = vstv %s7561_s24 }
  0x10   :  { %29 = vst [vmem:[#allocation4] sm:$0x1] %v28_v0 }
  0x11 LB: > { %s4571_s5 = sadd.s32 4294967295, %s5202_s25   ;;  %p4575_p0 = scmp.ge.s32.totalorder %s5202_s25, 1  ;;  %s5202_s25 = sphi %s5329_s25, %s35_s25  }
  0x12   : > { %p639_p1 = scmp.lt.s32.totalorder %s5202_s25, 3 }
  0x14   : > { %p640_p2 = pnand %p4575_p0, %p639_p1 }
  0x16   : > { %643 = sbr.rel (%p640_p2) target bundleno = 2058 (0x80a), region = 112 }
  0x1b   : > { %s7562_s2 = sld [smem:[#allocation57_spill]]  ;;  %vm850_vm0 = vcmask 1043456   ;;  %p703_p3 = scmp.lt.s32.totalorder %s4571_s5, 1  ;;  %vm753_vm1 = vcmask 31744   ;;  %vm1304_vm2 = vcmask 195584   ;;  %v5204_v34 = vmov 0.0  }
  0x1c   : > { %s7563_s28 = sld [smem:[#allocation56_spill]]  ;;  %1337 = vst.msk [vmem:[#allocation2] sm:$0xff] %vm1304_vm2, %v5204_v34  ;;  %1338 = vst.msk [vmem:[#allocation2 + $0x8] sm:$0xff] %vm1304_vm2, %v5204_v34  ;;  %vm1345_vm3 = vcmask 188416   ;;  %vm1339_vm4 = vcmask 189440   ;;  %vm2228_vm5 = vcmask 64512  }
  0x1d   : > { %s7731_s5 = smov (!%p703_p3, %s4571_s5), 1  ;;  %2423 = vst.msk [vmem:[#allocation3] sm:$0xff] %vm1304_vm2, %v5204_v34  ;;  %2426 = vst.msk [vmem:[#allocation3 + $0x10] sm:$0xff] %vm1304_vm2, %v5204_v34  ;;  %s7564_s4 = sld [smem:[#allocation58_spill]]  ;;  %vm2424_vm6 = vcmask 191488   ;;  %vm2525_vm7 = vcmask 1046528  }
  0x1e   : > { %s4748_s6 = sshll.u32 %s7731_s5, 8  ;;  %2429 = vst.msk [vmem:[#allocation3 + $0xa0] sm:$0xff] %vm1304_vm2, %v5204_v34  ;;  %2431 = vst.msk [vmem:[#allocation3 + $0xb0] sm:$0xff] %vm1304_vm2, %v5204_v34  ;;  %s7566_s1 = sld [smem:[#allocation59_spill]]  ;;  %vm2602_vm8 = vcmask 1045504   ;;  %vm2679_vm9 = vcmask 1044480  }
  0x1f   : > { %1346 = vst.msk [vmem:[#allocation2 + $0x18] sm:$0x1] %vm1345_vm3, %v5204_v34  ;;  %1347 = vst.msk [vmem:[#allocation2 + $0x30] sm:$0x1] %vm1345_vm3, %v5204_v34  ;;  %s7568_s7 = sld [smem:[#allocation60_spill]]  ;;  %s4749_s30 = sshll.u32 %s7731_s5, 6 }
  0x20   : > { %1348 = vst.msk [vmem:[#allocation2 + $0x48] sm:$0x1] %vm1345_vm3, %v5204_v34  ;;  %1349 = vst.msk [vmem:[#allocation2 + $0x60] sm:$0x1] %vm1345_vm3, %v5204_v34  ;;  %s7569_s0 = sld [smem:[#allocation61_spill]] }
  0x21   : > { %v745_v1 = vld [vmem:[%s7562_s2] sm:$0xf]  ;;  %1350 = vst.msk [vmem:[#allocation2 + $0x78] sm:$0x1] %vm1345_vm3, %v5204_v34  ;;  %1351 = vst.msk [vmem:[#allocation2 + $0x90] sm:$0x1] %vm1345_vm3, %v5204_v34  ;;  %s712_s2 = scalar_lea.vmem %s7502_s23, %s4749_s30 }
  0x22   : > { %4823 = vmatprep.subr.msk.mxu0 %vm850_vm0, %v745_v1  ;;  %s5348_s29 = scalar_lea.vmem %s7563_s28, %s4748_s6  ;;  %1352 = vst.msk [vmem:[#allocation2 + $0xa8] sm:$0x1] %vm1345_vm3, %v5204_v34  ;;  %1353 = vst.msk [vmem:[#allocation2 + $0xc0] sm:$0x1] %vm1345_vm3, %v5204_v34 }
  0x23   : > { %4824 = vmatpush3.msk.msra.mxu0 %vm850_vm0, %v745_v1  ;;  %v713_v2 = vld [vmem:[%s5348_s29] sm:$0xff]  ;;  %v714_v3 = vld [vmem:[%s5348_s29 + $0x8] sm:$0xff]  ;;  %v715_v4 = vld [vmem:[%s5348_s29 + $0x10] sm:$0xff]  ;;  %1354 = vst.msk [vmem:[#allocation2 + $0xd8] sm:$0x1] %vm1345_vm3, %v5204_v34 }
  0x24   : > { %4825 = vmatprep.mubr.msk.f32.mxu0 %vm753_vm1, %v713_v2  ;;  %v716_v5 = vld [vmem:[%s5348_s29 + $0x18] sm:$0xff]  ;;  %v717_v6 = vld [vmem:[%s5348_s29 + $0x20] sm:$0xff]  ;;  %v718_v7 = vld [vmem:[%s5348_s29 + $0x28] sm:$0xff]  ;;  %1355 = vst.msk [vmem:[#allocation2 + $0xf0] sm:$0x1] %vm1345_vm3, %v5204_v34 }
  0x25   : > { %4826 = vmatmul.mubr.msk.f32.vlgmr.msra.gmra.mxu0 %vm753_vm1, %v714_v3  ;;  %v719_v8 = vld [vmem:[%s5348_s29 + $0x30] sm:$0xff]  ;;  %v720_v9 = vld [vmem:[%s5348_s29 + $0x38] sm:$0xff]  ;;  %v721_v10 = vld [vmem:[%s5348_s29 + $0x40] sm:$0xff]  ;;  %1356 = vst.msk [vmem:[#allocation2 + $0x108] sm:$0x1] %vm1345_vm3, %v5204_v34 }
  0x26   : > { %4828 = vmatprep.mubr.msk.f32.mxu0 %vm753_vm1, %v715_v4  ;;  %v722_v11 = vld [vmem:[%s5348_s29 + $0x48] sm:$0xff]  ;;  %v723_v12 = vld [vmem:[%s5348_s29 + $0x50] sm:$0xff]  ;;  %v724_v13 = vld [vmem:[%s5348_s29 + $0x58] sm:$0xff]  ;;  %1357 = vst.msk [vmem:[#allocation2 + $0x120] sm:$0x1] %vm1345_vm3, %v5204_v34 }
  0x27   : > { %v725_v14 = vld [vmem:[%s5348_s29 + $0x60] sm:$0xff]  ;;  %v726_v15 = vld [vmem:[%s5348_s29 + $0x68] sm:$0xff]  ;;  %v727_v16 = vld [vmem:[%s5348_s29 + $0x70] sm:$0xff]  ;;  %1358 = vst.msk [vmem:[#allocation2 + $0x138] sm:$0x1] %vm1345_vm3, %v5204_v34 }
  0x28   : > { %v728_v17 = vld [vmem:[%s5348_s29 + $0x78] sm:$0xff]  ;;  %v729_v18 = vld [vmem:[%s5348_s29 + $0x80] sm:$0xff]  ;;  %v730_v19 = vld [vmem:[%s5348_s29 + $0x88] sm:$0xff]  ;;  %1359 = vst.msk [vmem:[#allocation2 + $0x150] sm:$0x1] %vm1345_vm3, %v5204_v34 }
  0x29   : > { %4829 = vmatmul.mubr.msk.f32.gmra.mxu0 %vm753_vm1, %v716_v5  ;;  %v731_v20 = vld [vmem:[%s5348_s29 + $0x90] sm:$0xff]  ;;  %v732_v21 = vld [vmem:[%s5348_s29 + $0x98] sm:$0xff]  ;;  %v733_v22 = vld [vmem:[%s5348_s29 + $0xa0] sm:$0xff]  ;;  %1360 = vst.msk [vmem:[#allocation2 + $0x168] sm:$0x1] %vm1345_vm3, %v5204_v34 }
  0x2a   : > { %4831 = vmatprep.mubr.msk.f32.mxu0 %vm753_vm1, %v717_v6  ;;  %v734_v23 = vld [vmem:[%s5348_s29 + $0xa8] sm:$0xff]  ;;  %v735_v24 = vld [vmem:[%s5348_s29 + $0xb0] sm:$0xff]  ;;  %v736_v25 = vld [vmem:[%s5348_s29 + $0xb8] sm:$0xff]  ;;  %1361 = vst.msk [vmem:[#allocation2 + $0x180] sm:$0x1] %vm1345_vm3, %v5204_v34 }
  0x2b   : > { %v737_v26 = vld [vmem:[%s5348_s29 + $0xc0] sm:$0xff]  ;;  %v738_v27 = vld [vmem:[%s5348_s29 + $0xc8] sm:$0xff]  ;;  %v739_v28 = vld [vmem:[%s5348_s29 + $0xd0] sm:$0xff]  ;;  %1340 = vst.msk [vmem:[#allocation2 + $0x10] sm:$0x3] %vm1339_vm4, %v5204_v34 }
  0x2c   : > { %v740_v29 = vld [vmem:[%s5348_s29 + $0xd8] sm:$0xff]  ;;  %v741_v30 = vld [vmem:[%s5348_s29 + $0xe0] sm:$0xff]  ;;  %v742_v31 = vld [vmem:[%s5348_s29 + $0xe8] sm:$0xff]  ;;  %2433 = vst.msk [vmem:[#allocation3 + $0x20] sm:$0x3] %vm1339_vm4, %v5204_v34 }
  0x2d   : > { %4832 = vmatmul.mubr.msk.f32.gmra.mxu0 %vm753_vm1, %v718_v7  ;;  %v743_v32 = vld [vmem:[%s5348_s29 + $0xf0] sm:$0xff]  ;;  %v744_v33 = vld [vmem:[%s5348_s29 + $0xf8] sm:$0xff]  ;;  %2434 = vst.msk [vmem:[#allocation3 + $0x30] sm:$0x3] %vm1339_vm4, %v5204_v34  ;;  %2435 = vst.msk [vmem:[#allocation3 + $0x40] sm:$0x3] %vm1339_vm4, %v5204_v34 }
  0x2e   : > { %4834 = vmatprep.mubr.msk.f32.mxu0 %vm753_vm1, %v719_v8  ;;  %2436 = vst.msk [vmem:[#allocation3 + $0x50] sm:$0x3] %vm1339_vm4, %v5204_v34  ;;  %2437 = vst.msk [vmem:[#allocation3 + $0x60] sm:$0x3] %vm1339_vm4, %v5204_v34  ;;  %v5495_v35 = vld [vmem:[%s7564_s4] ss:$0 sm:$0xff] }
  0x2f   : > { %2438 = vst.msk [vmem:[#allocation3 + $0x70] sm:$0x3] %vm1339_vm4, %v5204_v34  ;;  %2439 = vst.msk [vmem:[#allocation3 + $0x80] sm:$0x3] %vm1339_vm4, %v5204_v34  ;;  %s7570_s4 = sld [smem:[#allocation63_spill]] }
  0x30   : > { %2440 = vst.msk [vmem:[#allocation3 + $0x90] sm:$0x3] %vm1339_vm4, %v5204_v34  ;;  %2441 = vst.msk [vmem:[#allocation3 + $0x2a] sm:$0x3] %vm1339_vm4, %v5204_v34 }
  0x31   : > { %4835 = vmatmul.mubr.msk.f32.gmra.mxu0 %vm753_vm1, %v720_v9  ;;  %2442 = vst.msk [vmem:[#allocation3 + $0x3a] sm:$0x3] %vm1339_vm4, %v5204_v34  ;;  %2443 = vst.msk [vmem:[#allocation3 + $0x4a] sm:$0x3] %vm1339_vm4, %v5204_v34 }
  0x32   : > { %4837 = vmatprep.mubr.msk.f32.mxu0 %vm753_vm1, %v721_v10  ;;  %2444 = vst.msk [vmem:[#allocation3 + $0x5a] sm:$0x3] %vm1339_vm4, %v5204_v34  ;;  %2445 = vst.msk [vmem:[#allocation3 + $0x6a] sm:$0x3] %vm1339_vm4, %v5204_v34 }
  0x33   : > { %2446 = vst.msk [vmem:[#allocation3 + $0x7a] sm:$0x3] %vm1339_vm4, %v5204_v34  ;;  %2447 = vst.msk [vmem:[#allocation3 + $0x8a] sm:$0x3] %vm1339_vm4, %v5204_v34 }
  0x34   : > { %2448 = vst.msk [vmem:[#allocation3 + $0x9a] sm:$0x3] %vm1339_vm4, %v5204_v34 }
  0x35   : > { %4838 = vmatmul.mubr.msk.f32.gmra.mxu0 %vm753_vm1, %v722_v11  ;;  %2425 = vst.msk [vmem:[#allocation3 + $0x8] sm:$0xf] %vm2424_vm6, %v5204_v34  ;;  %2427 = vst.msk [vmem:[#allocation3 + $0x18] sm:$0xf] %vm2424_vm6, %v5204_v34 }
  0x36   : > { %4840 = vmatprep.mubr.msk.f32.mxu0 %vm753_vm1, %v723_v12  ;;  %2430 = vst.msk [vmem:[#allocation3 + $0xa8] sm:$0xf] %vm2424_vm6, %v5204_v34  ;;  %2432 = vst.msk [vmem:[#allocation3 + $0xb8] sm:$0xf] %vm2424_vm6, %v5204_v34 }
  0x39   : > { %4841 = vmatmul.mubr.msk.f32.gmra.mxu0 %vm753_vm1, %v724_v13 }
  0x3a   : > { %4843 = vmatprep.mubr.msk.f32.mxu0 %vm753_vm1, %v725_v14 }
  0x3d   : > { %4844 = vmatmul.mubr.msk.f32.gmra.mxu0 %vm753_vm1, %v726_v15 }
  0x3e   : > { %4846 = vmatprep.mubr.msk.f32.mxu0 %vm753_vm1, %v727_v16 }
  0x41   : > { %4847 = vmatmul.mubr.msk.f32.gmra.mxu0 %vm753_vm1, %v728_v17 }
  0x42   : > { %4849 = vmatprep.mubr.msk.f32.mxu0 %vm753_vm1, %v729_v18 }
  0x45   : > { %4850 = vmatmul.mubr.msk.f32.gmra.mxu0 %vm753_vm1, %v730_v19  ;;  %v1395_v19 = vlaneseq }
  0x46   : > { %4852 = vmatprep.mubr.msk.f32.mxu0 %vm753_vm1, %v731_v20 }
  0x49   : > { %4853 = vmatmul.mubr.msk.f32.gmra.mxu0 %vm753_vm1, %v732_v21 }
  0x4a   : > { %4855 = vmatprep.mubr.msk.f32.mxu0 %vm753_vm1, %v733_v22 }
  0x4d   : > { %4856 = vmatmul.mubr.msk.f32.gmra.mxu0 %vm753_vm1, %v734_v23 }
  0x4e   : > { %4858 = vmatprep.mubr.msk.f32.mxu0 %vm753_vm1, %v735_v24 }
  0x51   : > { %4859 = vmatmul.mubr.msk.f32.gmra.mxu0 %vm753_vm1, %v736_v25 }
  0x52   : > { %4861 = vmatprep.mubr.msk.f32.mxu0 %vm753_vm1, %v737_v26 }
  0x55   : > { %4862 = vmatmul.mubr.msk.f32.gmra.mxu0 %vm753_vm1, %v738_v27 }
  0x56   : > { %4864 = vmatprep.mubr.msk.f32.mxu0 %vm753_vm1, %v739_v28 }
  0x59   : > { %4865 = vmatmul.mubr.msk.f32.gmra.mxu0 %vm753_vm1, %v740_v29 }
  0x5a   : > { %4867 = vmatprep.mubr.msk.f32.mxu0 %vm753_vm1, %v741_v30  ;;  %v5556_v30 = vshrl.u32 %v1395_v19, 7 }
  0x5d   : > { %4868 = vmatmul.mubr.msk.f32.gmra.mxu0 %vm753_vm1, %v742_v31 }
  0x5e   : > { %4870 = vmatprep.mubr.msk.f32.mxu0 %vm753_vm1, %v743_v32 }
  0x61   : > { %4871 = vmatmul.mubr.msk.f32.gmra.mxu0 %vm753_vm1, %v744_v33 }
  0xe5   : > { %v4827_v36 = vpop.f32.mrf.mxu0 }
  0xe6   : > { %v5498_v37 = vadd.f32 %v4827_v36, %v5495_v35 }
  0xe7   : > { %v920_v38 = vpop.f32.mrf.mxu0 }
  0xe8   : > { %v4615_v39 = vmul.f32 -1.442695, %v5498_v37  ;;  %v5502_v40 = vadd.f32 %v5495_v35, %v920_v38 }
  0xe9   : > { %v4830_v41 = vpop.f32.mrf.mxu0 }
  0xea   : > { %4949 = vpow2.f32 %v4615_v39  ;;  %v4614_v42 = vmul.f32 -1.442695, %v5502_v40  ;;  %v5506_v43 = vadd.f32 %v4830_v41, %v5495_v35 }
  0xeb   : > { %v930_v44 = vpop.f32.mrf.mxu0 }
  0xec   : > { %4951 = vpow2.f32 %v4614_v42  ;;  %v4617_v45 = vmul.f32 -1.442695, %v5506_v43  ;;  %v5510_v46 = vadd.f32 %v5495_v35, %v930_v44 }
  0xed   : > { %v4833_v47 = vpop.f32.mrf.mxu0 }
  0xee   : > { %4953 = vpow2.f32 %v4617_v45  ;;  %v4616_v48 = vmul.f32 -1.442695, %v5510_v46  ;;  %v5514_v49 = vadd.f32 %v4833_v47, %v5495_v35  ;;  %v5567_v47 = vsub.s32 0, %v5556_v30 }
  0xef   : > { %v940_v50 = vpop.f32.mrf.mxu0 }
  0xf0   : > { %4955 = vpow2.f32 %v4616_v48  ;;  %v4619_v51 = vmul.f32 -1.442695, %v5514_v49  ;;  %v5518_v52 = vadd.f32 %v5495_v35, %v940_v50  ;;  %7565 = vst [vmem:[#allocation5_spill] sm:$0xff] %v5567_v47  ;;  %v5570_v48 = vsub.s32 1, %v5556_v30 }
  0xf1   : > { %v4836_v53 = vpop.f32.mrf.mxu0 }
  0xf2   : > { %4957 = vpow2.f32 %v4619_v51  ;;  %v4618_v54 = vmul.f32 -1.442695, %v5518_v52  ;;  %v5522_v55 = vadd.f32 %v4836_v53, %v5495_v35 }
  0xf3   : > { %v950_v56 = vpop.f32.mrf.mxu0 }
  0xf4   : > { %4959 = vpow2.f32 %v4618_v54  ;;  %v4621_v57 = vmul.f32 -1.442695, %v5522_v55  ;;  %v5526_v58 = vadd.f32 %v5495_v35, %v950_v56  ;;  %v5576_v54 = vld [vmem:[%s7566_s1] sm:$0xff] }
  0xf5   : > { %v4839_v59 = vpop.f32.mrf.mxu0 }
  0xf6   : > { %4961 = vpow2.f32 %v4621_v57  ;;  %v4620_v60 = vmul.f32 -1.442695, %v5526_v58  ;;  %v5530_v61 = vadd.f32 %v4839_v59, %v5495_v35 }
  0xf7   : > { %v4950_v62 = vpop.eup %4949  ;;  %v960_v63 = vpop.f32.mrf.mxu0 }
  0xf8   : > { %v1176_v0 = vadd.f32 1.0, %v4950_v62  ;;  %4963 = vpow2.f32 %v4620_v60  ;;  %v4623_v1 = vmul.f32 -1.442695, %v5530_v61  ;;  %v5534_v2 = vadd.f32 %v5495_v35, %v960_v63 }
  0xf9   : > { %v4952_v3 = vpop.eup %4951  ;;  %v4842_v4 = vpop.f32.mrf.mxu0  ;;  %v5583_v60 = vsub.s32 2, %v5556_v30 }
  0xfa   : > { %4965 = vrcp.f32 %v1176_v0  ;;  %v1175_v5 = vadd.f32 1.0, %v4952_v3  ;;  %v4622_v6 = vmul.f32 -1.442695, %v5534_v2  ;;  %v5538_v7 = vadd.f32 %v4842_v4, %v5495_v35 }
  0xfb   : > { %v4954_v8 = vpop.eup %4953  ;;  %4967 = vpow2.f32 %v4623_v1  ;;  %v970_v9 = vpop.f32.mrf.mxu0  ;;  %v5610_v19 = vrot.slane %v5576_v54, %v5583_v60 }
  0xfc   : > { %4969 = vrcp.f32 %v1175_v5  ;;  %v1178_v10 = vadd.f32 1.0, %v4954_v8  ;;  %v4625_v11 = vmul.f32 -1.442695, %v5538_v7  ;;  %v5542_v12 = vadd.f32 %v5495_v35, %v970_v9 }
  0xfd   : > { %v4956_v13 = vpop.eup %4955  ;;  %4971 = vpow2.f32 %v4622_v6  ;;  %v4845_v14 = vpop.f32.mrf.mxu0  ;;  %v5593_v5 = vrot.slane %v5576_v54, %v5567_v47  ;;  %v5597_v6 = vrot.slane %v5576_v54, %v5570_v48 }
  0xfe   : > { %4973 = vrcp.f32 %v1178_v10  ;;  %v1177_v15 = vadd.f32 1.0, %v4956_v13  ;;  %v4624_v16 = vmul.f32 -1.442695, %v5542_v12  ;;  %v5546_v17 = vadd.f32 %v4845_v14, %v5495_v35  ;;  %v1380_v14 = vld [vmem:[#allocation2] ss:$2 sm:$0xff] }
  0xff   : > { %v4958_v18 = vpop.eup %4957  ;;  %4975 = vpow2.f32 %v4625_v11  ;;  %v980_v20 = vpop.f32.mrf.mxu0 }
 0x100   : > { %4977 = vrcp.f32 %v1177_v15  ;;  %v1180_v21 = vadd.f32 1.0, %v4958_v18  ;;  %v4627_v22 = vmul.f32 -1.442695, %v5546_v17  ;;  %v5550_v23 = vadd.f32 %v5495_v35, %v980_v20  ;;  %v1416_v15 = vld [vmem:[#allocation2 + $0x1] ss:$2 sm:$0xff] }
 0x101   : > { %v4960_v24 = vpop.eup %4959  ;;  %4979 = vpow2.f32 %v4624_v16  ;;  %v4848_v25 = vpop.f32.mrf.mxu0  ;;  %v5606_v18 = vsub.s32 3, %v5556_v30 }
 0x102   : > { %4981 = vrcp.f32 %v1180_v21  ;;  %v1179_v26 = vadd.f32 1.0, %v4960_v24  ;;  %v4626_v27 = vmul.f32 -1.442695, %v5550_v23  ;;  %v5554_v28 = vadd.f32 %v4848_v25, %v5495_v35 }
 0x103   : > { %v4962_v29 = vpop.eup %4961  ;;  %4983 = vpow2.f32 %v4627_v22  ;;  %v990_v31 = vpop.f32.mrf.mxu0 }
 0x104   : > { %4985 = vrcp.f32 %v1179_v26  ;;  %v1182_v32 = vadd.f32 1.0, %v4962_v29  ;;  %v4629_v33 = vmul.f32 -1.442695, %v5554_v28  ;;  %v5560_v36 = vadd.f32 %v5495_v35, %v990_v31  ;;  %v1452_v26 = vld [vmem:[#allocation2 + $0x2] ss:$2 sm:$0xff] }
 0x105   : > { %v4964_v38 = vpop.eup %4963  ;;  %4987 = vpow2.f32 %v4626_v27  ;;  %v4851_v39 = vpop.f32.mrf.mxu0 }
 0x106   : > { %4989 = vrcp.f32 %v1182_v32  ;;  %v1181_v41 = vadd.f32 1.0, %v4964_v38  ;;  %v4628_v42 = vmul.f32 -1.442695, %v5560_v36  ;;  %v5564_v44 = vadd.f32 %v4851_v39, %v5495_v35 }
 0x107   : > { %v4966_v45 = vpop.eup %4965  ;;  %4991 = vpow2.f32 %v4629_v33  ;;  %v1000_v50 = vpop.f32.mrf.mxu0  ;;  %v1399_v32 = vmul.f32 %v5593_v5, %v1380_v14  ;;  %v1435_v33 = vmul.f32 %v5597_v6, %v1416_v15 }
 0x108   : > { %v4968_v51 = vpop.eup %4967  ;;  %v1272_v53 = vmul.f32 %v4966_v45, %v5498_v37  ;;  %4993 = vrcp.f32 %v1181_v41  ;;  %v4631_v56 = vmul.f32 -1.442695, %v5564_v44  ;;  %v5580_v57 = vadd.f32 %v5495_v35, %v1000_v50 }
 0x109   : > { %v4970_v59 = vpop.eup %4969  ;;  %v1184_v62 = vadd.f32 1.0, %v4968_v51  ;;  %4995 = vpow2.f32 %v4628_v42  ;;  %v4854_v63 = vpop.f32.mrf.mxu0  ;;  %v5627_v45 = vsub.s32 4, %v5556_v30 }
 0x10a   : > { %v4972_v0 = vpop.eup %4971  ;;  %1306 = vst.msk [vmem:[#allocation2 + $0x21] sm:$0xff] %vm1304_vm2, %v1272_v53  ;;  %v1271_v37 = vmul.f32 %v4970_v59, %v5502_v40  ;;  %4997 = vpow2.f32 %v4631_v56  ;;  %v4630_v1 = vmul.f32 -1.442695, %v5580_v57  ;;  %v5589_v3 = vadd.f32 %v4854_v63, %v5495_v35 }
 0x10b   : > { %v4974_v4 = vpop.eup %4973  ;;  %4999 = vrcp.f32 %v1184_v62  ;;  %v1183_v8 = vadd.f32 1.0, %v4972_v0  ;;  %v1010_v9 = vpop.f32.mrf.mxu0  ;;  %7567 = vst [vmem:[#allocation6_spill] sm:$0xff] %v5627_v45  ;;  %v1471_v53 = vmul.f32 %v5610_v19, %v1452_v26 }
 0x10c   : > { %v4976_v10 = vpop.eup %4975  ;;  %1305 = vst.msk [vmem:[#allocation2 + $0x19] sm:$0xff] %vm1304_vm2, %v1271_v37  ;;  %v1274_v40 = vmul.f32 %v4974_v4, %v5506_v43  ;;  %5001 = vpow2.f32 %v4630_v1  ;;  %v4633_v11 = vmul.f32 -1.442695, %v5589_v3  ;;  %v5603_v13 = vadd.f32 %v5495_v35, %v1010_v9 }
 0x10d   : > { %v4978_v16 = vpop.eup %4977  ;;  %5003 = vrcp.f32 %v1183_v8  ;;  %v1186_v20 = vadd.f32 1.0, %v4976_v10  ;;  %v4857_v21 = vpop.f32.mrf.mxu0  ;;  %v1443_v37 = vadd.f32 %v1435_v33, %v1399_v32  ;;  %v5637_v1 = vsub.s32 5, %v5556_v30 }
 0x10e   : > { %v4980_v43 = vpop.eup %4979  ;;  %1308 = vst.msk [vmem:[#allocation2 + $0x39] sm:$0xff] %vm1304_vm2, %v1274_v40  ;;  %v1273_v22 = vmul.f32 %v4978_v16, %v5510_v46  ;;  %5005 = vpow2.f32 %v4633_v11  ;;  %v4632_v24 = vmul.f32 -1.442695, %v5603_v13  ;;  %v5616_v25 = vadd.f32 %v4857_v21, %v5495_v35 }
 0x10f   : > { %v4982_v27 = vpop.eup %4981  ;;  %5007 = vrcp.f32 %v1186_v20  ;;  %v1185_v29 = vadd.f32 1.0, %v4980_v43  ;;  %v1020_v31 = vpop.f32.mrf.mxu0  ;;  %v5640_v4 = vsub.s32 6, %v5556_v30  ;;  %v5654_v43 = vrot.slane %v5576_v54, %v5627_v45 }
 0x110   : > { %v4984_v38 = vpop.eup %4983  ;;  %1307 = vst.msk [vmem:[#allocation2 + $0x31] sm:$0xff] %vm1304_vm2, %v1273_v22  ;;  %v1276_v46 = vmul.f32 %v4982_v27, %v5514_v49  ;;  %5009 = vpow2.f32 %v4632_v24  ;;  %v4635_v39 = vmul.f32 -1.442695, %v5616_v25  ;;  %v5624_v41 = vadd.f32 %v5495_v35, %v1020_v31 }
 0x111   : > { %v4986_v42 = vpop.eup %4985  ;;  %5011 = vrcp.f32 %v1185_v29  ;;  %v1188_v50 = vadd.f32 1.0, %v4984_v38  ;;  %v4860_v51 = vpop.f32.mrf.mxu0  ;;  %v1479_v31 = vadd.f32 %v1471_v53, %v1443_v37  ;;  %v5663_v32 = vrot.slane %v5576_v54, %v5637_v1 }
 0x112   : > { %v4988_v56 = vpop.eup %4987  ;;  %1310 = vst.msk [vmem:[#allocation2 + $0x51] sm:$0xff] %vm1304_vm2, %v1276_v46  ;;  %v1275_v49 = vmul.f32 %v4986_v42, %v5518_v52  ;;  %5013 = vpow2.f32 %v4635_v39  ;;  %v4634_v59 = vmul.f32 -1.442695, %v5624_v41  ;;  %v5634_v62 = vadd.f32 %v4860_v51, %v5495_v35 }
 0x113   : > { %v4990_v63 = vpop.eup %4989  ;;  %5015 = vrcp.f32 %v1188_v50  ;;  %v1030_v0 = vpop.f32.mrf.mxu0  ;;  %v5644_v52 = vrot.slane %v5576_v54, %v5606_v18  ;;  %v1187_v10 = vadd.f32 1.0, %v4988_v56  ;;  %v1487_v11 = vld [vmem:[#allocation2 + $0x18] ss:$2 sm:$0xff]  ;;  %v5667_v33 = vrot.slane %v5576_v54, %v5640_v4 }
 0x114   : > { %v4992_v8 = vpop.eup %4991  ;;  %1309 = vst.msk [vmem:[#allocation2 + $0x49] sm:$0xff] %vm1304_vm2, %v1275_v49  ;;  %v1278_v9 = vmul.f32 %v4990_v63, %v5522_v55  ;;  %5017 = vpow2.f32 %v4634_v59  ;;  %v4637_v15 = vmul.f32 -1.442695, %v5634_v62  ;;  %v5650_v16 = vadd.f32 %v5495_v35, %v1030_v0 }
 0x115   : > { %v4994_v40 = vpop.eup %4993  ;;  %v1190_v14 = vadd.f32 1.0, %v4992_v8  ;;  %v4863_v20 = vpop.f32.mrf.mxu0  ;;  %5019 = vrcp.f32 %v1187_v10 }
 0x116   : > { %v4996_v21 = vpop.eup %4995  ;;  %1312 = vst.msk [vmem:[#allocation2 + $0x69] sm:$0xff] %vm1304_vm2, %v1278_v9  ;;  %v1277_v55 = vmul.f32 %v4994_v40, %v5526_v58  ;;  %v5659_v22 = vadd.f32 %v4863_v20, %v5495_v35  ;;  %v1506_v58 = vmul.f32 %v5644_v52, %v1487_v11  ;;  %v4636_v49 = vmul.f32 -1.442695, %v5650_v16 }
 0x117   : > { %v4998_v24 = vpop.eup %4997  ;;  %v1382_v26 = vld [vmem:[#allocation2 + $0x30] ss:$2 sm:$0xff]  ;;  %v1418_v27 = vld [vmem:[#allocation2 + $0x31] ss:$2 sm:$0xff]  ;;  %5021 = vrcp.f32 %v1190_v14  ;;  %v1040_v29 = vpop.f32.mrf.mxu0  ;;  %v1189_v42 = vadd.f32 1.0, %v4996_v21  ;;  %v5688_v21 = vsub.s32 7, %v5556_v30 }
 0x118   : > { %v5000_v38 = vpop.eup %4999  ;;  %v1400_v46 = vmul.f32 %v5593_v5, %v1382_v26  ;;  %v1436_v39 = vmul.f32 %v5597_v6, %v1418_v27  ;;  %1311 = vst.msk [vmem:[#allocation2 + $0x61] sm:$0xff] %vm1304_vm2, %v1277_v55  ;;  %v1454_v51 = vld [vmem:[#allocation2 + $0x32] ss:$2 sm:$0xff]  ;;  %v1192_v56 = vadd.f32 1.0, %v4998_v24  ;;  %5023 = vpow2.f32 %v4637_v15 }
 0x119   : > { %v5002_v50 = vpop.eup %5001  ;;  %v1280_v53 = vmul.f32 %v5000_v38, %v5530_v61  ;;  %v4866_v59 = vpop.f32.mrf.mxu0  ;;  %5025 = vrcp.f32 %v1189_v42  ;;  %v4639_v8 = vmul.f32 -1.442695, %v5659_v22  ;;  %v5679_v40 = vadd.f32 %v5495_v35, %v1040_v29 }
 0x11a   : > { %v5004_v63 = vpop.eup %5003  ;;  %v1444_v0 = vadd.f32 %v1436_v39, %v1400_v46  ;;  %v1191_v37 = vadd.f32 1.0, %v5002_v50  ;;  %5027 = vrcp.f32 %v1192_v56  ;;  %v5682_v61 = vadd.f32 %v4866_v59, %v5495_v35 }
 0x11b   : > { %v5006_v9 = vpop.eup %5005  ;;  %1314 = vst.msk [vmem:[#allocation2 + $0x81] sm:$0xff] %vm1304_vm2, %v1280_v53  ;;  %v1279_v10 = vmul.f32 %v5004_v63, %v5534_v2  ;;  %v1050_v11 = vpop.f32.mrf.mxu0  ;;  %v1472_v15 = vmul.f32 %v5610_v19, %v1454_v51  ;;  %v5685_v20 = vadd.f32 %v1506_v58, %v1479_v31  ;;  %v1489_v24 = vld [vmem:[#allocation2 + $0x48] ss:$2 sm:$0xff]  ;;  %v4638_v27 = vmul.f32 -1.442695, %v5679_v40 }
 0x11c   : > { %v5008_v14 = vpop.eup %5007  ;;  %5029 = vrcp.f32 %v1191_v37  ;;  %v1194_v26 = vadd.f32 1.0, %v5006_v9  ;;  %v4641_v31 = vmul.f32 -1.442695, %v5682_v61  ;;  %v5695_v58 = vadd.f32 %v5495_v35, %v1050_v11 }
 0x11d   : > { %v5010_v55 = vpop.eup %5009  ;;  %1313 = vst.msk [vmem:[#allocation2 + $0x79] sm:$0xff] %vm1304_vm2, %v1279_v10  ;;  %v1282_v2 = vmul.f32 %v5008_v14, %v5538_v7  ;;  %5031 = vpow2.f32 %v4636_v49  ;;  %v4869_v29 = vpop.f32.mrf.mxu0  ;;  %v1480_v39 = vadd.f32 %v1472_v15, %v1444_v0  ;;  %v1507_v49 = vmul.f32 %v5644_v52, %v1489_v24  ;;  %v1523_v24 = vld [vmem:[#allocation2 + $0x19] ss:$2 sm:$0xff] }
 0x11e   : > { %v5012_v38 = vpop.eup %5011  ;;  %v1193_v46 = vadd.f32 1.0, %v5010_v55  ;;  %5033 = vpow2.f32 %v4639_v8  ;;  %v5700_v51 = vadd.f32 %v4869_v29, %v5495_v35 }
 0x11f   : > { %v5014_v30 = vpop.eup %5013  ;;  %v1384_v42 = vld [vmem:[#allocation2 + $0x60] ss:$2 sm:$0xff]  ;;  %v1420_v50 = vld [vmem:[#allocation2 + $0x61] ss:$2 sm:$0xff]  ;;  %1316 = vst.msk [vmem:[#allocation2 + $0x99] sm:$0xff] %vm1304_vm2, %v1282_v2  ;;  %v1281_v7 = vmul.f32 %v5012_v38, %v5542_v12  ;;  %5035 = vrcp.f32 %v1194_v26  ;;  %v1060_v53 = vpop.f32.mrf.mxu0 }
 0x120   : > { %v5016_v56 = vpop.eup %5015  ;;  %v1401_v59 = vmul.f32 %v5593_v5, %v1384_v42  ;;  %v1437_v63 = vmul.f32 %v5597_v6, %v1420_v50  ;;  %v1456_v37 = vld [vmem:[#allocation2 + $0x62] ss:$2 sm:$0xff]  ;;  %5037 = vrcp.f32 %v1193_v46  ;;  %v1196_v8 = vadd.f32 1.0, %v5014_v30  ;;  %v1525_v38 = vld [vmem:[#allocation2 + $0x49] ss:$2 sm:$0xff] }
 0x121   : > { %1315 = vst.msk [vmem:[#allocation2 + $0x91] sm:$0xff] %vm1304_vm2, %v1281_v7  ;;  %v1284_v0 = vmul.f32 %v5016_v56, %v5546_v17  ;;  %5039 = vpow2.f32 %v4638_v27  ;;  %v4640_v12 = vmul.f32 -1.442695, %v5695_v58  ;;  %v4872_v9 = vpop.f32.mrf.mxu0  ;;  %v5018_v10 = vpop.eup %5017  ;;  %v4643_v14 = vmul.f32 -1.442695, %v5700_v51 }
 0x122   : > { %v1445_v11 = vadd.f32 %v1437_v63, %v1401_v59  ;;  %5041 = vpow2.f32 %v4641_v31  ;;  %v5710_v15 = vadd.f32 %v5495_v35, %v1060_v53  ;;  %v5020_v55 = vpop.eup %5019  ;;  %v1473_v2 = vmul.f32 %v5610_v19, %v1456_v37 }
 0x123   : > { %1318 = vst.msk [vmem:[#allocation2 + $0xb1] sm:$0xff] %vm1304_vm2, %v1284_v0  ;;  %5043 = vrcp.f32 %v1196_v8  ;;  %v1195_v17 = vadd.f32 1.0, %v5018_v10  ;;  %v5715_v26 = vadd.f32 %v4872_v9, %v5495_v35  ;;  %v1070_v27 = vpop.f32.mrf.mxu0  ;;  %v1283_v31 = vmul.f32 %v5020_v55, %v5550_v23 }
 0x124   : > { %v5022_v29 = vpop.eup %5021  ;;  %v1491_v46 = vld [vmem:[#allocation2 + $0x78] ss:$2 sm:$0xff]  ;;  %5045 = vpow2.f32 %v4640_v12  ;;  %v4642_v30 = vmul.f32 -1.442695, %v5710_v15  ;;  %v5720_v42 = vadd.f32 %v5495_v35, %v1070_v27  ;;  %v1542_v59 = vmul.f32 %v5654_v43, %v1523_v24  ;;  %v1527_v63 = vld [vmem:[#allocation2 + $0x79] ss:$2 sm:$0xff] }
 0x125   : > { %v1508_v50 = vmul.f32 %v5644_v52, %v1491_v46  ;;  %v1286_v7 = vmul.f32 %v5022_v29, %v5554_v28  ;;  %5047 = vrcp.f32 %v1195_v17  ;;  %v4645_v53 = vmul.f32 -1.442695, %v5715_v26  ;;  %v5024_v56 = vpop.eup %5023  ;;  %1317 = vst.msk [vmem:[#allocation2 + $0xa9] sm:$0xff] %vm1304_vm2, %v1283_v31 }
 0x126   : > { %5049 = vpow2.f32 %v4643_v14  ;;  %v1481_v23 = vadd.f32 %v1473_v2, %v1445_v11  ;;  %v1515_v37 = vadd.f32 %v1507_v49, %v1480_v39  ;;  %v5026_v0 = vpop.eup %5025  ;;  %v1543_v35 = vmul.f32 %v5654_v43, %v1525_v38  ;;  %v1559_v49 = vld [vmem:[#allocation2 + $0x1a] ss:$2 sm:$0xff]  ;;  %v1561_v14 = vld [vmem:[#allocation2 + $0x4a] ss:$2 sm:$0xff] }
 0x127   : > { %1320 = vst.msk [vmem:[#allocation2 + $0xc9] sm:$0xff] %vm1304_vm2, %v1286_v7  ;;  %v1198_v8 = vadd.f32 1.0, %v5024_v56  ;;  %5051 = vpow2.f32 %v4642_v30  ;;  %v4644_v28 = vmul.f32 -1.442695, %v5720_v42  ;;  %v5028_v12 = vpop.eup %5027  ;;  %v1285_v24 = vmul.f32 %v5026_v0, %v5560_v36  ;;  %v1563_v30 = vld [vmem:[#allocation2 + $0x7a] ss:$2 sm:$0xff] }
 0x128   : > { %v1386_v9 = vld [vmem:[#allocation2 + $0x90] ss:$2 sm:$0xff]  ;;  %v1422_v10 = vld [vmem:[#allocation2 + $0x91] ss:$2 sm:$0xff]  ;;  %5053 = vpow2.f32 %v4645_v53  ;;  %v1516_v17 = vadd.f32 %v1508_v50, %v1481_v23  ;;  %v1550_v11 = vadd.f32 %v1542_v59, %v5685_v20  ;;  %v1288_v29 = vmul.f32 %v5028_v12, %v5564_v44 }
 0x129   : > { %v1458_v55 = vld [vmem:[#allocation2 + $0x92] ss:$2 sm:$0xff]  ;;  %v5030_v39 = vpop.eup %5029  ;;  %v1402_v2 = vmul.f32 %v5593_v5, %v1386_v9  ;;  %v1438_v27 = vmul.f32 %v5597_v6, %v1422_v10  ;;  %v1544_v38 = vmul.f32 %v5654_v43, %v1527_v63  ;;  %1319 = vst.msk [vmem:[#allocation2 + $0xc1] sm:$0xff] %vm1304_vm2, %v1285_v24  ;;  %5055 = vrcp.f32 %v1198_v8 }
 0x12a   : > { %v5032_v46 = vpop.eup %5031  ;;  %v1474_v31 = vmul.f32 %v5610_v19, %v1458_v55  ;;  %v1287_v36 = vmul.f32 %v5030_v39, %v5580_v57  ;;  %v1551_v20 = vadd.f32 %v1543_v35, %v1515_v37  ;;  %1322 = vst.msk [vmem:[#allocation2 + $0xe1] sm:$0xff] %vm1304_vm2, %v1288_v29  ;;  %5057 = vpow2.f32 %v4644_v28  ;;  %v1595_v0 = vld [vmem:[#allocation2 + $0x30] ss:$2 sm:$0xff]  ;;  %v1597_v9 = vld [vmem:[#allocation2 + $0x60] ss:$2 sm:$0xff] }
 0x12b   : > { %v5034_v50 = vpop.eup %5033  ;;  %v1197_v7 = vadd.f32 1.0, %v5032_v46  ;;  %v1446_v53 = vadd.f32 %v1438_v27, %v1402_v2  ;;  %v1552_v56 = vadd.f32 %v1544_v38, %v1516_v17  ;;  %v1578_v63 = vmul.f32 %v5663_v32, %v1559_v49  ;;  %v1599_v10 = vld [vmem:[#allocation2 + $0x90] ss:$2 sm:$0xff] }
 0x12c   : > { %v5036_v44 = vpop.eup %5035  ;;  %1321 = vst.msk [vmem:[#allocation2 + $0xd9] sm:$0xff] %vm1304_vm2, %v1287_v36  ;;  %v1200_v59 = vadd.f32 1.0, %v5034_v50  ;;  %v1579_v23 = vmul.f32 %v5663_v32, %v1561_v14  ;;  %v5745_v57 = vrot.slane %v5576_v54, %v5688_v21  ;;  %v1493_v35 = vld [vmem:[#allocation2 + $0xa8] ss:$2 sm:$0xff]  ;;  %v1580_v12 = vmul.f32 %v5663_v32, %v1563_v30  ;;  %v1529_v39 = vld [vmem:[#allocation2 + $0xa9] ss:$2 sm:$0xff] }
 0x12d   : > { %v5038_v37 = vpop.eup %5037  ;;  %v1290_v8 = vmul.f32 %v5036_v44, %v5589_v3  ;;  %5059 = vrcp.f32 %v1197_v7  ;;  %v1482_v28 = vadd.f32 %v1474_v31, %v1446_v53  ;;  %v1509_v17 = vmul.f32 %v5644_v52, %v1493_v35  ;;  %v1565_v49 = vld [vmem:[#allocation2 + $0xaa] ss:$2 sm:$0xff] }
 0x12e   : > { %v5040_v55 = vpop.eup %5039  ;;  %v1289_v24 = vmul.f32 %v5038_v37, %v5603_v13  ;;  %5061 = vrcp.f32 %v1200_v59  ;;  %v1586_v54 = vadd.f32 %v1578_v63, %v1550_v11  ;;  %v1587_v3 = vadd.f32 %v1579_v23, %v1551_v20 }
 0x12f   : > { %v5042_v14 = vpop.eup %5041  ;;  %1324 = vst.msk [vmem:[#allocation2 + $0xf9] sm:$0xff] %vm1304_vm2, %v1290_v8  ;;  %v1199_v2 = vadd.f32 1.0, %v5040_v55  ;;  %v1588_v27 = vadd.f32 %v1580_v12, %v1552_v56  ;;  %v1614_v29 = vmul.f32 %v5667_v33, %v1595_v0  ;;  %v1517_v31 = vadd.f32 %v1509_v17, %v1482_v28  ;;  %v1631_v0 = vld [vmem:[#allocation2 + $0x31] ss:$2 sm:$0xff] }
 0x130   : > { %v5044_v38 = vpop.eup %5043  ;;  %1323 = vst.msk [vmem:[#allocation2 + $0xf1] sm:$0xff] %vm1304_vm2, %v1289_v24  ;;  %v1202_v46 = vadd.f32 1.0, %v5042_v14  ;;  %v1615_v13 = vmul.f32 %v5667_v33, %v1597_v9  ;;  %v1616_v36 = vmul.f32 %v5667_v33, %v1599_v10  ;;  %v1388_v50 = vld [vmem:[#allocation2 + $0xc0] ss:$2 sm:$0xff]  ;;  %v1424_v11 = vld [vmem:[#allocation2 + $0xc1] ss:$2 sm:$0xff]  ;;  %v1545_v20 = vmul.f32 %v5654_v43, %v1529_v39 }
 0x131   : > { %v5046_v30 = vpop.eup %5045  ;;  %v1460_v7 = vld [vmem:[#allocation2 + $0xc2] ss:$2 sm:$0xff]  ;;  %v1292_v53 = vmul.f32 %v5044_v38, %v5616_v25  ;;  %5063 = vrcp.f32 %v1199_v2  ;;  %v1581_v56 = vmul.f32 %v5663_v32, %v1565_v49  ;;  %v1403_v59 = vmul.f32 %v5593_v5, %v1388_v50  ;;  %v1633_v9 = vld [vmem:[#allocation2 + $0x61] ss:$2 sm:$0xff]  ;;  %v1635_v49 = vld [vmem:[#allocation2 + $0x91] ss:$2 sm:$0xff] }
 0x132   : > { %v5048_v44 = vpop.eup %5047  ;;  %v1439_v63 = vmul.f32 %v5597_v6, %v1424_v11  ;;  %5065 = vrcp.f32 %v1202_v46  ;;  %v1201_v23 = vadd.f32 1.0, %v5046_v30  ;;  %v1553_v25 = vadd.f32 %v1545_v20, %v1517_v31  ;;  %v1601_v39 = vld [vmem:[#allocation2 + $0xc0] ss:$2 sm:$0xff] }
 0x133   : > { %v5050_v37 = vpop.eup %5049  ;;  %1326 = vst.msk [vmem:[#allocation2 + $0x111] sm:$0xff] %vm1304_vm2, %v1292_v53  ;;  %v1291_v35 = vmul.f32 %v5048_v44, %v5624_v41  ;;  %v1495_v8 = vld [vmem:[#allocation2 + $0xd8] ss:$2 sm:$0xff]  ;;  %v1622_v28 = vadd.f32 %v1614_v29, %v1586_v54  ;;  %v1623_v12 = vadd.f32 %v1615_v13, %v1587_v3  ;;  %v1475_v17 = vmul.f32 %v5610_v19, %v1460_v7  ;;  %v1531_v29 = vld [vmem:[#allocation2 + $0xd9] ss:$2 sm:$0xff] }
 0x134   : > { %v5052_v10 = vpop.eup %5051  ;;  %5067 = vrcp.f32 %v1201_v23  ;;  %v1204_v55 = vadd.f32 1.0, %v5050_v37  ;;  %v1447_v24 = vadd.f32 %v1439_v63, %v1403_v59  ;;  %v1510_v38 = vmul.f32 %v5644_v52, %v1495_v8  ;;  %v1567_v31 = vld [vmem:[#allocation2 + $0xda] ss:$2 sm:$0xff] }
 0x135   : > { %v5054_v14 = vpop.eup %5053  ;;  %1325 = vst.msk [vmem:[#allocation2 + $0x109] sm:$0xff] %vm1304_vm2, %v1291_v35  ;;  %v1203_v2 = vadd.f32 1.0, %v5052_v10  ;;  %v1624_v41 = vadd.f32 %v1616_v36, %v1588_v27  ;;  %v1650_v46 = vmul.f32 %v5745_v57, %v1631_v0  ;;  %v1589_v13 = vadd.f32 %v1581_v56, %v1553_v25  ;;  %v5774_v59 = vld [vmem:[%s7566_s1 + $0x8] ss:$0 sm:$0xff]  ;;  %v1667_v25 = vld [vmem:[#allocation2 + $0x32] ss:$2 sm:$0xff] }
 0x136   : > { %5069 = vrcp.f32 %v1204_v55  ;;  %v1206_v54 = vadd.f32 1.0, %v5054_v14  ;;  %v1483_v3 = vadd.f32 %v1475_v17, %v1447_v24  ;;  %v5056_v30 = vpop.eup %5055  ;;  %v1617_v53 = vmul.f32 %v5667_v33, %v1601_v39  ;;  %v1669_v17 = vld [vmem:[#allocation2 + $0x62] ss:$2 sm:$0xff] }
 0x137   : > { %v1390_v50 = vld [vmem:[#allocation2 + $0xf0] ss:$2 sm:$0xff]  ;;  %v1426_v11 = vld [vmem:[#allocation2 + $0xf1] ss:$2 sm:$0xff]  ;;  %5071 = vrcp.f32 %v1203_v2  ;;  %v1651_v20 = vmul.f32 %v5745_v57, %v1633_v9  ;;  %v1652_v44 = vmul.f32 %v5745_v57, %v1635_v49  ;;  %v5058_v27 = vpop.eup %5057  ;;  %v1294_v36 = vmul.f32 %v5056_v30, %v5634_v62  ;;  %v1637_v2 = vld [vmem:[#allocation2 + $0xc1] ss:$2 sm:$0xff] }
 0x138   : > { %v1462_v7 = vld [vmem:[#allocation2 + $0xf2] ss:$2 sm:$0xff]  ;;  %5073 = vrcp.f32 %v1206_v54  ;;  %v1404_v56 = vmul.f32 %v5593_v5, %v1390_v50  ;;  %v1440_v63 = vmul.f32 %v5597_v6, %v1426_v11  ;;  %v1205_v23 = vadd.f32 1.0, %v5058_v27 }
 0x139   : > { %v1518_v0 = vadd.f32 %v1510_v38, %v1483_v3  ;;  %v1546_v37 = vmul.f32 %v5654_v43, %v1531_v29  ;;  %v1582_v35 = vmul.f32 %v5663_v32, %v1567_v31  ;;  %v1603_v8 = vld [vmem:[#allocation2 + $0xf0] ss:$2 sm:$0xff]  ;;  %1328 = vst.msk [vmem:[#allocation2 + $0x129] sm:$0xff] %vm1304_vm2, %v1294_v36  ;;  %v1476_v10 = vmul.f32 %v5610_v19, %v1462_v7 }
 0x13a   : > { %v5060_v9 = vpop.eup %5059  ;;  %v1448_v62 = vadd.f32 %v1440_v63, %v1404_v56  ;;  %v1625_v55 = vadd.f32 %v1617_v53, %v1589_v13  ;;  %v1658_v24 = vadd.f32 %v1650_v46, %v1622_v28  ;;  %5075 = vrcp.f32 %v1205_v23  ;;  %v1671_v54 = vld [vmem:[#allocation2 + $0x92] ss:$2 sm:$0xff] }
 0x13b   : > { %v5062_v39 = vpop.eup %5061  ;;  %v1293_v49 = vmul.f32 %v5060_v9, %v5650_v16  ;;  %v1554_v14 = vadd.f32 %v1546_v37, %v1518_v0  ;;  %v1659_v38 = vadd.f32 %v1651_v20, %v1623_v12  ;;  %v1618_v50 = vmul.f32 %v5667_v33, %v1603_v8  ;;  %v1639_v16 = vld [vmem:[#allocation2 + $0xf1] ss:$2 sm:$0xff]  ;;  %v1673_v37 = vld [vmem:[#allocation2 + $0xc2] ss:$2 sm:$0xff] }
 0x13c   : > { %v1296_v3 = vmul.f32 %v5062_v39, %v5659_v22  ;;  %v1484_v29 = vadd.f32 %v1476_v10, %v1448_v62  ;;  %v1497_v31 = vld [vmem:[#allocation2 + $0x108] ss:$2 sm:$0xff]  ;;  %v1533_v30 = vld [vmem:[#allocation2 + $0x109] ss:$2 sm:$0xff]  ;;  %v1686_v11 = vmul.f32 %v5774_v59, %v1667_v25  ;;  %v1660_v13 = vadd.f32 %v1652_v44, %v1624_v41  ;;  %v5797_v44 = vld [vmem:[%s7568_s7] ss:$0 sm:$0xff] }
 0x13d   : > { %1327 = vst.msk [vmem:[#allocation2 + $0x121] sm:$0xff] %vm1304_vm2, %v1293_v49  ;;  %v1511_v28 = vmul.f32 %v5644_v52, %v1497_v31  ;;  %v1590_v46 = vadd.f32 %v1582_v35, %v1554_v14  ;;  %v1687_v7 = vmul.f32 %v5774_v59, %v1669_v17  ;;  %v1547_v22 = vmul.f32 %v5654_v43, %v1533_v30  ;;  %v1569_v53 = vld [vmem:[#allocation2 + $0x10a] ss:$2 sm:$0xff] }
 0x13e   : > { %v5064_v12 = vpop.eup %5063  ;;  %1330 = vst.msk [vmem:[#allocation2 + $0x141] sm:$0xff] %vm1304_vm2, %v1296_v3  ;;  %v1653_v20 = vmul.f32 %v5745_v57, %v1637_v2  ;;  %v1688_v27 = vmul.f32 %v5774_v59, %v1671_v54  ;;  %v1694_v36 = vadd.f32 %v1686_v11, %v1658_v24  ;;  %v1654_v8 = vmul.f32 %v5745_v57, %v1639_v16  ;;  %v1675_v10 = vld [vmem:[#allocation2 + $0xf2] ss:$2 sm:$0xff] }
 0x13f   : > { %v5066_v56 = vpop.eup %5065  ;;  %v1295_v63 = vmul.f32 %v5064_v12, %v5679_v40  ;;  %v1519_v23 = vadd.f32 %v1511_v28, %v1484_v29  ;;  %v1626_v0 = vadd.f32 %v1618_v50, %v1590_v46  ;;  %v1695_v41 = vadd.f32 %v1687_v7, %v1659_v38 }
 0x140   : > { %v1298_v35 = vmul.f32 %v5066_v56, %v5682_v61  ;;  %v1661_v25 = vadd.f32 %v1653_v20, %v1625_v55  ;;  %v1583_v40 = vmul.f32 %v5663_v32, %v1569_v53  ;;  %v1696_v24 = vadd.f32 %v1688_v27, %v1660_v13 }
 0x141   : > { %v5068_v9 = vpop.eup %5067  ;;  %1329 = vst.msk [vmem:[#allocation2 + $0x139] sm:$0xff] %vm1304_vm2, %v1295_v63  ;;  %v1555_v62 = vadd.f32 %v1547_v22, %v1519_v23  ;;  %v1662_v39 = vadd.f32 %v1654_v8, %v1626_v0  ;;  %v1689_v49 = vmul.f32 %v5774_v59, %v1673_v37  ;;  %v5807_v61 = vadd.f32 %v5797_v44, %v1694_v36 }
 0x142   : > { %1332 = vst.msk [vmem:[#allocation2 + $0x159] sm:$0xff] %vm1304_vm2, %v1298_v35  ;;  %v1297_v17 = vmul.f32 %v5068_v9, %v5695_v58  ;;  %v5810_v55 = vadd.f32 %v5797_v44, %v1695_v41  ;;  %v1690_v58 = vmul.f32 %v5774_v59, %v1675_v10  ;;  %v5819_v7 = vadd.f32 %v5797_v44, %v1696_v24 }
 0x143   : > { %v5070_v14 = vpop.eup %5069  ;;  %v1591_v31 = vadd.f32 %v1583_v40, %v1555_v62  ;;  %v1697_v30 = vadd.f32 %v1689_v49, %v1661_v25  ;;  %v4648_v53 = vmul.f32 -1.442695, %v5807_v61 }
 0x144   : > { %v5072_v2 = vpop.eup %5071  ;;  %1331 = vst.msk [vmem:[#allocation2 + $0x151] sm:$0xff] %vm1304_vm2, %v1297_v17  ;;  %v1300_v38 = vmul.f32 %v5070_v14, %v5700_v51  ;;  %v1392_v54 = vld [vmem:[#allocation2 + $0x120] ss:$2 sm:$0xff]  ;;  %v1428_v3 = vld [vmem:[#allocation2 + $0x121] ss:$2 sm:$0xff]  ;;  %v1698_v22 = vadd.f32 %v1690_v58, %v1662_v39 }
 0x145   : > { %v1464_v29 = vld [vmem:[#allocation2 + $0x122] ss:$2 sm:$0xff]  ;;  %v5074_v50 = vpop.eup %5073  ;;  %v1299_v11 = vmul.f32 %v5072_v2, %v5710_v15  ;;  %v1405_v28 = vmul.f32 %v5593_v5, %v1392_v54  ;;  %v1441_v46 = vmul.f32 %v5597_v6, %v1428_v3  ;;  %v1641_v13 = vld [vmem:[#allocation2 + $0x121] ss:$2 sm:$0xff]  ;;  %v4649_v36 = vmul.f32 -1.442695, %v5810_v55 }
 0x146   : > { %v1605_v16 = vld [vmem:[#allocation2 + $0x120] ss:$2 sm:$0xff]  ;;  %1334 = vst.msk [vmem:[#allocation2 + $0x171] sm:$0xff] %vm1304_vm2, %v1300_v38  ;;  %v1302_v51 = vmul.f32 %v5074_v50, %v5715_v26  ;;  %v1477_v20 = vmul.f32 %v5610_v19, %v1464_v29  ;;  %v1655_v26 = vmul.f32 %v5745_v57, %v1641_v13  ;;  %v5831_v37 = vadd.f32 %v5797_v44, %v1697_v30 }
 0x147   : > { %v1619_v12 = vmul.f32 %v5667_v33, %v1605_v16  ;;  %1333 = vst.msk [vmem:[#allocation2 + $0x169] sm:$0xff] %vm1304_vm2, %v1299_v11  ;;  %v1449_v15 = vadd.f32 %v1441_v46, %v1405_v28  ;;  %v1677_v27 = vld [vmem:[#allocation2 + $0x122] ss:$2 sm:$0xff]  ;;  %v5076_v56 = vpop.eup %5075  ;;  %v4650_v25 = vmul.f32 -1.442695, %v5819_v7  ;;  %v5838_v10 = vadd.f32 %v5797_v44, %v1698_v22 }
 0x148   : > { %1336 = vst.msk [vmem:[#allocation2 + $0x189] sm:$0xff] %vm1304_vm2, %v1302_v51  ;;  %v1499_v63 = vld [vmem:[#allocation2 + $0x138] ss:$2 sm:$0xff]  ;;  %v1535_v23 = vld [vmem:[#allocation2 + $0x139] ss:$2 sm:$0xff]  ;;  %v1301_v41 = vmul.f32 %v5076_v56, %v5720_v42  ;;  %v1691_v40 = vmul.f32 %v5774_v59, %v1677_v27  ;;  %5077 = vpow2.f32 %v4648_v53 }
 0x149   : > { %v1627_v0 = vadd.f32 %v1619_v12, %v1591_v31  ;;  %v1485_v35 = vadd.f32 %v1477_v20, %v1449_v15  ;;  %v1512_v8 = vmul.f32 %v5644_v52, %v1499_v63  ;;  %v1571_v9 = vld [vmem:[#allocation2 + $0x13a] ss:$2 sm:$0xff]  ;;  %v1548_v42 = vmul.f32 %v5654_v43, %v1535_v23 }
 0x14a   : > { %1335 = vst.msk [vmem:[#allocation2 + $0x181] sm:$0xff] %vm1304_vm2, %v1301_v41  ;;  %5079 = vpow2.f32 %v4649_v36  ;;  %v4651_v3 = vmul.f32 -1.442695, %v5831_v37  ;;  %v1584_v31 = vmul.f32 %v5663_v32, %v1571_v9 }
 0x14b   : > { %v1663_v62 = vadd.f32 %v1655_v26, %v1627_v0  ;;  %v1394_v24 = vld [vmem:[#allocation2 + $0x150] ss:$2 sm:$0xff]  ;;  %v1430_v17 = vld [vmem:[#allocation2 + $0x151] ss:$2 sm:$0xff]  ;;  %v1520_v49 = vadd.f32 %v1512_v8, %v1485_v35  ;;  %5081 = vpow2.f32 %v4650_v25 }
 0x14c   : > { %v1466_v39 = vld [vmem:[#allocation2 + $0x152] ss:$2 sm:$0xff]  ;;  %v1406_v14 = vmul.f32 %v5593_v5, %v1394_v24  ;;  %v1442_v2 = vmul.f32 %v5597_v6, %v1430_v17  ;;  %v1643_v11 = vld [vmem:[#allocation2 + $0x151] ss:$2 sm:$0xff]  ;;  %v4652_v5 = vmul.f32 -1.442695, %v5838_v10  ;;  %5083 = vpow2.f32 %v4651_v3 }
 0x14d   : > { %v1607_v38 = vld [vmem:[#allocation2 + $0x150] ss:$2 sm:$0xff]  ;;  %v1699_v54 = vadd.f32 %v1691_v40, %v1663_v62  ;;  %v1556_v29 = vadd.f32 %v1548_v42, %v1520_v49  ;;  %v1478_v30 = vmul.f32 %v5610_v19, %v1466_v39  ;;  %v1656_v15 = vmul.f32 %v5745_v57, %v1643_v11 }
 0x14e   : > { %v1450_v58 = vadd.f32 %v1442_v2, %v1406_v14  ;;  %v1501_v50 = vld [vmem:[#allocation2 + $0x168] ss:$2 sm:$0xff]  ;;  %v1537_v46 = vld [vmem:[#allocation2 + $0x169] ss:$2 sm:$0xff]  ;;  %v1620_v13 = vmul.f32 %v5667_v33, %v1607_v38  ;;  %5085 = vpow2.f32 %v4652_v5 }
 0x14f   : > { %v5848_v28 = vadd.f32 %v5797_v44, %v1699_v54  ;;  %v1513_v6 = vmul.f32 %v5644_v52, %v1501_v50  ;;  %v1592_v16 = vadd.f32 %v1584_v31, %v1556_v29  ;;  %v1679_v12 = vld [vmem:[#allocation2 + $0x152] ss:$2 sm:$0xff]  ;;  %v1549_v27 = vmul.f32 %v5654_v43, %v1537_v46 }
 0x150   : > { %v1486_v51 = vadd.f32 %v1478_v30, %v1450_v58  ;;  %v1573_v53 = vld [vmem:[#allocation2 + $0x16a] ss:$2 sm:$0xff]  ;;  %v1692_v52 = vmul.f32 %v5774_v59, %v1679_v12 }
 0x151   : > { %v4653_v22 = vmul.f32 -1.442695, %v5848_v28  ;;  %v1628_v19 = vadd.f32 %v1620_v13, %v1592_v16  ;;  %v1609_v36 = vld [vmem:[#allocation2 + $0x180] ss:$2 sm:$0xff]  ;;  %v1585_v23 = vmul.f32 %v5663_v32, %v1573_v53  ;;  %v1645_v0 = vld [vmem:[#allocation2 + $0x181] ss:$2 sm:$0xff] }
 0x152   : > { %v1521_v20 = vadd.f32 %v1513_v6, %v1486_v51  ;;  %v1621_v35 = vmul.f32 %v5667_v33, %v1609_v36  ;;  %v1681_v25 = vld [vmem:[#allocation2 + $0x182] ss:$2 sm:$0xff]  ;;  %v1657_v40 = vmul.f32 %v5745_v57, %v1645_v0 }
 0x153   : > { %v1664_v56 = vadd.f32 %v1656_v15, %v1628_v19  ;;  %5087 = vpow2.f32 %v4653_v22  ;;  %v1693_v49 = vmul.f32 %v5774_v59, %v1681_v25 }
 0x154   : > { %v1557_v63 = vadd.f32 %v1549_v27, %v1521_v20 }
 0x155   : > { %v1700_v26 = vadd.f32 %v1692_v52, %v1664_v56  ;;  %v5078_v8 = vpop.eup %5077 }
 0x156   : > { %v1593_v41 = vadd.f32 %v1585_v23, %v1557_v63  ;;  %v1741_v32 = vadd.f32 1.0, %v5078_v8 }
 0x157   : > { %v1715_v9 = vadd.f32 %v5797_v44, %v1700_v26  ;;  %v5080_v62 = vpop.eup %5079 }
 0x158   : > { %v1629_v43 = vadd.f32 %v1621_v35, %v1593_v41  ;;  %v5082_v17 = vpop.eup %5081  ;;  %v1742_v14 = vadd.f32 1.0, %v5080_v62 }
 0x159   : > { %v4654_v24 = vmul.f32 -1.442695, %v1715_v9  ;;  %v5084_v2 = vpop.eup %5083  ;;  %v1743_v38 = vadd.f32 1.0, %v5082_v17 }
 0x15a   : > { %v1665_v39 = vadd.f32 %v1657_v40, %v1629_v43  ;;  %v1744_v29 = vadd.f32 1.0, %v5084_v2  ;;  %v1801_v2 = vld [vmem:[#allocation4] sm:$0x1] }
 0x15b   : > { %5089 = vpow2.f32 %v4654_v24  ;;  %v5086_v54 = vpop.eup %5085 }
 0x15c   : > { %v1701_v42 = vadd.f32 %v1693_v49, %v1665_v39  ;;  %5091 = vrcp.f32 %v1741_v32  ;;  %v1745_v57 = vadd.f32 1.0, %v5086_v54  ;;  %v1796_v39 = vld [vmem:[%s7569_s0] sm:$0x1] }
 0x15d   : > { %5093 = vrcp.f32 %v1742_v14  ;;  %v5205_v14 = vmov 0  }
 0x15e   : > { %v1716_v33 = vadd.f32 %v5797_v44, %v1701_v42  ;;  %5095 = vrcp.f32 %v1743_v38  ;;  %4947 = vset.pattern.permute.xlu0 %v5205_v14  ;;  %4948 = vset.pattern.permute.xlu1 %v5205_v14  ;;  %v4686_v14 = vld [vmem:[%s5348_s29 + $0xb1] ss:$2 sm:$0xff] }
 0x160   : > { %v4655_v3 = vmul.f32 -1.442695, %v1716_v33  ;;  %v5088_v31 = vpop.eup %5087 }
 0x161   : > { %v1746_v58 = vadd.f32 1.0, %v5088_v31 }
 0x162   : > { %5097 = vpow2.f32 %v4655_v3 }
 0x163   : > { %5099 = vrcp.f32 %v1744_v29 }
 0x164   : > { %5101 = vrcp.f32 %v1745_v57 }
 0x165   : > { %5103 = vrcp.f32 %v1746_v58  ;;  %v1921_v58 = vld [vmem:[%s7490_s11] sm:$0xf] }
 0x166   : > { %4873 = vmatprep.subr.msk.mxu1 %vm850_vm0, %v1921_v58 }
 0x167   : > { %4874 = vmatpush3.msk.msra.mxu1 %vm850_vm0, %v1921_v58 }
 0x168   : > { %v5090_v59 = vpop.eup %5089 }
 0x169   : > { %v1747_v30 = vadd.f32 1.0, %v5090_v59  ;;  %v5092_v50 = vpop.eup %5091  ;;  %v1826_v59 = vld [vmem:[%s5348_s29] ss:$2 sm:$0xff] }
 0x16a   : > { %v5094_v11 = vpop.eup %5093  ;;  %v5867_v13 = vmul.f32 %v5092_v50, %v5807_v61 }
 0x16b   : > { %5105 = vrcp.f32 %v1747_v30  ;;  %v5096_v5 = vpop.eup %5095  ;;  %v5864_v46 = vmul.f32 %v5094_v11, %v5810_v55  ;;  %v4665_v30 = vld [vmem:[%s5348_s29 + $0x1] ss:$2 sm:$0xff]  ;;  %v4673_v11 = vld [vmem:[%s5348_s29 + $0x10] ss:$2 sm:$0xff] }
 0x16c   : > { %v5870_v51 = vmul.f32 %v5096_v5, %v5819_v7  ;;  %v1773_v55 = vsel %vm1304_vm2, %v5867_v13, 0.0  ;;  %v1857_v50 = vadd.f32 %v4665_v30, %v1826_v59  ;;  %v4681_v5 = vld [vmem:[%s5348_s29 + $0x11] ss:$2 sm:$0xff]  ;;  %v4679_v59 = vld [vmem:[%s5348_s29 + $0xd0] ss:$2 sm:$0xff] }
 0x16d   : > { %v1774_v53 = vsel %vm1304_vm2, %v5864_v46, 0.0  ;;  %v4687_v30 = vld [vmem:[%s5348_s29 + $0xd1] ss:$2 sm:$0xff] }
 0x16e   : > { %v1776_v61 = vsel %vm1304_vm2, %v5870_v51, 0.0  ;;  %v1775_v20 = vadd.f32 %v1774_v53, %v1773_v55  ;;  %v1881_v53 = vadd.f32 %v4673_v11, %v1857_v50  ;;  %v2075_v55 = vld [vmem:[%s7488_s9 + $0x10] sm:$0xff] }
 0x16f   : > { %v5098_v44 = vpop.eup %5097  ;;  %4887 = vmatprep.subr.mxu1 %v2075_v55 }
 0x170   : > { %v1748_v6 = vadd.f32 1.0, %v5098_v44  ;;  %v5100_v16 = vpop.eup %5099  ;;  %v1777_v36 = vadd.f32 %v1776_v61, %v1775_v20  ;;  %v4658_v44 = vld [vmem:[%s5348_s29 + $0x20] ss:$2 sm:$0xff]  ;;  %v4667_v20 = vld [vmem:[%s5348_s29 + $0x41] ss:$2 sm:$0xff] }
 0x171   : > { %v5102_v12 = vpop.eup %5101  ;;  %v5873_v22 = vmul.f32 %v5100_v16, %v5831_v37  ;;  %v4674_v16 = vld [vmem:[%s5348_s29 + $0x30] ss:$2 sm:$0xff]  ;;  %v4659_v61 = vld [vmem:[%s5348_s29 + $0x40] ss:$2 sm:$0xff] }
 0x172   : > { %5107 = vrcp.f32 %v1748_v6  ;;  %v5104_v19 = vpop.eup %5103  ;;  %v5878_v15 = vmul.f32 %v5102_v12, %v5838_v10  ;;  %v4666_v6 = vld [vmem:[%s5348_s29 + $0x21] ss:$2 sm:$0xff]  ;;  %v4682_v12 = vld [vmem:[%s5348_s29 + $0x31] ss:$2 sm:$0xff] }
 0x173   : > { %v5885_v27 = vmul.f32 %v5104_v19, %v5848_v28  ;;  %v1778_v37 = vsel %vm1304_vm2, %v5873_v22, 0.0  ;;  %v1858_v19 = vadd.f32 %v4666_v6, %v4658_v44  ;;  %v4672_v44 = vld [vmem:[%s5348_s29 + $0xe1] ss:$2 sm:$0xff]  ;;  %v4680_v6 = vld [vmem:[%s5348_s29 + $0xf0] ss:$2 sm:$0xff] }
 0x174   : > { %v1780_v10 = vsel %vm1304_vm2, %v5878_v15, 0.0  ;;  %v1779_v52 = vadd.f32 %v1778_v37, %v1777_v36  ;;  %v4675_v37 = vld [vmem:[%s5348_s29 + $0x50] ss:$2 sm:$0xff]  ;;  %v4683_v36 = vld [vmem:[%s5348_s29 + $0x51] ss:$2 sm:$0xff] }
 0x175   : > { %v1782_v63 = vsel %vm1304_vm2, %v5885_v27, 0.0 }
 0x176   : > { %v1781_v23 = vadd.f32 %v1780_v10, %v1779_v52  ;;  %v4660_v10 = vld [vmem:[%s5348_s29 + $0x60] ss:$2 sm:$0xff]  ;;  %v1905_v52 = vadd.f32 %v4681_v5, %v1881_v53 }
 0x177   : > { %v4664_v5 = vld [vmem:[%s5348_s29 + $0xe0] ss:$2 sm:$0xff] }
 0x178   : > { %v5106_v7 = vpop.eup %5105  ;;  %v1783_v28 = vadd.f32 %v1782_v63, %v1781_v23  ;;  %v1882_v63 = vadd.f32 %v4674_v16, %v1858_v19  ;;  %v4668_v23 = vld [vmem:[%s5348_s29 + $0x61] ss:$2 sm:$0xff]  ;;  %v1864_v53 = vadd.f32 %v4672_v44, %v4664_v5 }
 0x179   : > { %v5889_v56 = vmul.f32 %v5106_v7, %v1715_v9  ;;  %v1859_v7 = vadd.f32 %v4667_v20, %v4659_v61  ;;  %v2073_v19 = vld [vmem:[%s7488_s9] sm:$0xff] }
 0x17b   : > { %v1784_v0 = vsel %vm1304_vm2, %v5889_v56, 0.0 }
 0x17c   : > { %v1785_v35 = vadd.f32 %v1784_v0, %v1783_v28  ;;  %v4676_v0 = vld [vmem:[%s5348_s29 + $0x70] ss:$2 sm:$0xff]  ;;  %v1883_v28 = vadd.f32 %v4675_v37, %v1859_v7  ;;  %v4688_v7 = vld [vmem:[%s5348_s29 + $0xf1] ss:$2 sm:$0xff] }
 0x17f   : > { %v5108_v26 = vpop.eup %5107 }
 0x180   : > { %v5897_v41 = vmul.f32 %v5108_v26, %v1716_v33  ;;  %v4684_v26 = vld [vmem:[%s5348_s29 + $0x71] ss:$2 sm:$0xff] }
 0x182   : > { %v1786_v8 = vsel %vm1304_vm2, %v5897_v41, 0.0 }
 0x183   : > { %v1787_v25 = vadd.f32 %v1786_v8, %v1785_v35  ;;  %v1860_v35 = vadd.f32 %v4668_v23, %v4660_v10  ;;  %v4661_v8 = vld [vmem:[%s5348_s29 + $0x80] ss:$2 sm:$0xff] }
 0x184   : > { %v2220_v23 = vld [vmem:[%s7492_s13] sm:$0xff] }
 0x185   : > { %v1788_v9 = vrot.slane %v1787_v25, 4 }
 0x187   : > { %v1789_v62 = vadd.f32 %v1788_v9, %v1787_v25  ;;  %v4669_v25 = vld [vmem:[%s5348_s29 + $0x81] ss:$2 sm:$0xff]  ;;  %v4677_v9 = vld [vmem:[%s5348_s29 + $0x90] ss:$2 sm:$0xff] }
 0x189   : > { %v1790_v43 = vrot.slane %v1789_v62, 2 }
 0x18b   : > { %v1791_v40 = vadd.f32 %v1790_v43, %v1789_v62  ;;  %v1913_v62 = vmul.f32 0.25, %v1905_v52  ;;  %v1906_v43 = vadd.f32 %v4682_v12, %v1882_v63 }
 0x18d   : > { %v1792_v24 = vrot.slane %v1791_v40, 1  ;;  %4875 = vmatprep.mubr.msk.f32.mxu1 %vm753_vm1, %v1913_v62 }
 0x18f   : > { %v1793_v17 = vadd.f32 %v1792_v24, %v1791_v40  ;;  %v1861_v40 = vadd.f32 %v4669_v25, %v4661_v8  ;;  %v4685_v24 = vld [vmem:[%s5348_s29 + $0x91] ss:$2 sm:$0xff] }
 0x191   : > { %v1795_v49 = vmul.f32 0.015625, %v1793_v17  ;;  %v4662_v17 = vld [vmem:[%s5348_s29 + $0xa0] ss:$2 sm:$0xff] }
 0x193   : > { %v1797_v32 = vmul.f32 %v1796_v39, %v1795_v49  ;;  %v1907_v39 = vadd.f32 %v4683_v36, %v1883_v28  ;;  %v1884_v49 = vadd.f32 %v4676_v0, %v1860_v35  ;;  %v1888_v36 = vadd.f32 %v4680_v6, %v1864_v53  ;;  %v1810_v0 = vld [vmem:[%s7570_s4] sm:$0x1] }
 0x195   : > { %v1798_v42 = vsel %vm1345_vm3, %v1797_v32, 0.0  ;;  %v4670_v32 = vld [vmem:[%s5348_s29 + $0xa1] ss:$2 sm:$0xff]  ;;  %v1912_v52 = vadd.f32 %v4688_v7, %v1888_v36 }
 0x196   : > { %1799 = vadd.xlane.f32.xlu0 %v1798_v42  ;;  %v4678_v42 = vld [vmem:[%s5348_s29 + $0xb0] ss:$2 sm:$0xff] }
 0x197   : > { %v1920_v63 = vmul.f32 0.25, %v1912_v52 }
 0x21f   : > { %v1800_v38 = vpop.xlane.xlu0 %1799 }
 0x220   : > { %v1802_v33 = vadd.f32 %v1801_v2, %v1800_v38  ;;  %v1914_v2 = vmul.f32 0.25, %v1906_v43  ;;  %v1885_v38 = vadd.f32 %v4677_v9, %v1861_v40 }
 0x222   : > { %v4656_v54 = vmul.f32 -1.442695, %v1802_v33  ;;  %4876 = vmatmul.mubr.msk.f32.vlgmr.msra.gmra.mxu1 %vm753_vm1, %v1914_v2  ;;  %v1909_v50 = vadd.f32 %v4685_v24, %v1885_v38 }
 0x223   : > { %4888 = vmatpush3.msra.mxu1 %v2075_v55 }
 0x224   : > { %5109 = vpow2.f32 %v4656_v54  ;;  %v4663_v54 = vld [vmem:[%s5348_s29 + $0xc0] ss:$2 sm:$0xff]  ;;  %v1917_v61 = vmul.f32 0.25, %v1909_v50 }
 0x231   : > { %v5110_v3 = vpop.eup %5109 }
 0x232   : > { %v1806_v29 = vadd.f32 1.0, %v5110_v3  ;;  %v4671_v3 = vld [vmem:[%s5348_s29 + $0xc1] ss:$2 sm:$0xff] }
 0x233   : > { %v1863_v58 = vadd.f32 %v4671_v3, %v4663_v54 }
 0x234   : > { %5111 = vrcp.f32 %v1806_v29  ;;  %v1915_v29 = vmul.f32 0.25, %v1907_v39 }
 0x235   : > { %v1887_v12 = vadd.f32 %v4679_v59, %v1863_v58 }
 0x236   : > { %4878 = vmatprep.mubr.msk.f32.mxu1 %vm753_vm1, %v1915_v29 }
 0x237   : > { %v1911_v37 = vadd.f32 %v4687_v30, %v1887_v12 }
 0x239   : > { %v1919_v55 = vmul.f32 0.25, %v1911_v37 }
 0x241   : > { %v5112_v31 = vpop.eup %5111 }
 0x242   : > { %v1809_v57 = vmul.f32 %v5112_v31, %v1802_v33  ;;  %v1862_v33 = vadd.f32 %v4670_v32, %v4662_v17  ;;  %v1908_v31 = vadd.f32 %v4684_v26, %v1884_v49  ;;  %v1818_v26 = vld [vmem:[%s7487_s8] sm:$0x1] }
 0x244   : > { %1813 = vperm.xlu0 %4947, %v1809_v57   ;;  %v2074_v57 = vld [vmem:[%s7488_s9 + $0x8] sm:$0xff]  ;;  %v1886_v11 = vadd.f32 %v4678_v42, %v1862_v33  ;;  %v1916_v16 = vmul.f32 0.25, %v1908_v31 }
 0x245   : > { %4889 = vmatprep.subr.mxu1 %v2074_v57 }
 0x246   : > { %v1910_v20 = vadd.f32 %v4686_v14, %v1886_v11  ;;  %4890 = vmatpush3.msra.mxu1 %v2074_v57 }
 0x247   : > { %4879 = vmatmul.mubr.msk.f32.gmra.mxu1 %vm753_vm1, %v1916_v16  ;;  %4891 = vmatprep.subr.mxu1 %v2073_v19 }
 0x248   : > { %v1918_v10 = vmul.f32 0.25, %v1910_v20  ;;  %4881 = vmatprep.mubr.msk.f32.mxu1 %vm753_vm1, %v1917_v61  ;;  %4892 = vmatpush3.msra.mxu1 %v2073_v19 }
 0x249   : > { %4905 = vmatprep.subr.mxu1 %v2220_v23 }
 0x24b   : > { %4882 = vmatmul.mubr.msk.f32.gmra.mxu1 %vm753_vm1, %v1918_v10 }
 0x24c   : > { %4884 = vmatprep.mubr.msk.f32.mxu1 %vm753_vm1, %v1919_v55 }
 0x24f   : > { %4885 = vmatmul.mubr.msk.f32.gmra.mxu1 %vm753_vm1, %v1920_v63 }
 0x2bf   : > { %v1814_v28 = vpop.permute.xlu0 %1813 }
 0x2c0   : > { %v1816_v35 = vmul.f32 %v1814_v28, %v1810_v0 }
 0x2c2   : > { %v1819_v8 = vadd.f32 %v1818_v26, %v1816_v35 }
 0x2c4   : > { %v4657_v25 = vmul.f32 -1.442695, %v1819_v8 }
 0x2c6   : > { %5113 = vpow2.f32 %v4657_v25  ;;  %v6030_v25 = vld [vmem:[%s7494_s15] sm:$0xff] }
 0x2d3   : > { %v5114_v9 = vpop.eup %5113 }
 0x2d4   : > { %v1823_v62 = vadd.f32 1.0, %v5114_v9  ;;  %v6034_v9 = vrot.slane %v6030_v25, %v5570_v48 }
 0x2d6   : > { %5115 = vrcp.f32 %v1823_v62  ;;  %v2453_v62 = vld [vmem:[#allocation3] sm:$0xff] }
 0x2e2   : > { %v4877_v42 = vpop.f32.mrf.mxu1 }
 0x2e3   : > { %v5116_v43 = vpop.eup %5115 }
 0x2e4   : > { %v2064_v40 = vrot.slane %v5116_v43, %v5567_v47  ;;  %v2454_v43 = vld [vmem:[#allocation3 + $0x8] sm:$0xf] }
 0x2e5   : > { %v2494_v34 = vmul.f32 %v6034_v9, %v2454_v43 }
 0x2e6   : > { %v2065_v24 = vmul.f32 %v2064_v40, %v5867_v13  ;;  %v2066_v17 = vmul.f32 %v2064_v40, %v5864_v46  ;;  %v2067_v39 = vmul.f32 %v2064_v40, %v5870_v51  ;;  %v2068_v49 = vmul.f32 %v2064_v40, %v5873_v22  ;;  %v2022_v22 = vpop.f32.mrf.mxu1 }
 0x2e7   : > { %v2069_v32 = vmul.f32 %v2064_v40, %v5878_v15  ;;  %v2070_v13 = vmul.f32 %v2064_v40, %v5885_v27  ;;  %v2071_v46 = vmul.f32 %v2064_v40, %v5889_v56  ;;  %v2072_v51 = vmul.f32 %v2064_v40, %v5897_v41  ;;  %v4699_v27 = vld [vmem:[%s7489_s10] ss:$0 sm:$0xff] }
 0x2e8   : > { %4893 = vmatprep.mubr.msk.f32.mxu1 %vm1304_vm2, %v2065_v24  ;;  %v4689_v56 = vld [vmem:[%s7491_s12] ss:$0 sm:$0xff]  ;;  %v2493_v24 = vmul.f32 %v6034_v9, %v2453_v62 }
 0x2e9   : > { %4894 = vmatmul.mubr.msk.f32.vlgmr.msra.gmra.mxu1 %vm1304_vm2, %v2066_v17  ;;  %v2023_v31 = vadd.f32 %v4689_v56, %v2022_v22  ;;  %v2028_v58 = vadd.f32 %v4877_v42, %v4689_v56  ;;  %v6039_v40 = vld [vmem:[%s7493_s14] ss:$0 sm:$0xff]  ;;  %v6045_v17 = vrot.slane %v6030_v25, %v5583_v60  ;;  %v2527_v22 = vrot.slane %v2494_v34, 1 }
 0x2ea   : > { %4896 = vmatprep.mubr.msk.f32.mxu1 %vm1304_vm2, %v2067_v39  ;;  %4906 = vmatpush3.msra.mxu1 %v2220_v23  ;;  %v2526_v42 = vrot.slane %v2493_v24, 1  ;;  %v6100_v34 = vrot.slane %v6030_v25, %v5640_v4 }
 0x2ed   : > { %4897 = vmatmul.mubr.msk.f32.gmra.mxu1 %vm1304_vm2, %v2068_v49 }
 0x2ee   : > { %4899 = vmatprep.mubr.msk.f32.mxu1 %vm1304_vm2, %v2069_v32  ;;  %v6052_v32 = vrot.slane %v6030_v25, %v5567_v47 }
 0x2f1   : > { %4900 = vmatmul.mubr.msk.f32.gmra.mxu1 %vm1304_vm2, %v2070_v13 }
 0x2f2   : > { %4902 = vmatprep.mubr.msk.f32.mxu1 %vm1304_vm2, %v2071_v46 }
 0x2f5   : > { %4903 = vmatmul.mubr.msk.f32.gmra.mxu1 %vm1304_vm2, %v2072_v51 }
 0x307   : > { %v4880_v14 = vpop.f32.mrf.mxu1 }
 0x308   : > { %v2038_v16 = vadd.f32 %v4880_v14, %v4689_v56  ;;  %v6060_v14 = vrot.slane %v6030_v25, %v5606_v18 }
 0x309   : > { %v2032_v15 = vpop.f32.mrf.mxu1 }
 0x30a   : > { %v2033_v44 = vadd.f32 %v4689_v56, %v2032_v15  ;;  %v2570_v15 = vmul.f32 %v6045_v17, %v2453_v62 }
 0x30b   : > { %v4883_v2 = vpop.f32.mrf.mxu1 }
 0x30c   : > { %v2048_v36 = vadd.f32 %v4883_v2, %v4689_v56  ;;  %v2571_v2 = vmul.f32 %v6045_v17, %v2454_v43 }
 0x30d   : > { %v2042_v38 = vpop.f32.mrf.mxu1 }
 0x30e   : > { %v2043_v7 = vadd.f32 %v4689_v56, %v2042_v38 }
 0x30f   : > { %v4886_v33 = vpop.f32.mrf.mxu1 }
 0x310   : > { %v2058_v28 = vadd.f32 %v4886_v33, %v4689_v56 }
 0x311   : > { %v2052_v54 = vpop.f32.mrf.mxu1 }
 0x312   : > { %v2053_v0 = vadd.f32 %v4689_v56, %v2052_v54  ;;  %v2473_v56 = vmul.f32 %v6052_v32, %v2453_v62 }
 0x3a9   : > { %v4895_v3 = vpop.f32.mrf.mxu1 }
 0x3aa   : > { %v2179_v41 = vadd.f32 %v4895_v3, %v4699_v27 }
 0x3ab   : > { %v2173_v29 = vpop.f32.mrf.mxu1 }
 0x3ac   : > { %v2174_v57 = vadd.f32 %v4699_v27, %v2173_v29  ;;  %v5993_v50 = vadd.f32 %v2179_v41, %v2028_v58  ;;  %v2528_v41 = vsel %vm2525_vm7, %v2526_v42, %v2527_v22  ;;  %v2604_v58 = vrot.slane %v2571_v2, 2  ;;  %v6108_v42 = vld [vmem:[#allocation3 + $0x18] sm:$0xf] }
 0x3ad   : > { %v4898_v59 = vpop.f32.mrf.mxu1 }
 0x3ae   : > { %v5991_v30 = vadd.f32 %v2174_v57, %v2023_v31  ;;  %7572 = vst [vmem:[#allocation8_spill] sm:$0xff] %v5993_v50  ;;  %v2189_v11 = vadd.f32 %v4898_v59, %v4699_v27  ;;  %v2603_v57 = vrot.slane %v2570_v15, 2  ;;  %v2647_v59 = vmul.f32 %v6060_v14, %v2453_v62 }
 0x3af   : > { %v2183_v5 = vpop.f32.mrf.mxu1 }
 0x3b0   : > { %7571 = vst [vmem:[#allocation7_spill] sm:$0xff] %v5991_v30  ;;  %v2184_v6 = vadd.f32 %v4699_v27, %v2183_v5  ;;  %4907 = vmatprep.mubr.msk.f32.mxu1 %vm2228_vm5, %v5991_v30  ;;  %v6001_v19 = vadd.f32 %v2189_v11, %v2038_v16  ;;  %v2648_v11 = vmul.f32 %v6060_v14, %v2454_v43 }
 0x3b1   : > { %v4901_v12 = vpop.f32.mrf.mxu1  ;;  %4908 = vmatmul.mubr.msk.f32.vlgmr.msra.gmra.mxu1 %vm2228_vm5, %v5993_v50  ;;  %v2558_v16 = vadd.f32 %v2528_v41, %v2473_v56 }
 0x3b2   : > { %v5999_v53 = vadd.f32 %v2184_v6, %v2033_v44  ;;  %7574 = vst [vmem:[#allocation10_spill] sm:$0xff] %v6001_v19  ;;  %v2199_v61 = vadd.f32 %v4901_v12, %v4699_v27 }
 0x3b3   : > { %v2193_v20 = vpop.f32.mrf.mxu1 }
 0x3b4   : > { %7573 = vst [vmem:[#allocation9_spill] sm:$0xff] %v5999_v53  ;;  %v2194_v37 = vadd.f32 %v4699_v27, %v2193_v20  ;;  %4910 = vmatprep.mubr.msk.f32.mxu1 %vm2228_vm5, %v5999_v53  ;;  %v6009_v52 = vadd.f32 %v2199_v61, %v2048_v36  ;;  %v2680_v36 = vrot.slane %v2647_v59, 3 }
 0x3b5   : > { %v4904_v10 = vpop.f32.mrf.mxu1  ;;  %4911 = vmatmul.mubr.msk.f32.gmra.mxu1 %vm2228_vm5, %v6001_v19 }
 0x3b6   : > { %v6007_v55 = vadd.f32 %v2194_v37, %v2043_v7  ;;  %7576 = vst [vmem:[#allocation12_spill] sm:$0xff] %v6009_v52  ;;  %v2209_v63 = vadd.f32 %v4904_v10, %v4699_v27  ;;  %v2605_v37 = vsel %vm2602_vm8, %v2603_v57, %v2604_v58  ;;  %v2681_v10 = vrot.slane %v2648_v11, 3 }
 0x3b7   : > { %v2203_v23 = vpop.f32.mrf.mxu1  ;;  %v2838_v11 = vmul.f32 %v6100_v34, %v6108_v42 }
 0x3b8   : > { %7575 = vst [vmem:[#allocation11_spill] sm:$0xff] %v6007_v55  ;;  %v2204_v26 = vadd.f32 %v4699_v27, %v2203_v23  ;;  %4913 = vmatprep.mubr.msk.f32.mxu1 %vm2228_vm5, %v6007_v55  ;;  %v6017_v8 = vadd.f32 %v2209_v63, %v2058_v28  ;;  %v6070_v27 = vrot.slane %v6030_v25, %v5627_v45  ;;  %v6096_v28 = vld [vmem:[#allocation3 + $0x18] sm:$0xf] }
 0x3b9   : > { %4914 = vmatmul.mubr.msk.f32.gmra.mxu1 %vm2228_vm5, %v6009_v52 }
 0x3ba   : > { %v6015_v35 = vadd.f32 %v2204_v26, %v2053_v0  ;;  %7578 = vst [vmem:[#allocation14_spill] sm:$0xff] %v6017_v8  ;;  %v2724_v61 = vmul.f32 %v6070_v27, %v2453_v62  ;;  %v2725_v20 = vmul.f32 %v6070_v27, %v2454_v43  ;;  %v6094_v26 = vld [vmem:[#allocation3 + $0x10] sm:$0xff]  ;;  %v2635_v62 = vadd.f32 %v2605_v37, %v2558_v16  ;;  %v6133_v16 = vld [vmem:[%s7494_s15 + $0x8] sm:$0xff] }
 0x3bb   : > { %v2495_v2 = vmul.f32 %v6034_v9, %v6094_v26  ;;  %v2837_v59 = vmul.f32 %v6100_v34, %v6094_v26 }
 0x3bc   : > { %7577 = vst [vmem:[#allocation13_spill] sm:$0xff] %v6015_v35  ;;  %4916 = vmatprep.mubr.msk.f32.mxu1 %vm2228_vm5, %v6015_v35  ;;  %v2756_v43 = vrot.slane %v2724_v61, 4  ;;  %v2757_v24 = vrot.slane %v2725_v20, 4  ;;  %v2572_v20 = vmul.f32 %v6045_v17, %v6094_v26 }
 0x3bd   : > { %4917 = vmatmul.mubr.msk.f32.gmra.mxu1 %vm2228_vm5, %v6017_v8 }
 0x3be   : > { %v2758_v57 = vsel %vm850_vm0, %v2756_v43, %v2757_v24  ;;  %v6143_v24 = vrot.slane %v6133_v16, %v5567_v47 }
 0x471   : > { %v4909_v39 = vpop.f32.mrf.mxu1 }
 0x472   : > { %v6048_v49 = vadd.f32 %v4909_v39, %v6039_v40  ;;  %v2682_v39 = vsel %vm2679_vm9, %v2680_v36, %v2681_v10 }
 0x473   : > { %v2319_v13 = vpop.f32.mrf.mxu1 }
 0x474   : > { %v4718_v46 = vmul.f32 -1.442695, %v6048_v49  ;;  %v6056_v51 = vadd.f32 %v6039_v40, %v2319_v13 }
 0x475   : > { %v4912_v38 = vpop.f32.mrf.mxu1 }
 0x476   : > { %5117 = vpow2.f32 %v4718_v46  ;;  %v4717_v33 = vmul.f32 -1.442695, %v6056_v51  ;;  %v6066_v54 = vadd.f32 %v4912_v38, %v6039_v40  ;;  %v6106_v46 = vrot.slane %v6030_v25, %v5637_v1 }
 0x477   : > { %v2329_v3 = vpop.f32.mrf.mxu1  ;;  %v2496_v38 = vmul.f32 %v6034_v9, %v6096_v28 }
 0x478   : > { %5119 = vpow2.f32 %v4717_v33  ;;  %v4720_v29 = vmul.f32 -1.442695, %v6066_v54  ;;  %v6076_v31 = vadd.f32 %v6039_v40, %v2329_v3  ;;  %v6120_v3 = vrot.slane %v6030_v25, %v5688_v21 }
 0x479   : > { %v4915_v5 = vpop.f32.mrf.mxu1  ;;  %v2817_v25 = vmul.f32 %v6106_v46, %v6094_v26  ;;  %v2530_v61 = vrot.slane %v2496_v38, 1 }
 0x47a   : > { %5121 = vpow2.f32 %v4720_v29  ;;  %v4719_v44 = vmul.f32 -1.442695, %v6076_v31  ;;  %v6082_v6 = vadd.f32 %v4915_v5, %v6039_v40  ;;  %v2712_v29 = vadd.f32 %v2682_v39, %v2635_v62 }
 0x47b   : > { %v2339_v12 = vpop.f32.mrf.mxu1  ;;  %v2870_v62 = vrot.slane %v2838_v11, 1  ;;  %v2913_v43 = vmul.f32 %v6120_v3, %v6094_v26  ;;  %v2914_v39 = vmul.f32 %v6120_v3, %v6108_v42 }
 0x47c   : > { %5123 = vpow2.f32 %v4719_v44  ;;  %v4722_v7 = vmul.f32 -1.442695, %v6082_v6  ;;  %v6089_v63 = vadd.f32 %v6039_v40, %v2339_v12  ;;  %v2529_v12 = vrot.slane %v2495_v2, 1 }
 0x47d   : > { %v4918_v23 = vpop.f32.mrf.mxu1  ;;  %v2788_v37 = vadd.f32 %v2758_v57, %v2712_v29  ;;  %v2474_v2 = vmul.f32 %v6052_v32, %v6094_v26  ;;  %v2649_v29 = vmul.f32 %v6060_v14, %v6094_v26 }
 0x47e   : > { %5125 = vpow2.f32 %v4722_v7  ;;  %v6092_v0 = vadd.f32 %v4918_v23, %v6039_v40  ;;  %v4721_v13 = vmul.f32 -1.442695, %v6089_v63  ;;  %v2573_v7 = vmul.f32 %v6045_v17, %v6096_v28 }
 0x47f   : > { %v2349_v22 = vpop.f32.mrf.mxu1  ;;  %v2869_v23 = vrot.slane %v2837_v59, 1  ;;  %v2531_v38 = vsel %vm2525_vm7, %v2529_v12, %v2530_v61  ;;  %v2825_v59 = vadd.f32 %v2817_v25, %v2788_v37  ;;  %v2990_v12 = vmul.f32 %v6143_v24, %v6108_v42 }
 0x480   : > { %v4724_v33 = vmul.f32 -1.442695, %v6092_v0  ;;  %v6116_v56 = vadd.f32 %v6039_v40, %v2349_v22  ;;  %5127 = vpow2.f32 %v4721_v13  ;;  %v2559_v61 = vadd.f32 %v2531_v38, %v2474_v2 }
 0x481   : > { %v2871_v11 = vsel %vm2525_vm7, %v2869_v23, %v2870_v62  ;;  %v2727_v25 = vmul.f32 %v6070_v27, %v6096_v28 }
 0x482   : > { %7579 = vst [vmem:[#allocation15_spill] sm:$0xff] %v6116_v56  ;;  %v4723_v5 = vmul.f32 -1.442695, %v6116_v56  ;;  %v2901_v37 = vadd.f32 %v2871_v11, %v2825_v59  ;;  %v2451_v11 = vld [vmem:[%s7494_s15 + $0x10] sm:$0xff] }
 0x483   : > { %v5118_v15 = vpop.eup %5117 }
 0x484   : > { %v2383_v41 = vadd.f32 1.0, %v5118_v15  ;;  %v6149_v15 = vrot.slane %v6133_v16, %v5570_v48 }
 0x485   : > { %v5120_v58 = vpop.eup %5119 }
 0x486   : > { %5129 = vrcp.f32 %v2383_v41  ;;  %v2382_v40 = vadd.f32 1.0, %v5120_v58  ;;  %v2607_v41 = vrot.slane %v2573_v7, 2  ;;  %v2650_v58 = vmul.f32 %v6060_v14, %v6096_v28 }
 0x487   : > { %v5122_v44 = vpop.eup %5121  ;;  %5131 = vpow2.f32 %v4724_v33  ;;  %v2606_v33 = vrot.slane %v2572_v20, 2  ;;  %v2683_v7 = vrot.slane %v2649_v29, 3  ;;  %v3065_v23 = vmul.f32 %v6149_v15, %v6094_v26 }
 0x488   : > { %5133 = vrcp.f32 %v2382_v40  ;;  %v2385_v36 = vadd.f32 1.0, %v5122_v44  ;;  %v2946_v40 = vrot.slane %v2914_v39, 2  ;;  %v2989_v44 = vmul.f32 %v6143_v24, %v6094_v26 }
 0x489   : > { %v5124_v10 = vpop.eup %5123  ;;  %5135 = vpow2.f32 %v4723_v5  ;;  %v2945_v5 = vrot.slane %v2913_v43, 2  ;;  %v2608_v20 = vsel %vm2602_vm8, %v2606_v33, %v2607_v41 }
 0x48a   : > { %5137 = vrcp.f32 %v2385_v36  ;;  %v2384_v13 = vadd.f32 1.0, %v5124_v10  ;;  %v2726_v36 = vmul.f32 %v6070_v27, %v6094_v26  ;;  %v2684_v10 = vrot.slane %v2650_v58, 3 }
 0x48b   : > { %v5126_v22 = vpop.eup %5125  ;;  %v2947_v43 = vsel %vm2602_vm8, %v2945_v5, %v2946_v40  ;;  %v3021_v39 = vrot.slane %v2989_v44, 3  ;;  %v2636_v41 = vadd.f32 %v2608_v20, %v2559_v61  ;;  %v2760_v58 = vrot.slane %v2727_v25, 4 }
 0x48c   : > { %5139 = vrcp.f32 %v2384_v13  ;;  %v2387_v57 = vadd.f32 1.0, %v5126_v22  ;;  %v3022_v13 = vrot.slane %v2990_v12, 3  ;;  %v3066_v22 = vmul.f32 %v6149_v15, %v6108_v42 }
 0x48d   : > { %v5128_v62 = vpop.eup %5127  ;;  %v2685_v28 = vsel %vm2679_vm9, %v2683_v7, %v2684_v10  ;;  %v2977_v59 = vadd.f32 %v2947_v43, %v2901_v37  ;;  %v3097_v40 = vrot.slane %v3065_v23, 4  ;;  %v6183_v12 = vrot.slane %v6133_v16, %v5606_v18 }
 0x48e   : > { %5141 = vrcp.f32 %v2387_v57  ;;  %v2759_v57 = vrot.slane %v2726_v36, 4  ;;  %v3023_v5 = vsel %vm2679_vm9, %v3021_v39, %v3022_v13  ;;  %v6187_v61 = vrot.slane %v6133_v16, %v5627_v45 }
 0x48f   : > { %v6191_v20 = vrot.slane %v6133_v16, %v5637_v1  ;;  %v2386_v7 = vadd.f32 1.0, %v5128_v62  ;;  %v6199_v36 = vrot.slane %v6133_v16, %v5688_v21  ;;  %v6204_v23 = vrot.slane %v2451_v11, %v5567_v47 }
 0x490   : > { %v2713_v43 = vadd.f32 %v2685_v28, %v2636_v41  ;;  %v3053_v39 = vadd.f32 %v3023_v5, %v2977_v59  ;;  %v6207_v13 = vrot.slane %v2451_v11, %v5570_v48  ;;  %v6220_v41 = vrot.slane %v2451_v11, %v5637_v1 }
 0x491   : > { %5143 = vrcp.f32 %v2386_v7  ;;  %v6223_v48 = vrot.slane %v2451_v11, %v5640_v4  ;;  %v6226_v28 = vrot.slane %v2451_v11, %v5688_v21 }
 0x492   : > { %7582 = vst [vmem:[#allocation18_spill] sm:$0xff] %v6220_v41 }
 0x493   : > { %v5130_v2 = vpop.eup %5129  ;;  %7583 = vst [vmem:[#allocation19_spill] sm:$0xff] %v6223_v48  ;;  %7584 = vst [vmem:[#allocation20_spill] sm:$0xff] %v6226_v28 }
 0x494   : > { %v5132_v38 = vpop.eup %5131  ;;  %v2407_v33 = vmul.f32 %v5130_v2, %v6048_v49  ;;  %v3098_v49 = vrot.slane %v3066_v22, 4  ;;  %v2761_v22 = vsel %vm850_vm0, %v2759_v57, %v2760_v58 }
 0x495   : > { %v5134_v29 = vpop.eup %5133  ;;  %v2389_v25 = vadd.f32 1.0, %v5132_v38  ;;  %v6214_v38 = vrot.slane %v2451_v11, %v5583_v60  ;;  %v6236_v1 = vadd.f32 %v2761_v22, %v2713_v43 }
 0x496   : > { %v5136_v26 = vpop.eup %5135  ;;  %2416 = vst.msk [vmem:[#allocation3 + $0x32] sm:$0xff] %vm1304_vm2, %v2407_v33  ;;  %v2406_v42 = vmul.f32 %v5134_v29, %v6056_v51  ;;  %v6195_v51 = vrot.slane %v6133_v16, %v5640_v4  ;;  %v3099_v2 = vsel %vm850_vm0, %v3097_v40, %v3098_v49  ;;  %v6217_v29 = vrot.slane %v2451_v11, %v5606_v18 }
 0x497   : > { %v5138_v44 = vpop.eup %5137  ;;  %v2388_v62 = vadd.f32 1.0, %v5136_v26  ;;  %7580 = vst [vmem:[#allocation16_spill] sm:$0xff] %v6214_v38  ;;  %5145 = vrcp.f32 %v2389_v25  ;;  %v6234_v18 = vrot.slane %v6133_v16, %v5583_v60  ;;  %v6238_v59 = vadd.f32 %v3099_v2, %v3053_v39 }
 0x498   : > { %2415 = vst.msk [vmem:[#allocation3 + $0x22] sm:$0xff] %vm1304_vm2, %v2406_v42  ;;  %v2409_v10 = vmul.f32 %v5138_v44, %v6066_v54  ;;  %7581 = vst [vmem:[#allocation17_spill] sm:$0xff] %v6217_v29 }
 0x499   : > { %v5140_v37 = vpop.eup %5139  ;;  %5147 = vrcp.f32 %v2388_v62 }
 0x49a   : > { %2418 = vst.msk [vmem:[#allocation3 + $0x52] sm:$0xff] %vm1304_vm2, %v2409_v10  ;;  %v2408_v33 = vmul.f32 %v5140_v37, %v6076_v31 }
 0x49b   : > { %v5142_v54 = vpop.eup %5141 }
 0x49c   : > { %2417 = vst.msk [vmem:[#allocation3 + $0x42] sm:$0xff] %vm1304_vm2, %v2408_v33  ;;  %v2411_v31 = vmul.f32 %v5142_v54, %v6082_v6 }
 0x49d   : > { %v6230_v57 = vld [vmem:[#allocation3 + $0x30] sm:$0xff]  ;;  %v2460_v58 = vld [vmem:[#allocation3 + $0x38] sm:$0xf] }
 0x49e   : > { %v2476_v4 = vmul.f32 %v6052_v32, %v6230_v57  ;;  %v2499_v21 = vmul.f32 %v6034_v9, %v6230_v57  ;;  %v2500_v6 = vmul.f32 %v6034_v9, %v2460_v58  ;;  %v2576_v26 = vmul.f32 %v6045_v17, %v6230_v57  ;;  %2420 = vst.msk [vmem:[#allocation3 + $0x72] sm:$0xff] %vm1304_vm2, %v2411_v31  ;;  %v2802_v7 = vld [vmem:[#allocation3 + $0x38] sm:$0xf] }
 0x49f   : > { %v2577_v60 = vmul.f32 %v6045_v17, %v2460_v58  ;;  %v2653_v16 = vmul.f32 %v6060_v14, %v6230_v57  ;;  %v2654_v11 = vmul.f32 %v6060_v14, %v2460_v58  ;;  %v2730_v42 = vmul.f32 %v6070_v27, %v6230_v57 }
 0x4a0   : > { %v2535_v5 = vrot.slane %v2499_v21, 1  ;;  %v2536_v40 = vrot.slane %v2500_v6, 1  ;;  %v2612_v49 = vrot.slane %v2576_v26, 2  ;;  %v2731_v44 = vmul.f32 %v6070_v27, %v2460_v58 }
 0x4a1   : > { %v2613_v10 = vrot.slane %v2577_v60, 2  ;;  %v2689_v25 = vrot.slane %v2653_v16, 3  ;;  %v2690_v37 = vrot.slane %v2654_v11, 3  ;;  %v2765_v43 = vrot.slane %v2730_v42, 4 }
 0x4a2   : > { %v2537_v39 = vsel %vm2525_vm7, %v2535_v5, %v2536_v40  ;;  %v2766_v62 = vrot.slane %v2731_v44, 4  ;;  %v6258_v22 = vmul.f32 %v6106_v46, %v6230_v57  ;;  %v2841_v2 = vmul.f32 %v6100_v34, %v6230_v57 }
 0x4a3   : > { %v2561_v33 = vadd.f32 %v2537_v39, %v2476_v4  ;;  %v2614_v54 = vsel %vm2602_vm8, %v2612_v49, %v2613_v10  ;;  %v2691_v31 = vsel %vm2679_vm9, %v2689_v25, %v2690_v37  ;;  %v2842_v58 = vmul.f32 %v6100_v34, %v2802_v7  ;;  %v3140_v10 = vld [vmem:[#allocation3 + $0x38] sm:$0xf] }
 0x4a4   : > { %v2767_v21 = vsel %vm850_vm0, %v2765_v43, %v2766_v62  ;;  %v2875_v6 = vrot.slane %v2841_v2, 1  ;;  %v2917_v26 = vmul.f32 %v6120_v3, %v6230_v57  ;;  %v2918_v60 = vmul.f32 %v6120_v3, %v2802_v7  ;;  %v6278_v62 = vpop.eup %5143 }
 0x4a5   : > { %v2638_v16 = vadd.f32 %v2614_v54, %v2561_v33  ;;  %v2876_v11 = vrot.slane %v2842_v58, 1  ;;  %v2993_v42 = vmul.f32 %v6143_v24, %v6230_v57  ;;  %v2994_v4 = vmul.f32 %v6143_v24, %v2802_v7 }
 0x4a6   : > { %v2951_v5 = vrot.slane %v2917_v26, 2  ;;  %v2952_v40 = vrot.slane %v2918_v60, 2  ;;  %v3069_v49 = vmul.f32 %v6149_v15, %v6230_v57  ;;  %v3070_v44 = vmul.f32 %v6149_v15, %v2802_v7  ;;  %v6287_v26 = vpop.eup %5145 }
 0x4a7   : > { %v2715_v25 = vadd.f32 %v2691_v31, %v2638_v16  ;;  %v6276_v37 = vsel %vm2525_vm7, %v2875_v6, %v2876_v11  ;;  %v3027_v43 = vrot.slane %v2993_v42, 3  ;;  %v3028_v39 = vrot.slane %v2994_v4, 3  ;;  %v6297_v16 = vpop.eup %5147 }
 0x4a8   : > { %v6281_v2 = vsel %vm2602_vm8, %v2951_v5, %v2952_v40  ;;  %v3103_v33 = vrot.slane %v3069_v49, 4  ;;  %v3104_v54 = vrot.slane %v3070_v44, 4  ;;  %v6285_v58 = vmul.f32 %v6234_v18, %v6230_v57  ;;  %7585 = vst [vmem:[#allocation21_spill] sm:$0xff] %v6297_v16 }
 0x4a9   : > { %v6289_v7 = vadd.f32 %v2767_v21, %v2715_v25  ;;  %v6292_v31 = vsel %vm2679_vm9, %v3027_v43, %v3028_v39  ;;  %v3179_v6 = vmul.f32 %v6183_v12, %v6230_v57  ;;  %v3180_v60 = vmul.f32 %v6183_v12, %v3140_v10  ;;  %v3479_v25 = vld [vmem:[#allocation3 + $0x38] sm:$0xf] }
 0x4aa   : > { %v6300_v11 = vsel %vm850_vm0, %v3103_v33, %v3104_v54  ;;  %v3255_v42 = vmul.f32 %v6187_v61, %v6230_v57  ;;  %v3256_v4 = vmul.f32 %v6187_v61, %v3140_v10  ;;  %v3331_v21 = vmul.f32 %v6191_v20, %v6230_v57 }
 0x4ab   : > { %v3212_v5 = vrot.slane %v3179_v6, 1  ;;  %v3213_v40 = vrot.slane %v3180_v60, 1  ;;  %v3332_v49 = vmul.f32 %v6191_v20, %v3140_v10  ;;  %v3407_v44 = vmul.f32 %v6195_v51, %v6230_v57 }
 0x4ac   : > { %v3288_v43 = vrot.slane %v3255_v42, 2  ;;  %v3289_v39 = vrot.slane %v3256_v4, 2  ;;  %v3364_v33 = vrot.slane %v3331_v21, 3  ;;  %v3408_v54 = vmul.f32 %v6195_v51, %v3140_v10 }
 0x4ad   : > { %v6312_v35 = vsel %vm2525_vm7, %v3212_v5, %v3213_v40  ;;  %v3365_v8 = vrot.slane %v3332_v49, 3  ;;  %v3440_v55 = vrot.slane %v3407_v44, 4  ;;  %v6316_v6 = vmul.f32 %v6199_v36, %v6230_v57  ;;  %v6338_v49 = vld [vmem:[#allocation3 + $0x20] sm:$0xff] }
 0x4ae   : > { %v6319_v60 = vsel %vm2602_vm8, %v3288_v43, %v3289_v39  ;;  %v3441_v52 = vrot.slane %v3408_v54, 4  ;;  %v3518_v42 = vmul.f32 %v6204_v23, %v6230_v57  ;;  %v3519_v4 = vmul.f32 %v6204_v23, %v3479_v25 }
 0x4af   : > { %7586 = vst [vmem:[#allocation22_spill] sm:$0xff] %v6316_v6  ;;  %v6325_v10 = vsel %vm2679_vm9, %v3364_v33, %v3365_v8  ;;  %v6329_v21 = vmul.f32 %v6207_v13, %v6230_v57  ;;  %v6332_v5 = vmul.f32 %v6207_v13, %v3479_v25  ;;  %v6336_v40 = vmul.f32 %v6214_v38, %v6230_v57  ;;  %v2458_v33 = vld [vmem:[#allocation3 + $0x28] sm:$0xf] }
 0x4b0   : > { %v6341_v44 = vsel %vm850_vm0, %v3440_v55, %v3441_v52  ;;  %v3550_v43 = vrot.slane %v3518_v42, 1  ;;  %v3551_v39 = vrot.slane %v3519_v4, 1  ;;  %v6344_v8 = vmul.f32 %v6214_v38, %v3479_v25 }
 0x4b1   : > { %7587 = vst [vmem:[#allocation23_spill] sm:$0xff] %v6329_v21  ;;  %7588 = vst [vmem:[#allocation24_spill] sm:$0xff] %v6332_v5  ;;  %v6351_v30 = vmul.f32 %v6217_v29, %v6230_v57  ;;  %v6358_v52 = vmul.f32 %v6217_v29, %v3479_v25  ;;  %v2475_v42 = vmul.f32 %v6052_v32, %v6338_v49 }
 0x4b2   : > { %7589 = vst [vmem:[#allocation25_spill] sm:$0xff] %v6336_v40  ;;  %7590 = vst [vmem:[#allocation26_spill] sm:$0xff] %v6344_v8  ;;  %v6354_v50 = vsel %vm2525_vm7, %v3550_v43, %v3551_v39  ;;  %v2497_v19 = vmul.f32 %v6034_v9, %v6338_v49  ;;  %v2498_v54 = vmul.f32 %v6034_v9, %v2458_v33  ;;  %v2800_v8 = vld [vmem:[#allocation3 + $0x28] sm:$0xf] }
 0x4b3   : > { %7591 = vst [vmem:[#allocation27_spill] sm:$0xff] %v6351_v30  ;;  %7592 = vst [vmem:[#allocation28_spill] sm:$0xff] %v6354_v50  ;;  %v2574_v57 = vmul.f32 %v6045_v17, %v6338_v49  ;;  %v2575_v39 = vmul.f32 %v6045_v17, %v2458_v33  ;;  %v2651_v25 = vmul.f32 %v6060_v14, %v6338_v49 }
 0x4b4   : > { %7593 = vst [vmem:[#allocation29_spill] sm:$0xff] %v6358_v52  ;;  %v2652_v55 = vmul.f32 %v6060_v14, %v2458_v33  ;;  %v2532_v53 = vrot.slane %v2497_v19, 1  ;;  %v2533_v47 = vrot.slane %v2498_v54, 1  ;;  %v2728_v28 = vmul.f32 %v6070_v27, %v6338_v49 }
 0x4b5   : > { %v2609_v4 = vrot.slane %v2574_v57, 2  ;;  %v2610_v48 = vrot.slane %v2575_v39, 2  ;;  %v2686_v45 = vrot.slane %v2651_v25, 3  ;;  %v2729_v40 = vmul.f32 %v6070_v27, %v2458_v33 }
 0x4b6   : > { %v2687_v30 = vrot.slane %v2652_v55, 3  ;;  %v2534_v43 = vsel %vm2525_vm7, %v2532_v53, %v2533_v47  ;;  %v2762_v52 = vrot.slane %v2728_v28, 4  ;;  %v2818_v21 = vmul.f32 %v6106_v46, %v6338_v49 }
 0x4b7   : > { %v2839_v19 = vmul.f32 %v6100_v34, %v6338_v49  ;;  %v2560_v54 = vadd.f32 %v2534_v43, %v2475_v42  ;;  %v2611_v57 = vsel %vm2602_vm8, %v2609_v4, %v2610_v48  ;;  %v2763_v39 = vrot.slane %v2729_v40, 4 }
 0x4b8   : > { %v2688_v5 = vsel %vm2679_vm9, %v2686_v45, %v2687_v30  ;;  %v2826_v55 = vadd.f32 %v2818_v21, %v6236_v1  ;;  %v2840_v33 = vmul.f32 %v6100_v34, %v2800_v8  ;;  %v2915_v47 = vmul.f32 %v6120_v3, %v6338_v49 }
 0x4b9   : > { %v2872_v25 = vrot.slane %v2839_v19, 1  ;;  %v2637_v53 = vadd.f32 %v2611_v57, %v2560_v54  ;;  %v2764_v28 = vsel %vm850_vm0, %v2762_v52, %v2763_v39  ;;  %v2916_v50 = vmul.f32 %v6120_v3, %v2800_v8  ;;  %v3138_v19 = vld [vmem:[#allocation3 + $0x28] sm:$0xf] }
 0x4ba   : > { %v2991_v42 = vmul.f32 %v6143_v24, %v6338_v49  ;;  %v2873_v48 = vrot.slane %v2840_v33, 1  ;;  %v2948_v4 = vrot.slane %v2915_v47, 2  ;;  %v2992_v45 = vmul.f32 %v6143_v24, %v2800_v8 }
 0x4bb   : > { %v3067_v30 = vmul.f32 %v6149_v15, %v6338_v49  ;;  %v2714_v1 = vadd.f32 %v2688_v5, %v2637_v53  ;;  %v2949_v21 = vrot.slane %v2916_v50, 2  ;;  %v3068_v43 = vmul.f32 %v6149_v15, %v2800_v8 }
 0x4bc   : > { %v3024_v40 = vrot.slane %v2991_v42, 3  ;;  %v2874_v52 = vsel %vm2525_vm7, %v2872_v25, %v2873_v48  ;;  %v3025_v54 = vrot.slane %v2992_v45, 3  ;;  %v3157_v39 = vmul.f32 %v6234_v18, %v6338_v49 }
 0x4bd   : > { %v3100_v57 = vrot.slane %v3067_v30, 4  ;;  %v2790_v33 = vadd.f32 %v2764_v28, %v2714_v1  ;;  %v2902_v47 = vadd.f32 %v2874_v52, %v2826_v55  ;;  %v2950_v6 = vsel %vm2602_vm8, %v2948_v4, %v2949_v21 }
 0x4be   : > { %v3101_v16 = vrot.slane %v3068_v43, 4  ;;  %v3026_v56 = vsel %vm2679_vm9, %v3024_v40, %v3025_v54  ;;  %v3165_v50 = vadd.f32 %v3157_v39, %v6238_v59  ;;  %v3177_v5 = vmul.f32 %v6183_v12, %v6338_v49 }
 0x4bf   : > { %v3178_v8 = vmul.f32 %v6183_v12, %v3138_v19  ;;  %v2827_v25 = vadd.f32 %v6258_v22, %v2790_v33  ;;  %v2978_v53 = vadd.f32 %v2950_v6, %v2902_v47  ;;  %v3253_v55 = vmul.f32 %v6187_v61, %v6338_v49  ;;  %v6415_v6 = vld [vmem:[#allocation3 + $0x50] sm:$0xff] }
 0x4c0   : > { %v3102_v42 = vsel %vm850_vm0, %v3100_v57, %v3101_v16  ;;  %v3209_v28 = vrot.slane %v3177_v5, 1  ;;  %v3254_v4 = vmul.f32 %v6187_v61, %v3138_v19  ;;  %v3329_v59 = vmul.f32 %v6191_v20, %v6338_v49 }
 0x4c1   : > { %v3210_v48 = vrot.slane %v3178_v8, 1  ;;  %v6412_v45 = vadd.f32 %v6276_v37, %v2827_v25  ;;  %v3054_v30 = vadd.f32 %v3026_v56, %v2978_v53  ;;  %v3285_v1 = vrot.slane %v3253_v55, 2  ;;  %v2464_v37 = vld [vmem:[#allocation3 + $0x58] sm:$0xf] }
 0x4c2   : > { %v3330_v22 = vmul.f32 %v6191_v20, %v3138_v19  ;;  %v3286_v21 = vrot.slane %v3254_v4, 2  ;;  %v3361_v40 = vrot.slane %v3329_v59, 3  ;;  %v3405_v43 = vmul.f32 %v6195_v51, %v6338_v49 }
 0x4c3   : > { %v3211_v16 = vsel %vm2525_vm7, %v3209_v28, %v3210_v48  ;;  %v3130_v52 = vadd.f32 %v3102_v42, %v3054_v30  ;;  %v3406_v39 = vmul.f32 %v6195_v51, %v3138_v19  ;;  %v2478_v47 = vmul.f32 %v6052_v32, %v6415_v6 }
 0x4c4   : > { %v3241_v54 = vadd.f32 %v3211_v16, %v3165_v50  ;;  %v3362_v57 = vrot.slane %v3330_v22, 3  ;;  %v3287_v56 = vsel %vm2602_vm8, %v3285_v1, %v3286_v21  ;;  %v3437_v33 = vrot.slane %v3405_v43, 4  ;;  %v2806_v43 = vld [vmem:[#allocation3 + $0x58] sm:$0xf] }
 0x4c5   : > { %v2503_v5 = vmul.f32 %v6034_v9, %v6415_v6  ;;  %v3166_v8 = vadd.f32 %v6285_v58, %v3130_v52  ;;  %v3438_v53 = vrot.slane %v3406_v39, 4  ;;  %v2504_v50 = vmul.f32 %v6034_v9, %v2464_v37 }
 0x4c6   : > { %v3317_v25 = vadd.f32 %v3287_v56, %v3241_v54  ;;  %v3363_v49 = vsel %vm2679_vm9, %v3361_v40, %v3362_v57  ;;  %v2580_v19 = vmul.f32 %v6045_v17, %v6415_v6  ;;  %v2581_v55 = vmul.f32 %v6045_v17, %v2464_v37 }
 0x4c7   : > { %v2541_v42 = vrot.slane %v2503_v5, 1  ;;  %v6433_v28 = vadd.f32 %v6312_v35, %v3166_v8  ;;  %v3439_v4 = vsel %vm850_vm0, %v3437_v33, %v3438_v53  ;;  %v2657_v58 = vmul.f32 %v6060_v14, %v6415_v6 }
 0x4c8   : > { %v3393_v48 = vadd.f32 %v3363_v49, %v3317_v25  ;;  %v2542_v59 = vrot.slane %v2504_v50, 1  ;;  %v2618_v30 = vrot.slane %v2580_v19, 2  ;;  %v2619_v1 = vrot.slane %v2581_v55, 2 }
 0x4c9   : > { %v2658_v22 = vmul.f32 %v6060_v14, %v2464_v37  ;;  %v2695_v21 = vrot.slane %v2657_v58, 3  ;;  %v2734_v40 = vmul.f32 %v6070_v27, %v6415_v6  ;;  %v2735_v35 = vmul.f32 %v6070_v27, %v2464_v37 }
 0x4ca   : > { %v6439_v16 = vadd.f32 %v3439_v4, %v3393_v48  ;;  %v2543_v52 = vsel %vm2525_vm7, %v2541_v42, %v2542_v59  ;;  %v2620_v54 = vsel %vm2602_vm8, %v2618_v30, %v2619_v1  ;;  %v6448_v39 = vmul.f32 %v6106_v46, %v6415_v6 }
 0x4cb   : > { %v2696_v57 = vrot.slane %v2658_v22, 3  ;;  %v2563_v56 = vadd.f32 %v2543_v52, %v2478_v47  ;;  %v2771_v33 = vrot.slane %v2734_v40, 4  ;;  %v2772_v5 = vrot.slane %v2735_v35, 4 }
 0x4cc   : > { %7594 = vst [vmem:[#allocation30_spill] sm:$0xff] %v6439_v16  ;;  %v2845_v8 = vmul.f32 %v6100_v34, %v6415_v6  ;;  %v2846_v37 = vmul.f32 %v6100_v34, %v2806_v43  ;;  %v2921_v49 = vmul.f32 %v6120_v3, %v6415_v6  ;;  %v2922_v53 = vmul.f32 %v6120_v3, %v2806_v43 }
 0x4cd   : > { %v2697_v25 = vsel %vm2679_vm9, %v2695_v21, %v2696_v57  ;;  %v2640_v50 = vadd.f32 %v2620_v54, %v2563_v56  ;;  %v2773_v42 = vsel %vm850_vm0, %v2771_v33, %v2772_v5  ;;  %v2997_v47 = vmul.f32 %v6143_v24, %v6415_v6  ;;  %v3144_v21 = vld [vmem:[#allocation3 + $0x58] sm:$0xf] }
 0x4ce   : > { %v2881_v19 = vrot.slane %v2845_v8, 1  ;;  %v2882_v55 = vrot.slane %v2846_v37, 1  ;;  %v2957_v48 = vrot.slane %v2921_v49, 2  ;;  %v2958_v4 = vrot.slane %v2922_v53, 2 }
 0x4cf   : > { %v2998_v58 = vmul.f32 %v6143_v24, %v2806_v43  ;;  %v2717_v59 = vadd.f32 %v2697_v25, %v2640_v50  ;;  %v3033_v30 = vrot.slane %v2997_v47, 3  ;;  %v3073_v1 = vmul.f32 %v6149_v15, %v6415_v6 }
 0x4d0   : > { %v3074_v22 = vmul.f32 %v6149_v15, %v2806_v43  ;;  %v6465_v40 = vsel %vm2525_vm7, %v2881_v19, %v2882_v55  ;;  %v6468_v35 = vsel %vm2602_vm8, %v2957_v48, %v2958_v4  ;;  %v6472_v54 = vmul.f32 %v6234_v18, %v6415_v6  ;;  %v3483_v4 = vld [vmem:[#allocation3 + $0x58] sm:$0xf] }
 0x4d1   : > { %v3034_v52 = vrot.slane %v2998_v58, 3  ;;  %v6474_v57 = vadd.f32 %v2773_v42, %v2717_v59  ;;  %v3109_v56 = vrot.slane %v3073_v1, 4  ;;  %v3183_v5 = vmul.f32 %v6183_v12, %v6415_v6 }
 0x4d2   : > { %v3110_v33 = vrot.slane %v3074_v22, 4  ;;  %v3184_v8 = vmul.f32 %v6183_v12, %v3144_v21  ;;  %v3259_v25 = vmul.f32 %v6187_v61, %v6415_v6  ;;  %v3260_v37 = vmul.f32 %v6187_v61, %v3144_v21 }
 0x4d3   : > { %7595 = vst [vmem:[#allocation31_spill] sm:$0xff] %v6474_v57  ;;  %v6479_v43 = vsel %vm2679_vm9, %v3033_v30, %v3034_v52  ;;  %v3218_v53 = vrot.slane %v3183_v5, 1  ;;  %v3335_v50 = vmul.f32 %v6191_v20, %v6415_v6  ;;  %v3336_v42 = vmul.f32 %v6191_v20, %v3144_v21 }
 0x4d4   : > { %v6486_v49 = vsel %vm850_vm0, %v3109_v56, %v3110_v33  ;;  %v3219_v19 = vrot.slane %v3184_v8, 1  ;;  %v3294_v47 = vrot.slane %v3259_v25, 2  ;;  %v3295_v55 = vrot.slane %v3260_v37, 2 }
 0x4d5   : > { %7596 = vst [vmem:[#allocation32_spill] sm:$0xff] %v6486_v49  ;;  %v3411_v48 = vmul.f32 %v6195_v51, %v6415_v6  ;;  %v3370_v58 = vrot.slane %v3335_v50, 3  ;;  %v3371_v59 = vrot.slane %v3336_v42, 3  ;;  %v3412_v30 = vmul.f32 %v6195_v51, %v3144_v21 }
 0x4d6   : > { %v6496_v1 = vmul.f32 %v6199_v36, %v6415_v6  ;;  %v6499_v22 = vsel %vm2525_vm7, %v3218_v53, %v3219_v19  ;;  %v6502_v52 = vsel %vm2602_vm8, %v3294_v47, %v3295_v55  ;;  %v6506_v33 = vmul.f32 %v6204_v23, %v6415_v6  ;;  %v3822_v19 = vld [vmem:[#allocation3 + $0x58] sm:$0xf]  ;;  %v6529_v47 = vld [vmem:[#allocation3 + $0x40] sm:$0xff]  ;;  %v2462_v55 = vld [vmem:[#allocation3 + $0x48] sm:$0xf] }
 0x4d7   : > { %v3446_v56 = vrot.slane %v3411_v48, 4  ;;  %v6509_v5 = vsel %vm2679_vm9, %v3370_v58, %v3371_v59  ;;  %v3447_v8 = vrot.slane %v3412_v30, 4  ;;  %v6512_v21 = vmul.f32 %v6204_v23, %v3483_v4 }
 0x4d8   : > { %7597 = vst [vmem:[#allocation33_spill] sm:$0xff] %v6496_v1  ;;  %7598 = vst [vmem:[#allocation34_spill] sm:$0xff] %v6506_v33  ;;  %v6516_v25 = vmul.f32 %v6207_v13, %v6415_v6  ;;  %v6520_v53 = vmul.f32 %v6207_v13, %v3483_v4  ;;  %v6524_v50 = vmul.f32 %v6214_v38, %v6415_v6 }
 0x4d9   : > { %7599 = vst [vmem:[#allocation35_spill] sm:$0xff] %v6509_v5  ;;  %7600 = vst [vmem:[#allocation36_spill] sm:$0xff] %v6512_v21  ;;  %v6527_v42 = vmul.f32 %v6214_v38, %v3483_v4  ;;  %v6532_v48 = vsel %vm850_vm0, %v3446_v56, %v3447_v8  ;;  %v6538_v30 = vmul.f32 %v6217_v29, %v6415_v6 }
 0x4da   : > { %7601 = vst [vmem:[#allocation37_spill] sm:$0xff] %v6516_v25  ;;  %7602 = vst [vmem:[#allocation38_spill] sm:$0xff] %v6520_v53  ;;  %v6544_v49 = vmul.f32 %v6217_v29, %v3483_v4  ;;  %v6547_v56 = vmul.f32 %v6220_v41, %v3822_v19  ;;  %v2477_v8 = vmul.f32 %v6052_v32, %v6529_v47 }
 0x4db   : > { %7603 = vst [vmem:[#allocation39_spill] sm:$0xff] %v6524_v50  ;;  %7604 = vst [vmem:[#allocation40_spill] sm:$0xff] %v6527_v42  ;;  %v2501_v59 = vmul.f32 %v6034_v9, %v6529_v47  ;;  %v2502_v6 = vmul.f32 %v6034_v9, %v2462_v55  ;;  %v2578_v57 = vmul.f32 %v6045_v17, %v6529_v47 }
 0x4dc   : > { %7605 = vst [vmem:[#allocation41_spill] sm:$0xff] %v6532_v48  ;;  %7606 = vst [vmem:[#allocation42_spill] sm:$0xff] %v6538_v30  ;;  %v2579_v33 = vmul.f32 %v6045_v17, %v2462_v55  ;;  %v2655_v4 = vmul.f32 %v6060_v14, %v6529_v47  ;;  %v2732_v30 = vmul.f32 %v6070_v27, %v6529_v47 }
 0x4dd   : > { %7607 = vst [vmem:[#allocation43_spill] sm:$0xff] %v6544_v49  ;;  %7608 = vst [vmem:[#allocation44_spill] sm:$0xff] %v6547_v56  ;;  %v2538_v19 = vrot.slane %v2501_v59, 1  ;;  %v2539_v58 = vrot.slane %v2502_v6, 1  ;;  %v2656_v56 = vmul.f32 %v6060_v14, %v2462_v55  ;;  %v2615_v50 = vrot.slane %v2578_v57, 2 }
 0x4de   : > { %v2616_v42 = vrot.slane %v2579_v33, 2  ;;  %v2692_v25 = vrot.slane %v2655_v4, 3  ;;  %v2733_v37 = vmul.f32 %v6070_v27, %v2462_v55  ;;  %v2804_v49 = vld [vmem:[#allocation3 + $0x48] sm:$0xf]  ;;  %v2768_v21 = vrot.slane %v2732_v30, 4 }
 0x4df   : > { %v2540_v53 = vsel %vm2525_vm7, %v2538_v19, %v2539_v58  ;;  %v2693_v48 = vrot.slane %v2656_v56, 3  ;;  %v2820_v1 = vmul.f32 %v6106_v46, %v6529_v47  ;;  %v2843_v5 = vmul.f32 %v6100_v34, %v6529_v47 }
 0x4e0   : > { %v2562_v59 = vadd.f32 %v2540_v53, %v2477_v8  ;;  %v2617_v6 = vsel %vm2602_vm8, %v2615_v50, %v2616_v42  ;;  %v2769_v16 = vrot.slane %v2733_v37, 4  ;;  %v2844_v55 = vmul.f32 %v6100_v34, %v2804_v49 }
 0x4e1   : > { %v2694_v57 = vsel %vm2679_vm9, %v2692_v25, %v2693_v48  ;;  %v2828_v33 = vadd.f32 %v2820_v1, %v6289_v7  ;;  %v2919_v58 = vmul.f32 %v6120_v3, %v6529_v47  ;;  %v2878_v4 = vrot.slane %v2843_v5, 1 }
 0x4e2   : > { %v2639_v30 = vadd.f32 %v2617_v6, %v2562_v59  ;;  %v2770_v56 = vsel %vm850_vm0, %v2768_v21, %v2769_v16  ;;  %v2920_v53 = vmul.f32 %v6120_v3, %v2804_v49  ;;  %v2879_v50 = vrot.slane %v2844_v55, 1  ;;  %v3142_v55 = vld [vmem:[#allocation3 + $0x48] sm:$0xf] }
 0x4e3   : > { %v2954_v37 = vrot.slane %v2919_v58, 2  ;;  %v2979_v42 = vadd.f32 %v6281_v2, %v6412_v45  ;;  %v2995_v25 = vmul.f32 %v6143_v24, %v6529_v47  ;;  %v2996_v48 = vmul.f32 %v6143_v24, %v2804_v49 }
 0x4e4   : > { %v2716_v7 = vadd.f32 %v2694_v57, %v2639_v30  ;;  %v2955_v1 = vrot.slane %v2920_v53, 2  ;;  %v3071_v8 = vmul.f32 %v6149_v15, %v6529_v47  ;;  %v2880_v16 = vsel %vm2525_vm7, %v2878_v4, %v2879_v50 }
 0x4e5   : > { %v3030_v5 = vrot.slane %v2995_v25, 3  ;;  %v3055_v21 = vadd.f32 %v6292_v31, %v2979_v42  ;;  %v3072_v19 = vmul.f32 %v6149_v15, %v2804_v49  ;;  %v2904_v6 = vadd.f32 %v2880_v16, %v2828_v33 }
 0x4e6   : > { %v2792_v59 = vadd.f32 %v2770_v56, %v2716_v7  ;;  %v2956_v2 = vsel %vm2602_vm8, %v2954_v37, %v2955_v1  ;;  %v3031_v45 = vrot.slane %v2996_v48, 3  ;;  %v3106_v57 = vrot.slane %v3071_v8, 4 }
 0x4e7   : > { %v3107_v58 = vrot.slane %v3072_v19, 4  ;;  %v3131_v30 = vadd.f32 %v6300_v11, %v3055_v21  ;;  %v3159_v53 = vmul.f32 %v6234_v18, %v6529_v47  ;;  %v2980_v50 = vadd.f32 %v2956_v2, %v2904_v6 }
 0x4e8   : > { %v2829_v4 = vadd.f32 %v6448_v39, %v2792_v59  ;;  %v3032_v31 = vsel %vm2679_vm9, %v3030_v5, %v3031_v45  ;;  %v3181_v49 = vmul.f32 %v6183_v12, %v6529_v47  ;;  %v3182_v37 = vmul.f32 %v6183_v12, %v3142_v55 }
 0x4e9   : > { %v3108_v33 = vsel %vm850_vm0, %v3106_v57, %v3107_v58  ;;  %v3167_v56 = vadd.f32 %v3159_v53, %v3131_v30  ;;  %v3257_v42 = vmul.f32 %v6187_v61, %v6529_v47  ;;  %v3056_v25 = vadd.f32 %v3032_v31, %v2980_v50  ;;  %v3481_v30 = vld [vmem:[#allocation3 + $0x48] sm:$0xf] }
 0x4ea   : > { %v6600_v11 = vadd.f32 %v6465_v40, %v2829_v4  ;;  %v3215_v7 = vrot.slane %v3181_v49, 1  ;;  %v3258_v39 = vmul.f32 %v6187_v61, %v3142_v55  ;;  %v3216_v1 = vrot.slane %v3182_v37, 1 }
 0x4eb   : > { %v3291_v48 = vrot.slane %v3257_v42, 2  ;;  %v3318_v8 = vadd.f32 %v6319_v60, %v6433_v28  ;;  %v3333_v16 = vmul.f32 %v6191_v20, %v6529_v47  ;;  %v3132_v5 = vadd.f32 %v3108_v33, %v3056_v25 }
 0x4ec   : > { %v3292_v21 = vrot.slane %v3258_v39, 2  ;;  %v3334_v19 = vmul.f32 %v6191_v20, %v3142_v55  ;;  %v3409_v40 = vmul.f32 %v6195_v51, %v6529_v47  ;;  %v3217_v59 = vsel %vm2525_vm7, %v3215_v7, %v3216_v1  ;;  %v6639_v39 = vld [vmem:[#allocation3 + $0x48] sm:$0xf] }
 0x4ed   : > { %v3367_v6 = vrot.slane %v3333_v16, 3  ;;  %v3394_v2 = vadd.f32 %v6325_v10, %v3318_v8  ;;  %v3410_v45 = vmul.f32 %v6195_v51, %v3142_v55  ;;  %v3168_v57 = vadd.f32 %v6472_v54, %v3132_v5  ;;  %7610 = vst [vmem:[#allocation46_spill] sm:$0xff] %v6639_v39  ;;  %v6649_v5 = vld [vmem:[#allocation3 + $0x70] sm:$0xff] }
 0x4ee   : > { %v3243_v60 = vadd.f32 %v3217_v59, %v3167_v56  ;;  %v3293_v28 = vsel %vm2602_vm8, %v3291_v48, %v3292_v21  ;;  %v3368_v58 = vrot.slane %v3334_v19, 3  ;;  %v3443_v53 = vrot.slane %v3409_v40, 4  ;;  %7613 = vst [vmem:[#allocation49_spill] sm:$0xff] %v6649_v5  ;;  %v2468_v21 = vld [vmem:[#allocation3 + $0x78] sm:$0xf] }
 0x4ef   : > { %v3444_v4 = vrot.slane %v3410_v45, 4  ;;  %v3470_v50 = vadd.f32 %v6341_v44, %v3394_v2  ;;  %v3499_v31 = vmul.f32 %v6199_v36, %v6529_v47  ;;  %v6619_v49 = vadd.f32 %v6499_v22, %v3168_v57 }
 0x4f0   : > { %v3319_v10 = vadd.f32 %v3293_v28, %v3243_v60  ;;  %v3369_v55 = vsel %vm2679_vm9, %v3367_v6, %v3368_v58  ;;  %v3520_v54 = vmul.f32 %v6204_v23, %v6529_v47  ;;  %v3521_v37 = vmul.f32 %v6204_v23, %v3481_v30 }
 0x4f1   : > { %v3445_v33 = vsel %vm850_vm0, %v3443_v53, %v3444_v4  ;;  %v6625_v56 = vadd.f32 %v3499_v31, %v3470_v50  ;;  %v6630_v44 = vmul.f32 %v6207_v13, %v6529_v47  ;;  %v6633_v22 = vmul.f32 %v6207_v13, %v3481_v30 }
 0x4f2   : > { %v3395_v42 = vadd.f32 %v3369_v55, %v3319_v10  ;;  %v3553_v25 = vrot.slane %v3520_v54, 1  ;;  %v6637_v7 = vmul.f32 %v6214_v38, %v6529_v47  ;;  %v3554_v1 = vrot.slane %v3521_v37, 1 }
 0x4f3   : > { %v6643_v8 = vmul.f32 %v6214_v38, %v3481_v30  ;;  %v6647_v16 = vmul.f32 %v6217_v29, %v6529_v47  ;;  %v6656_v6 = vmul.f32 %v6217_v29, %v3481_v30  ;;  %v6665_v57 = vmul.f32 %v6220_v41, %v6639_v39  ;;  %v2810_v47 = vld [vmem:[#allocation3 + $0x78] sm:$0xf] }
 0x4f4   : > { %7609 = vst [vmem:[#allocation45_spill] sm:$0xff] %v6637_v7  ;;  %v6651_v19 = vadd.f32 %v3445_v33, %v3395_v42  ;;  %v6659_v2 = vsel %vm2525_vm7, %v3553_v25, %v3554_v1  ;;  %v2480_v28 = vmul.f32 %v6052_v32, %v6649_v5  ;;  %v2507_v58 = vmul.f32 %v6034_v9, %v6649_v5  ;;  %v3148_v39 = vld [vmem:[#allocation3 + $0x78] sm:$0xf] }
 0x4f5   : > { %7611 = vst [vmem:[#allocation47_spill] sm:$0xff] %v6643_v8  ;;  %7612 = vst [vmem:[#allocation48_spill] sm:$0xff] %v6647_v16  ;;  %v2508_v30 = vmul.f32 %v6034_v9, %v2468_v21  ;;  %v2584_v53 = vmul.f32 %v6045_v17, %v6649_v5  ;;  %v2585_v4 = vmul.f32 %v6045_v17, %v2468_v21  ;;  %v7620_v7 = vld [vmem:[#allocation15_spill] sm:$0xff]  ;;  %v7621_v8 = vld [vmem:[#allocation21_spill] sm:$0xff] }
 0x4f6   : > { %7614 = vst [vmem:[#allocation50_spill] sm:$0xff] %v6656_v6  ;;  %7615 = vst [vmem:[#allocation51_spill] sm:$0xff] %v6665_v57  ;;  %v2661_v50 = vmul.f32 %v6060_v14, %v6649_v5  ;;  %v2662_v31 = vmul.f32 %v6060_v14, %v2468_v21  ;;  %v2547_v10 = vrot.slane %v2507_v58, 1  ;;  %v2738_v54 = vmul.f32 %v6070_v27, %v6649_v5 }
 0x4f7   : > { %v2548_v55 = vrot.slane %v2508_v30, 1  ;;  %v2739_v33 = vmul.f32 %v6070_v27, %v2468_v21  ;;  %v2624_v37 = vrot.slane %v2584_v53, 2  ;;  %v2625_v42 = vrot.slane %v2585_v4, 2 }
 0x4f8   : > { %v2701_v25 = vrot.slane %v2661_v50, 3  ;;  %v2702_v1 = vrot.slane %v2662_v31, 3  ;;  %v2777_v59 = vrot.slane %v2738_v54, 4  ;;  %v6685_v48 = vmul.f32 %v6106_v46, %v6649_v5 }
 0x4f9   : > { %v2549_v60 = vsel %vm2525_vm7, %v2547_v10, %v2548_v55  ;;  %v2778_v45 = vrot.slane %v2739_v33, 4  ;;  %v2626_v30 = vsel %vm2602_vm8, %v2624_v37, %v2625_v42  ;;  %v2849_v21 = vmul.f32 %v6100_v34, %v6649_v5 }
 0x4fa   : > { %v2565_v58 = vadd.f32 %v2549_v60, %v2480_v28  ;;  %v2703_v40 = vsel %vm2679_vm9, %v2701_v25, %v2702_v1  ;;  %v2850_v4 = vmul.f32 %v6100_v34, %v2810_v47  ;;  %v2925_v50 = vmul.f32 %v6120_v3, %v6649_v5 }
 0x4fb   : > { %v2779_v53 = vsel %vm850_vm0, %v2777_v59, %v2778_v45  ;;  %v2926_v31 = vmul.f32 %v6120_v3, %v2810_v47  ;;  %v2887_v55 = vrot.slane %v2849_v21, 1  ;;  %v3001_v60 = vmul.f32 %v6143_v24, %v6649_v5 }
 0x4fc   : > { %v2642_v10 = vadd.f32 %v2626_v30, %v2565_v58  ;;  %v3002_v28 = vmul.f32 %v6143_v24, %v2810_v47  ;;  %v2888_v54 = vrot.slane %v2850_v4, 1  ;;  %v2963_v33 = vrot.slane %v2925_v50, 2 }
 0x4fd   : > { %v2964_v37 = vrot.slane %v2926_v31, 2  ;;  %v3077_v59 = vmul.f32 %v6149_v15, %v6649_v5  ;;  %v3039_v42 = vrot.slane %v3001_v60, 3  ;;  %v3078_v1 = vmul.f32 %v6149_v15, %v2810_v47 }
 0x4fe   : > { %v2719_v45 = vadd.f32 %v2703_v40, %v2642_v10  ;;  %v3040_v25 = vrot.slane %v3002_v28, 3  ;;  %v6703_v58 = vsel %vm2525_vm7, %v2887_v55, %v2888_v54  ;;  %v6710_v4 = vmul.f32 %v6234_v18, %v6649_v5 }
 0x4ff   : > { %v6706_v30 = vsel %vm2602_vm8, %v2963_v33, %v2964_v37  ;;  %v3115_v21 = vrot.slane %v3077_v59, 4  ;;  %v3116_v31 = vrot.slane %v3078_v1, 4  ;;  %v3187_v47 = vmul.f32 %v6183_v12, %v6649_v5  ;;  %v6731_v59 = vld [vmem:[#allocation3 + $0x78] sm:$0xf] }
 0x500   : > { %v6712_v50 = vadd.f32 %v2779_v53, %v2719_v45  ;;  %v6715_v40 = vsel %vm2679_vm9, %v3039_v42, %v3040_v25  ;;  %v3188_v10 = vmul.f32 %v6183_v12, %v3148_v39  ;;  %v3263_v55 = vmul.f32 %v6187_v61, %v6649_v5  ;;  %7616 = vst [vmem:[#allocation52_spill] sm:$0xff] %v6731_v59 }
 0x501   : > { %v3264_v60 = vmul.f32 %v6187_v61, %v3148_v39  ;;  %v3339_v28 = vmul.f32 %v6191_v20, %v6649_v5  ;;  %v6726_v53 = vsel %vm850_vm0, %v3115_v21, %v3116_v31  ;;  %v3224_v54 = vrot.slane %v3187_v47, 1 }
 0x502   : > { %v3340_v33 = vmul.f32 %v6191_v20, %v3148_v39  ;;  %v3415_v37 = vmul.f32 %v6195_v51, %v6649_v5  ;;  %v3225_v45 = vrot.slane %v3188_v10, 1  ;;  %v3300_v42 = vrot.slane %v3263_v55, 2 }
 0x503   : > { %v3301_v25 = vrot.slane %v3264_v60, 2  ;;  %v3376_v1 = vrot.slane %v3339_v28, 3  ;;  %v3416_v41 = vmul.f32 %v6195_v51, %v3148_v39  ;;  %v6736_v21 = vmul.f32 %v6199_v36, %v6649_v5 }
 0x504   : > { %v3377_v57 = vrot.slane %v3340_v33, 3  ;;  %v3452_v16 = vrot.slane %v3415_v37, 4  ;;  %v6739_v31 = vsel %vm2525_vm7, %v3224_v54, %v3225_v45  ;;  %v3526_v10 = vmul.f32 %v6204_v23, %v6649_v5  ;;  %v6756_v33 = vld [vmem:[#allocation3 + $0xa0] sm:$0xff] }
 0x505   : > { %7617 = vst [vmem:[#allocation53_spill] sm:$0xff] %v6736_v21  ;;  %v6742_v47 = vsel %vm2602_vm8, %v3300_v42, %v3301_v25  ;;  %v3527_v55 = vmul.f32 %v6204_v23, %v6731_v59  ;;  %v3453_v60 = vrot.slane %v3416_v41, 4  ;;  %v3602_v39 = vmul.f32 %v6207_v13, %v6649_v5  ;;  %7619 = vst [vmem:[#allocation55_spill] sm:$0xff] %v6756_v33 }
 0x506   : > { %v3603_v28 = vmul.f32 %v6207_v13, %v6731_v59  ;;  %v6754_v54 = vmul.f32 %v6214_v38, %v6731_v59  ;;  %v3562_v37 = vrot.slane %v3526_v10, 1  ;;  %v2410_v42 = vmul.f32 %v6278_v62, %v6089_v63 }
 0x507   : > { %v3563_v45 = vrot.slane %v3527_v55, 1  ;;  %v2981_v41 = vadd.f32 %v6468_v35, %v6600_v11  ;;  %v2413_v6 = vmul.f32 %v6287_v26, %v6092_v0  ;;  %v2412_v21 = vmul.f32 %v7621_v8, %v7620_v7  ;;  %v7623_v26 = vld [vmem:[#allocation35_spill] sm:$0xff]  ;;  %v7625_v11 = vld [vmem:[#allocation22_spill] sm:$0xff] }
 0x508   : > { %7618 = vst [vmem:[#allocation54_spill] sm:$0xff] %v6754_v54  ;;  %v3639_v25 = vrot.slane %v3603_v28, 2  ;;  %v3320_v59 = vadd.f32 %v6502_v52, %v6619_v49  ;;  %v6768_v54 = vld [vmem:[#allocation3 + $0xa8] sm:$0xf]  ;;  %2419 = vst.msk [vmem:[#allocation3 + $0x62] sm:$0xff] %vm1304_vm2, %v2410_v42  ;;  %v6773_v63 = vsel %vm2679_vm9, %v3376_v1, %v3377_v57  ;;  %v6776_v62 = vsel %vm850_vm0, %v3452_v16, %v3453_v60  ;;  %v7627_v16 = vld [vmem:[#allocation32_spill] sm:$0xff] }
 0x509   : > { %7622 = vst [vmem:[#allocation15_spill] sm:$0xff] %v6768_v54  ;;  %v3057_v10 = vadd.f32 %v6479_v43, %v2981_v41  ;;  %v6780_v0 = vmul.f32 %v6199_v36, %v6756_v33  ;;  %2422 = vst.msk [vmem:[#allocation3 + $0x92] sm:$0xff] %vm1304_vm2, %v2413_v6  ;;  %v7624_v52 = vld [vmem:[#allocation30_spill] sm:$0xff]  ;;  %v7626_v43 = vld [vmem:[#allocation33_spill] sm:$0xff]  ;;  %v3532_v8 = vmul.f32 %v6204_v23, %v6756_v33 }
 0x50a   : > { %2421 = vst.msk [vmem:[#allocation3 + $0x82] sm:$0xff] %vm1304_vm2, %v2412_v21  ;;  %v3396_v35 = vadd.f32 %v7623_v26, %v3320_v59  ;;  %v3506_v49 = vadd.f32 %v7625_v11, %v7624_v52  ;;  %v3508_v7 = vadd.f32 %v7626_v43, %v6651_v19  ;;  %v3533_v1 = vmul.f32 %v6204_v23, %v6768_v54  ;;  %v7628_v6 = vld [vmem:[#allocation36_spill] sm:$0xff]  ;;  %v7630_v21 = vld [vmem:[#allocation34_spill] sm:$0xff]  ;;  %v7632_v42 = vld [vmem:[#allocation41_spill] sm:$0xff] }
 0x50b   : > { %v6792_v57 = vadd.f32 %v7627_v16, %v3057_v10  ;;  %v7629_v55 = vrot.slane %v7628_v6, 1  ;;  %v7631_v60 = vrot.slane %v7630_v21, 1  ;;  %v6802_v28 = vsel %vm2525_vm7, %v3562_v37, %v3563_v45  ;;  %v7633_v26 = vld [vmem:[#allocation28_spill] sm:$0xff]  ;;  %v7644_v21 = vld [vmem:[#allocation37_spill] sm:$0xff] }
 0x50c   : > { %v6805_v19 = vadd.f32 %v7632_v42, %v3396_v35  ;;  %v3571_v41 = vrot.slane %v3532_v8, 1  ;;  %v3582_v52 = vadd.f32 %v7633_v26, %v3506_v49  ;;  %v3583_v10 = vadd.f32 %v6659_v2, %v6625_v56  ;;  %v7636_v37 = vld [vmem:[#allocation24_spill] sm:$0xff]  ;;  %v7638_v35 = vld [vmem:[#allocation23_spill] sm:$0xff] }
 0x50d   : > { %v3558_v59 = vsel %vm2525_vm7, %v7631_v60, %v7629_v55  ;;  %v3572_v11 = vrot.slane %v3533_v1, 1  ;;  %v6812_v16 = vmul.f32 %v6207_v13, %v6756_v33  ;;  %v6816_v6 = vmul.f32 %v6207_v13, %v6768_v54 }
 0x50e   : > { %v3584_v43 = vadd.f32 %v3558_v59, %v3508_v7  ;;  %v7637_v45 = vrot.slane %v7636_v37, 2  ;;  %v7639_v55 = vrot.slane %v7638_v35, 2  ;;  %v7640_v49 = vrot.slane %v6633_v22, 2  ;;  %v7642_v7 = vld [vmem:[#allocation38_spill] sm:$0xff] }
 0x50f   : > { %7634 = vst [vmem:[#allocation21_spill] sm:$0xff] %v6812_v16  ;;  %7635 = vst [vmem:[#allocation35_spill] sm:$0xff] %v6816_v6  ;;  %v7641_v56 = vrot.slane %v6630_v44, 2  ;;  %v7643_v1 = vrot.slane %v7642_v7, 2  ;;  %v7645_v60 = vrot.slane %v7644_v21, 2  ;;  %v3638_v42 = vrot.slane %v3602_v39, 2 }
 0x510   : > { %v3628_v8 = vsel %vm2602_vm8, %v7639_v55, %v7637_v45  ;;  %v6834_v26 = vsel %vm2525_vm7, %v3571_v41, %v3572_v11  ;;  %v6840_v22 = vld [vmem:[#allocation3 + $0x60] sm:$0xff]  ;;  %v2466_v44 = vld [vmem:[#allocation3 + $0x68] sm:$0xf]  ;;  %v6851_v39 = vmul.f32 %v6214_v38, %v6649_v5 }
 0x511   : > { %v3631_v2 = vsel %vm2602_vm8, %v7641_v56, %v7640_v49  ;;  %v3634_v59 = vsel %vm2602_vm8, %v7645_v60, %v7643_v1  ;;  %v6838_v35 = vadd.f32 %v3628_v8, %v3582_v52  ;;  %7647 = vst [vmem:[#allocation22_spill] sm:$0xff] %v6840_v22  ;;  %v6843_v55 = vsel %vm2602_vm8, %v3638_v42, %v3639_v25  ;;  %v2808_v60 = vld [vmem:[#allocation3 + $0x68] sm:$0xf] }
 0x512   : > { %7648 = vst [vmem:[#allocation33_spill] sm:$0xff] %v6843_v55  ;;  %v6845_v49 = vadd.f32 %v3631_v2, %v3583_v10  ;;  %v6847_v56 = vadd.f32 %v3634_v59, %v3584_v43  ;;  %7651 = vst [vmem:[#allocation34_spill] sm:$0xff] %v6851_v39  ;;  %v2479_v41 = vmul.f32 %v6052_v32, %v6840_v22 }
 0x513   : > { %7646 = vst [vmem:[#allocation30_spill] sm:$0xff] %v6838_v35  ;;  %v2505_v52 = vmul.f32 %v6034_v9, %v6840_v22  ;;  %v2506_v11 = vmul.f32 %v6034_v9, %v2466_v44  ;;  %v2582_v25 = vmul.f32 %v6045_v17, %v6840_v22  ;;  %v2583_v10 = vmul.f32 %v6045_v17, %v2466_v44 }
 0x514   : > { %7649 = vst [vmem:[#allocation32_spill] sm:$0xff] %v6845_v49  ;;  %7650 = vst [vmem:[#allocation36_spill] sm:$0xff] %v6847_v56  ;;  %v2659_v43 = vmul.f32 %v6060_v14, %v6840_v22  ;;  %v2660_v8 = vmul.f32 %v6060_v14, %v2466_v44  ;;  %v2736_v2 = vmul.f32 %v6070_v27, %v6840_v22 }
 0x515   : > { %v2544_v7 = vrot.slane %v2505_v52, 1  ;;  %v2545_v32 = vrot.slane %v2506_v11, 1  ;;  %v2621_v1 = vrot.slane %v2582_v25, 2  ;;  %v2737_v21 = vmul.f32 %v6070_v27, %v2466_v44  ;;  %v7652_v25 = vld [vmem:[#allocation31_spill] sm:$0xff] }
 0x516   : > { %v2622_v9 = vrot.slane %v2583_v10, 2  ;;  %v2698_v59 = vrot.slane %v2659_v43, 3  ;;  %v2699_v42 = vrot.slane %v2660_v8, 3  ;;  %v2774_v37 = vrot.slane %v2736_v2, 4 }
 0x517   : > { %v2546_v17 = vsel %vm2525_vm7, %v2544_v7, %v2545_v32  ;;  %v2775_v45 = vrot.slane %v2737_v21, 4  ;;  %v2822_v5 = vmul.f32 %v6106_v46, %v6840_v22  ;;  %v2847_v14 = vmul.f32 %v6100_v34, %v6840_v22 }
 0x518   : > { %v2564_v56 = vadd.f32 %v2546_v17, %v2479_v41  ;;  %v2623_v52 = vsel %vm2602_vm8, %v2621_v1, %v2622_v9  ;;  %v2700_v11 = vsel %vm2679_vm9, %v2698_v59, %v2699_v42  ;;  %v2848_v27 = vmul.f32 %v6100_v34, %v2808_v60 }
 0x519   : > { %v2776_v44 = vsel %vm850_vm0, %v2774_v37, %v2775_v45  ;;  %v2830_v10 = vadd.f32 %v2822_v5, %v7652_v25  ;;  %v2884_v43 = vrot.slane %v2847_v14, 1  ;;  %v2923_v8 = vmul.f32 %v6120_v3, %v6840_v22 }
 0x51a   : > { %v2641_v2 = vadd.f32 %v2623_v52, %v2564_v56  ;;  %v2885_v7 = vrot.slane %v2848_v27, 1  ;;  %v2924_v32 = vmul.f32 %v6120_v3, %v2808_v60  ;;  %v2999_v41 = vmul.f32 %v6143_v24, %v6840_v22  ;;  %v3146_v56 = vld [vmem:[#allocation3 + $0x68] sm:$0xf] }
 0x51b   : > { %v2960_v1 = vrot.slane %v2923_v8, 2  ;;  %v3000_v21 = vmul.f32 %v6143_v24, %v2808_v60  ;;  %v3075_v9 = vmul.f32 %v6149_v15, %v6840_v22  ;;  %v3076_v37 = vmul.f32 %v6149_v15, %v2808_v60 }
 0x51c   : > { %v2718_v5 = vadd.f32 %v2700_v11, %v2641_v2  ;;  %v2886_v45 = vsel %vm2525_vm7, %v2884_v43, %v2885_v7  ;;  %v2961_v59 = vrot.slane %v2924_v32, 2  ;;  %v3036_v42 = vrot.slane %v2999_v41, 3 }
 0x51d   : > { %v2906_v17 = vadd.f32 %v2886_v45, %v2830_v10  ;;  %v3037_v14 = vrot.slane %v3000_v21, 3  ;;  %v3112_v52 = vrot.slane %v3075_v9, 4  ;;  %v3113_v27 = vrot.slane %v3076_v37, 4 }
 0x51e   : > { %v2794_v25 = vadd.f32 %v2776_v44, %v2718_v5  ;;  %v2962_v8 = vsel %vm2602_vm8, %v2960_v1, %v2961_v59  ;;  %v3161_v49 = vmul.f32 %v6234_v18, %v6840_v22  ;;  %v3185_v35 = vmul.f32 %v6183_v12, %v6840_v22 }
 0x51f   : > { %v2982_v60 = vadd.f32 %v2962_v8, %v2906_v17  ;;  %v3038_v11 = vsel %vm2679_vm9, %v3036_v42, %v3037_v14  ;;  %v3114_v43 = vsel %vm850_vm0, %v3112_v52, %v3113_v27  ;;  %v3186_v2 = vmul.f32 %v6183_v12, %v3146_v56  ;;  %v3485_v42 = vld [vmem:[#allocation3 + $0x68] sm:$0xf] }
 0x520   : > { %v2831_v10 = vadd.f32 %v6685_v48, %v2794_v25  ;;  %v3169_v7 = vadd.f32 %v3161_v49, %v6792_v57  ;;  %v3221_v44 = vrot.slane %v3185_v35, 1  ;;  %v3261_v32 = vmul.f32 %v6187_v61, %v6840_v22 }
 0x521   : > { %v3058_v41 = vadd.f32 %v3038_v11, %v2982_v60  ;;  %v3222_v1 = vrot.slane %v3186_v2, 1  ;;  %v3262_v21 = vmul.f32 %v6187_v61, %v3146_v56  ;;  %v3337_v9 = vmul.f32 %v6191_v20, %v6840_v22  ;;  %v6925_v11 = vld [vmem:[#allocation3 + $0x90] sm:$0xff] }
 0x522   : > { %v2907_v37 = vadd.f32 %v6703_v58, %v2831_v10  ;;  %v3297_v5 = vrot.slane %v3261_v32, 2  ;;  %v3338_v45 = vmul.f32 %v6191_v20, %v3146_v56  ;;  %v6906_v48 = vmul.f32 %v6195_v51, %v6840_v22  ;;  %v3152_v10 = vld [vmem:[#allocation3 + $0x98] sm:$0xf]  ;;  %v2812_v58 = vld [vmem:[#allocation3 + $0x88] sm:$0xf] }
 0x523   : > { %v3134_v57 = vadd.f32 %v3114_v43, %v3058_v41  ;;  %v3223_v35 = vsel %vm2525_vm7, %v3221_v44, %v3222_v1  ;;  %v3298_v49 = vrot.slane %v3262_v21, 2  ;;  %v3373_v59 = vrot.slane %v3337_v9, 3 }
 0x524   : > { %v3245_v17 = vadd.f32 %v3223_v35, %v3169_v7  ;;  %v3374_v14 = vrot.slane %v3338_v45, 3  ;;  %v6910_v52 = vmul.f32 %v6195_v51, %v3146_v56  ;;  %v6919_v8 = vmul.f32 %v6199_v36, %v6840_v22  ;;  %v6982_v45 = vld [vmem:[#allocation3 + $0x80] sm:$0xff] }
 0x525   : > { %v6914_v27 = vadd.f32 %v6710_v4, %v3134_v57  ;;  %v3299_v25 = vsel %vm2602_vm8, %v3297_v5, %v3298_v49  ;;  %v6923_v60 = vmul.f32 %v6204_v23, %v6840_v22  ;;  %v6934_v2 = vmul.f32 %v6204_v23, %v3485_v42 }
 0x526   : > { %v6927_v43 = vadd.f32 %v3299_v25, %v3245_v17  ;;  %v6930_v56 = vsel %vm2679_vm9, %v3373_v59, %v3374_v14  ;;  %v6939_v44 = vmul.f32 %v6207_v13, %v6840_v22  ;;  %v6942_v32 = vmul.f32 %v6207_v13, %v3485_v42  ;;  %v6980_v25 = vld [vmem:[#allocation3 + $0x98] sm:$0xf] }
 0x527   : > { %v6946_v41 = vmul.f32 %v6214_v38, %v6840_v22  ;;  %v6950_v21 = vmul.f32 %v6214_v38, %v3485_v42  ;;  %v6953_v9 = vmul.f32 %v6217_v29, %v3485_v42  ;;  %v6957_v5 = vmul.f32 %v6234_v18, %v6925_v11 }
 0x528   : > { %v6963_v35 = vmul.f32 %v6183_v12, %v6925_v11  ;;  %v6966_v49 = vmul.f32 %v6183_v12, %v3152_v10  ;;  %v6971_v42 = vmul.f32 %v6187_v61, %v6925_v11  ;;  %v6974_v17 = vmul.f32 %v6187_v61, %v3152_v10 }
 0x529   : > { %7653 = vst [vmem:[#allocation41_spill] sm:$0xff] %v6946_v41  ;;  %7654 = vst [vmem:[#allocation28_spill] sm:$0xff] %v6950_v21  ;;  %v6978_v14 = vmul.f32 %v6191_v20, %v6925_v11  ;;  %v6987_v59 = vmul.f32 %v6191_v20, %v3152_v10  ;;  %v6991_v1 = vmul.f32 %v6195_v51, %v6925_v11 }
 0x52a   : > { %7655 = vst [vmem:[#allocation24_spill] sm:$0xff] %v6953_v9  ;;  %v6997_v22 = vmul.f32 %v6195_v51, %v3152_v10  ;;  %v7002_v7 = vmul.f32 %v6204_v23, %v6980_v25  ;;  %v2824_v21 = vmul.f32 %v6106_v46, %v6982_v45  ;;  %v2851_v39 = vmul.f32 %v6100_v34, %v6982_v45 }
 0x52b   : > { %v2852_v9 = vmul.f32 %v6100_v34, %v2812_v58  ;;  %v2927_v10 = vmul.f32 %v6120_v3, %v6982_v45  ;;  %v2928_v29 = vmul.f32 %v6120_v3, %v2812_v58  ;;  %v2983_v54 = vadd.f32 %v6706_v30, %v2907_v37 }
 0x52c   : > { %v2832_v57 = vadd.f32 %v2824_v21, %v6712_v50  ;;  %v2890_v41 = vrot.slane %v2851_v39, 1  ;;  %v3003_v46 = vmul.f32 %v6143_v24, %v6982_v45  ;;  %v3004_v4 = vmul.f32 %v6143_v24, %v2812_v58  ;;  %v3150_v50 = vld [vmem:[#allocation3 + $0x88] sm:$0xf] }
 0x52d   : > { %v2891_v33 = vrot.slane %v2852_v9, 1  ;;  %v2966_v38 = vrot.slane %v2927_v10, 2  ;;  %v2967_v55 = vrot.slane %v2928_v29, 2  ;;  %v3059_v34 = vadd.f32 %v6715_v40, %v2983_v54 }
 0x52e   : > { %v3042_v16 = vrot.slane %v3003_v46, 3  ;;  %v3079_v6 = vmul.f32 %v6149_v15, %v6982_v45  ;;  %v3080_v3 = vmul.f32 %v6149_v15, %v2812_v58  ;;  %v3043_v37 = vrot.slane %v3004_v4, 3 }
 0x52f   : > { %v2892_v39 = vsel %vm2525_vm7, %v2890_v41, %v2891_v33  ;;  %v2968_v30 = vsel %vm2602_vm8, %v2966_v38, %v2967_v55  ;;  %v3163_v21 = vmul.f32 %v6234_v18, %v6982_v45  ;;  %v3135_v10 = vadd.f32 %v6726_v53, %v3059_v34 }
 0x530   : > { %v2908_v29 = vadd.f32 %v2892_v39, %v2832_v57  ;;  %v3118_v9 = vrot.slane %v3079_v6, 4  ;;  %v3119_v24 = vrot.slane %v3080_v3, 4  ;;  %v3044_v40 = vsel %vm2679_vm9, %v3042_v16, %v3043_v37  ;;  %v7037_v16 = vld [vmem:[#allocation3 + $0x88] sm:$0xf] }
 0x531   : > { %v3189_v54 = vmul.f32 %v6183_v12, %v6982_v45  ;;  %v3190_v15 = vmul.f32 %v6183_v12, %v3150_v50  ;;  %v3265_v33 = vmul.f32 %v6187_v61, %v6982_v45  ;;  %v3171_v58 = vadd.f32 %v3163_v21, %v3135_v10 }
 0x532   : > { %v2984_v38 = vadd.f32 %v2968_v30, %v2908_v29  ;;  %v3120_v55 = vsel %vm850_vm0, %v3118_v9, %v3119_v24  ;;  %v3266_v18 = vmul.f32 %v6187_v61, %v3150_v50  ;;  %v3341_v53 = vmul.f32 %v6191_v20, %v6982_v45 }
 0x533   : > { %v3227_v6 = vrot.slane %v3189_v54, 1  ;;  %v3228_v4 = vrot.slane %v3190_v15, 1  ;;  %v3303_v41 = vrot.slane %v3265_v33, 2  ;;  %v3342_v12 = vmul.f32 %v6191_v20, %v3150_v50 }
 0x534   : > { %v3060_v57 = vadd.f32 %v3044_v40, %v2984_v38  ;;  %v3304_v46 = vrot.slane %v3266_v18, 2  ;;  %v3417_v34 = vmul.f32 %v6195_v51, %v6982_v45  ;;  %v3379_v39 = vrot.slane %v3341_v53, 3 }
 0x535   : > { %v3229_v3 = vsel %vm2525_vm7, %v3227_v6, %v3228_v4  ;;  %v3418_v61 = vmul.f32 %v6195_v51, %v3150_v50  ;;  %v3528_v30 = vmul.f32 %v6204_v23, %v6982_v45  ;;  %v3380_v21 = vrot.slane %v3342_v12, 3 }
 0x536   : > { %v3136_v37 = vadd.f32 %v3120_v55, %v3060_v57  ;;  %v3455_v29 = vrot.slane %v3417_v34, 4  ;;  %v3529_v9 = vmul.f32 %v6204_v23, %v7037_v16  ;;  %v3605_v20 = vmul.f32 %v6207_v13, %v7037_v16 }
 0x537   : > { %v3456_v24 = vrot.slane %v3418_v61, 4  ;;  %v7656_v10 = vrot.slane %v6966_v49, 1  ;;  %v7657_v40 = vrot.slane %v6963_v35, 1  ;;  %v3246_v51 = vadd.f32 %v6739_v31, %v6914_v27  ;;  %v7665_v61 = vld [vmem:[#allocation53_spill] sm:$0xff] }
 0x538   : > { %v3566_v50 = vrot.slane %v3529_v9, 1  ;;  %v3172_v15 = vadd.f32 %v6957_v5, %v3136_v37  ;;  %v3247_v33 = vadd.f32 %v3229_v3, %v3171_v58  ;;  %v3305_v38 = vsel %vm2602_vm8, %v3303_v41, %v3304_v46 }
 0x539   : > { %v3232_v54 = vsel %vm2525_vm7, %v7657_v40, %v7656_v10  ;;  %v7658_v55 = vrot.slane %v6974_v17, 2  ;;  %v7659_v18 = vrot.slane %v6971_v42, 2  ;;  %v3322_v49 = vadd.f32 %v6742_v47, %v3246_v51 }
 0x53a   : > { %v3381_v35 = vsel %vm2679_vm9, %v3379_v39, %v3380_v21  ;;  %v7660_v4 = vrot.slane %v6987_v59, 3  ;;  %v7661_v31 = vrot.slane %v6978_v14, 3  ;;  %v3248_v5 = vadd.f32 %v3232_v54, %v3172_v15 }
 0x53b   : > { %v3308_v6 = vsel %vm2602_vm8, %v7659_v18, %v7658_v55  ;;  %v3323_v58 = vadd.f32 %v3305_v38, %v3247_v33  ;;  %v3397_v41 = vadd.f32 %v6930_v56, %v6927_v43  ;;  %v7662_v17 = vrot.slane %v6910_v52, 4 }
 0x53c   : > { %v3384_v27 = vsel %vm2679_vm9, %v7661_v31, %v7660_v4  ;;  %v7663_v42 = vrot.slane %v6906_v48, 4  ;;  %v3398_v47 = vadd.f32 %v6773_v63, %v3322_v49  ;;  %v3457_v57 = vsel %vm850_vm0, %v3455_v29, %v3456_v24 }
 0x53d   : > { %v3458_v59 = vrot.slane %v6991_v1, 4  ;;  %v3503_v14 = vmul.f32 %v6199_v36, %v6982_v45  ;;  %v3324_v46 = vadd.f32 %v3308_v6, %v3248_v5  ;;  %v3399_v12 = vadd.f32 %v3381_v35, %v3323_v58  ;;  %v7670_v35 = vld [vmem:[#allocation35_spill] sm:$0xff] }
 0x53e   : > { %v3451_v53 = vsel %vm850_vm0, %v7663_v42, %v7662_v17  ;;  %v3504_v43 = vmul.f32 %v6199_v36, %v6925_v11  ;;  %v7664_v52 = vrot.slane %v6997_v22, 4  ;;  %v3474_v56 = vadd.f32 %v6776_v62, %v3398_v47 }
 0x53f   : > { %v3473_v34 = vadd.f32 %v3451_v53, %v3397_v41  ;;  %v3509_v63 = vadd.f32 %v6919_v8, %v6805_v19  ;;  %v3530_v1 = vmul.f32 %v6204_v23, %v6925_v11  ;;  %v3400_v3 = vadd.f32 %v3384_v27, %v3324_v46  ;;  %v7677_v46 = vld [vmem:[#allocation15_spill] sm:$0xff] }
 0x540   : > { %v3460_v48 = vsel %vm850_vm0, %v3458_v59, %v7664_v52  ;;  %v3475_v39 = vadd.f32 %v3457_v57, %v3399_v12  ;;  %v7666_v21 = vrot.slane %v6934_v2, 1  ;;  %v7667_v36 = vrot.slane %v6923_v60, 1  ;;  %v7676_v59 = vld [vmem:[#allocation55_spill] sm:$0xff]  ;;  %v7680_v52 = vld [vmem:[#allocation25_spill] sm:$0xff] }
 0x541   : > { %v3510_v37 = vadd.f32 %v7665_v61, %v3473_v34  ;;  %v3511_v29 = vadd.f32 %v3503_v14, %v3474_v56  ;;  %v3565_v9 = vrot.slane %v3528_v30, 1  ;;  %v3568_v24 = vrot.slane %v3530_v1, 1  ;;  %v7678_v34 = vld [vmem:[#allocation26_spill] sm:$0xff] }
 0x542   : > { %v3561_v22 = vsel %vm2525_vm7, %v7667_v36, %v7666_v21  ;;  %v3569_v62 = vrot.slane %v7002_v7, 1  ;;  %v3476_v10 = vadd.f32 %v3460_v48, %v3400_v3  ;;  %v3512_v19 = vadd.f32 %v3504_v43, %v3475_v39  ;;  %v7684_v3 = vld [vmem:[#allocation45_spill] sm:$0xff]  ;;  %v7688_v36 = vld [vmem:[#allocation39_spill] sm:$0xff] }
 0x543   : > { %v3585_v8 = vadd.f32 %v3561_v22, %v3509_v63  ;;  %v3586_v23 = vadd.f32 %v6802_v28, %v3510_v37  ;;  %v3567_v40 = vsel %vm2525_vm7, %v3565_v9, %v3566_v50  ;;  %v3604_v2 = vmul.f32 %v6207_v13, %v6982_v45  ;;  %v7682_v63 = vld [vmem:[#allocation47_spill] sm:$0xff]  ;;  %v7686_v37 = vld [vmem:[#allocation40_spill] sm:$0xff]  ;;  %v7690_v9 = vld [vmem:[#allocation41_spill] sm:$0xff] }
 0x544   : > { %v3570_v54 = vsel %vm2525_vm7, %v3568_v24, %v3569_v62  ;;  %v3606_v60 = vmul.f32 %v6207_v13, %v6925_v11  ;;  %v3513_v30 = vadd.f32 %v6780_v0, %v3476_v10  ;;  %v3587_v51 = vadd.f32 %v3567_v40, %v3511_v29  ;;  %v7672_v0 = vld [vmem:[#allocation21_spill] sm:$0xff]  ;;  %v7691_v62 = vld [vmem:[#allocation34_spill] sm:$0xff] }
 0x545   : > { %v3588_v15 = vadd.f32 %v3570_v54, %v3512_v19  ;;  %v3607_v7 = vmul.f32 %v6207_v13, %v6980_v25  ;;  %v7668_v33 = vrot.slane %v6942_v32, 2  ;;  %v7669_v28 = vrot.slane %v6939_v44, 2  ;;  %v7674_v32 = vld [vmem:[#allocation33_spill] sm:$0xff]  ;;  %v7675_v44 = vld [vmem:[#allocation16_spill] sm:$0xff]  ;;  %v7692_v19 = vld [vmem:[#allocation54_spill] sm:$0xff] }
 0x546   : > { %v3641_v38 = vrot.slane %v3604_v2, 2  ;;  %v3642_v55 = vrot.slane %v3605_v20, 2  ;;  %v3644_v18 = vrot.slane %v3606_v60, 2  ;;  %v3589_v6 = vadd.f32 %v6834_v26, %v3513_v30  ;;  %v7693_v54 = vld [vmem:[#allocation28_spill] sm:$0xff] }
 0x547   : > { %v3637_v50 = vsel %vm2602_vm8, %v7669_v28, %v7668_v33  ;;  %v3645_v49 = vrot.slane %v3607_v7, 2  ;;  %v7671_v4 = vrot.slane %v7670_v35, 2  ;;  %v7673_v31 = vrot.slane %v7672_v0, 2 }
 0x548   : > { %v3661_v5 = vadd.f32 %v3637_v50, %v3585_v8  ;;  %v3643_v13 = vsel %vm2602_vm8, %v3641_v38, %v3642_v55  ;;  %v3662_v58 = vadd.f32 %v7674_v32, %v3586_v23  ;;  %v3680_v41 = vmul.f32 %v7675_v44, %v6982_v45  ;;  %v7695_v50 = vld [vmem:[#allocation30_spill] sm:$0xff] }
 0x549   : > { %v3649_v27 = vsel %vm2602_vm8, %v7673_v31, %v7671_v4  ;;  %v3681_v20 = vmul.f32 %v7675_v44, %v7037_v16  ;;  %v3646_v26 = vsel %vm2602_vm8, %v3644_v18, %v3645_v49  ;;  %v3663_v17 = vadd.f32 %v3643_v13, %v3587_v51  ;;  %v7696_v18 = vld [vmem:[#allocation32_spill] sm:$0xff] }
 0x54a   : > { %v3665_v42 = vadd.f32 %v3649_v27, %v3589_v6  ;;  %v3682_v53 = vmul.f32 %v7675_v44, %v6925_v11  ;;  %v3664_v47 = vadd.f32 %v3646_v26, %v3588_v15  ;;  %v3683_v57 = vmul.f32 %v7675_v44, %v6980_v25  ;;  %v7697_v49 = vld [vmem:[#allocation36_spill] sm:$0xff]  ;;  %v7700_v26 = vld [vmem:[#allocation49_spill] sm:$0xff] }
 0x54b   : > { %v3684_v14 = vmul.f32 %v7675_v44, %v7676_v59  ;;  %v3685_v12 = vmul.f32 %v7675_v44, %v7677_v46  ;;  %v7679_v43 = vrot.slane %v7678_v34, 3  ;;  %v7681_v48 = vrot.slane %v7680_v52, 3  ;;  %v7698_v44 = vld [vmem:[#allocation22_spill] sm:$0xff]  ;;  %v7702_v34 = vld [vmem:[#allocation29_spill] sm:$0xff]  ;;  %v7704_v52 = vld [vmem:[#allocation27_spill] sm:$0xff] }
 0x54c   : > { %v7683_v1 = vrot.slane %v7682_v63, 3  ;;  %v7685_v39 = vrot.slane %v7684_v3, 3  ;;  %v7687_v21 = vrot.slane %v7686_v37, 3  ;;  %v7689_v22 = vrot.slane %v7688_v36, 3  ;;  %v7706_v63 = vld [vmem:[#allocation50_spill] sm:$0xff] }
 0x54d   : > { %v3704_v56 = vsel %vm2679_vm9, %v7681_v48, %v7679_v43  ;;  %v3711_v24 = vrot.slane %v7690_v9, 3  ;;  %v3714_v10 = vrot.slane %v7691_v62, 3  ;;  %v3715_v8 = vrot.slane %v7692_v19, 3  ;;  %v7712_v62 = vld [vmem:[#allocation43_spill] sm:$0xff] }
 0x54e   : > { %v3707_v61 = vsel %vm2679_vm9, %v7685_v39, %v7683_v1  ;;  %v3710_v29 = vsel %vm2679_vm9, %v7689_v22, %v7687_v21  ;;  %v3717_v23 = vrot.slane %v3680_v41, 3  ;;  %v3718_v40 = vrot.slane %v3681_v20, 3  ;;  %v7699_v41 = vld [vmem:[#allocation17_spill] sm:$0xff]  ;;  %v7708_v1 = vld [vmem:[#allocation48_spill] sm:$0xff] }
 0x54f   : > { %v7694_v2 = vrot.slane %v7693_v54, 3  ;;  %v3720_v30 = vrot.slane %v3682_v53, 3  ;;  %v3721_v51 = vrot.slane %v3683_v57, 3  ;;  %v3723_v15 = vrot.slane %v3684_v14, 3  ;;  %v7701_v57 = vld [vmem:[#allocation52_spill] sm:$0xff] }
 0x550   : > { %v3716_v7 = vsel %vm2679_vm9, %v3714_v10, %v3715_v8  ;;  %v3719_v33 = vsel %vm2679_vm9, %v3717_v23, %v3718_v40  ;;  %v3724_v28 = vrot.slane %v3685_v12, 3  ;;  %v3734_v38 = vadd.f32 %v3704_v56, %v7695_v50  ;;  %v7711_v21 = vld [vmem:[#allocation24_spill] sm:$0xff] }
 0x551   : > { %v3713_v60 = vsel %vm2679_vm9, %v3711_v24, %v7694_v2  ;;  %v3722_v55 = vsel %vm2679_vm9, %v3720_v30, %v3721_v51  ;;  %v3735_v6 = vadd.f32 %v3707_v61, %v7696_v18  ;;  %v3736_v35 = vadd.f32 %v3710_v29, %v7697_v49  ;;  %v7710_v61 = vld [vmem:[#allocation42_spill] sm:$0xff]  ;;  %v7203_v50 = vld [vmem:[#allocation3 + $0x78] sm:$0xf] }
 0x552   : > { %v3737_v4 = vadd.f32 %v3713_v60, %v3661_v5  ;;  %v3725_v0 = vsel %vm2679_vm9, %v3723_v15, %v3724_v28  ;;  %v3738_v31 = vadd.f32 %v3716_v7, %v3662_v58  ;;  %v3739_v27 = vadd.f32 %v3719_v33, %v3663_v17  ;;  %v7200_v51 = vld [vmem:[#allocation3 + $0x68] sm:$0xf] }
 0x553   : > { %v3740_v13 = vadd.f32 %v3722_v55, %v3664_v47  ;;  %v3741_v32 = vadd.f32 %v3725_v0, %v3665_v42  ;;  %v3752_v20 = vmul.f32 %v7699_v41, %v7698_v44  ;;  %v3754_v53 = vmul.f32 %v7699_v41, %v7700_v26 }
 0x554   : > { %v3755_v14 = vmul.f32 %v7699_v41, %v7701_v57  ;;  %v3756_v12 = vmul.f32 %v7699_v41, %v6982_v45  ;;  %v3757_v5 = vmul.f32 %v7699_v41, %v7037_v16  ;;  %v3758_v58 = vmul.f32 %v7699_v41, %v6925_v11 }
 0x555   : > { %v3759_v17 = vmul.f32 %v7699_v41, %v6980_v25  ;;  %v3760_v42 = vmul.f32 %v7699_v41, %v7676_v59  ;;  %v3761_v47 = vmul.f32 %v7699_v41, %v7677_v46  ;;  %v7703_v43 = vrot.slane %v7702_v34, 4  ;;  %v7234_v34 = vld [vmem:[#allocation3 + $0x98] sm:$0xf] }
 0x556   : > { %v7705_v48 = vrot.slane %v7704_v52, 4  ;;  %v7707_v16 = vrot.slane %v7706_v63, 4  ;;  %v7709_v3 = vrot.slane %v7708_v1, 4  ;;  %v3784_v25 = vrot.slane %v7710_v61, 4  ;;  %v7240_v63 = vld [vmem:[#allocation3 + $0xa8] sm:$0xf] }
 0x557   : > { %v3787_v37 = vrot.slane %v3752_v20, 4  ;;  %v3788_v36 = vrot.slane %v7711_v21, 4  ;;  %v3790_v22 = vrot.slane %v3754_v53, 4  ;;  %v3791_v29 = vrot.slane %v3755_v14, 4  ;;  %v7206_v20 = vld [vmem:[#allocation3 + $0xb0] sm:$0xff]  ;;  %v7212_v14 = vld [vmem:[#allocation3 + $0x40] sm:$0xff] }
 0x558   : > { %v3780_v56 = vsel %vm850_vm0, %v7705_v48, %v7703_v43  ;;  %v3783_v39 = vsel %vm850_vm0, %v7709_v3, %v7707_v16  ;;  %v3793_v46 = vrot.slane %v3756_v12, 4  ;;  %v3794_v9 = vrot.slane %v3757_v5, 4  ;;  %v7714_v53 = vld [vmem:[#allocation6_spill] sm:$0xff]  ;;  %v7242_v16 = vld [vmem:[#allocation3 + $0xb8] sm:$0xf] }
 0x559   : > { %v3796_v24 = vrot.slane %v3758_v58, 4  ;;  %v7713_v10 = vrot.slane %v7712_v62, 4  ;;  %v3789_v8 = vsel %vm850_vm0, %v3787_v37, %v3788_v36  ;;  %v3797_v23 = vrot.slane %v3759_v17, 4 }
 0x55a   : > { %v3799_v40 = vrot.slane %v3760_v42, 4  ;;  %v3792_v54 = vsel %vm850_vm0, %v3790_v22, %v3791_v29  ;;  %v3795_v2 = vsel %vm850_vm0, %v3793_v46, %v3794_v9  ;;  %v3800_v60 = vrot.slane %v3761_v47, 4  ;;  %v7232_v47 = vld [vmem:[#allocation3 + $0x88] sm:$0xf] }
 0x55b   : > { %v3786_v19 = vsel %vm850_vm0, %v3784_v25, %v7713_v10  ;;  %v3810_v30 = vadd.f32 %v3780_v56, %v3734_v38  ;;  %v3798_v15 = vsel %vm850_vm0, %v3796_v24, %v3797_v23  ;;  %v3811_v7 = vadd.f32 %v3783_v39, %v3735_v6  ;;  %v5189_v38 = vld [vmem:[%s7494_s15 + $0x10] sm:$0xff]  ;;  %v7715_v6 = vld [vmem:[#allocation18_spill] sm:$0xff]  ;;  %v7716_v23 = vld [vmem:[#allocation51_spill] sm:$0xff] }
 0x55c   : > { %v3812_v33 = vadd.f32 %v3786_v19, %v3736_v35  ;;  %v3813_v28 = vadd.f32 %v3789_v8, %v3737_v4  ;;  %v3801_v55 = vsel %vm850_vm0, %v3799_v40, %v3800_v60  ;;  %v3814_v18 = vadd.f32 %v3792_v54, %v3738_v31  ;;  %v7216_v4 = vld [vmem:[#allocation3 + $0x50] sm:$0xff] }
 0x55d   : > { %v3815_v49 = vadd.f32 %v3795_v2, %v3739_v27  ;;  %v3816_v0 = vadd.f32 %v3798_v15, %v3740_v13  ;;  %v3817_v41 = vadd.f32 %v3801_v55, %v3741_v32  ;;  %v3838_v57 = vrot.slane %v5189_v38, %v7714_v53  ;;  %v7717_v2 = vld [vmem:[#allocation44_spill] sm:$0xff] }
 0x55e   : > { %v3859_v35 = vmul.f32 %v7212_v14, %v7715_v6  ;;  %v3861_v31 = vmul.f32 %v7216_v4, %v7715_v6  ;;  %v3863_v27 = vmul.f32 %v7715_v6, %v7698_v44  ;;  %v3864_v13 = vmul.f32 %v7715_v6, %v7200_v51 }
 0x55f   : > { %v3865_v32 = vmul.f32 %v7715_v6, %v7700_v26  ;;  %v3866_v12 = vmul.f32 %v7715_v6, %v7203_v50  ;;  %v3839_v5 = vmul.f32 %v7212_v14, %v3838_v57  ;;  %v3840_v58 = vmul.f32 %v7216_v4, %v3838_v57 }
 0x560   : > { %v3841_v17 = vmul.f32 %v3838_v57, %v7698_v44  ;;  %v3842_v42 = vmul.f32 %v3838_v57, %v7700_v26  ;;  %v3843_v43 = vmul.f32 %v3838_v57, %v6982_v45  ;;  %v3844_v52 = vmul.f32 %v3838_v57, %v6925_v11 }
 0x561   : > { %v3845_v48 = vmul.f32 %v3838_v57, %v7676_v59  ;;  %v3846_v56 = vmul.f32 %v3838_v57, %v7206_v20  ;;  %v3847_v1 = vadd.f32 %v3839_v5, %v3810_v30  ;;  %v3848_v3 = vadd.f32 %v3840_v58, %v3811_v7 }
 0x562   : > { %v3849_v39 = vadd.f32 %v3841_v17, %v3812_v33  ;;  %v3850_v61 = vadd.f32 %v3842_v42, %v3813_v28  ;;  %v3851_v25 = vadd.f32 %v3843_v43, %v3814_v18  ;;  %v3852_v37 = vadd.f32 %v3844_v52, %v3815_v49 }
 0x563   : > { %v3853_v21 = vadd.f32 %v3845_v48, %v3816_v0  ;;  %v3854_v36 = vadd.f32 %v3846_v56, %v3817_v41  ;;  %v3867_v22 = vmul.f32 %v7715_v6, %v6982_v45  ;;  %v3868_v29 = vmul.f32 %v7715_v6, %v7232_v47  ;;  %v7718_v56 = vld [vmem:[#allocation19_spill] sm:$0xff] }
 0x564   : > { %v3869_v46 = vmul.f32 %v7715_v6, %v6925_v11  ;;  %v3870_v9 = vmul.f32 %v7715_v6, %v7234_v34  ;;  %v3871_v24 = vmul.f32 %v7715_v6, %v7676_v59  ;;  %v3872_v62 = vmul.f32 %v7715_v6, %v7240_v63 }
 0x565   : > { %v3873_v10 = vmul.f32 %v7715_v6, %v7206_v20  ;;  %v3874_v19 = vmul.f32 %v7715_v6, %v7242_v16  ;;  %v3891_v8 = vrot.slane %v3859_v35, 1  ;;  %v3892_v40 = vrot.slane %v7716_v23, 1 }
 0x566   : > { %v3894_v54 = vrot.slane %v3861_v31, 1  ;;  %v3895_v60 = vrot.slane %v7717_v2, 1  ;;  %v3897_v30 = vrot.slane %v3863_v27, 1  ;;  %v3898_v15 = vrot.slane %v3864_v13, 1 }
 0x567   : > { %v3900_v7 = vrot.slane %v3865_v32, 1  ;;  %v3901_v33 = vrot.slane %v3866_v12, 1  ;;  %v3893_v28 = vsel %vm2525_vm7, %v3891_v8, %v3892_v40  ;;  %v3903_v18 = vrot.slane %v3867_v22, 1 }
 0x568   : > { %v3896_v55 = vsel %vm2525_vm7, %v3894_v54, %v3895_v60  ;;  %v3904_v49 = vrot.slane %v3868_v29, 1  ;;  %v3899_v0 = vsel %vm2525_vm7, %v3897_v30, %v3898_v15  ;;  %v3906_v38 = vrot.slane %v3869_v46, 1  ;;  %v7719_v46 = vld [vmem:[#allocation46_spill] sm:$0xff] }
 0x569   : > { %v3902_v41 = vsel %vm2525_vm7, %v3900_v7, %v3901_v33  ;;  %v3907_v53 = vrot.slane %v3870_v9, 1  ;;  %v3909_v6 = vrot.slane %v3871_v24, 1  ;;  %v3910_v35 = vrot.slane %v3872_v62, 1 }
 0x56a   : > { %v3905_v57 = vsel %vm2525_vm7, %v3903_v18, %v3904_v49  ;;  %v3912_v31 = vrot.slane %v3873_v10, 1  ;;  %v3913_v13 = vrot.slane %v3874_v19, 1  ;;  %v3923_v32 = vadd.f32 %v3893_v28, %v3847_v1 }
 0x56b   : > { %v3908_v27 = vsel %vm2525_vm7, %v3906_v38, %v3907_v53  ;;  %v3924_v12 = vadd.f32 %v3896_v55, %v3848_v3  ;;  %v3911_v5 = vsel %vm2525_vm7, %v3909_v6, %v3910_v35  ;;  %v3925_v58 = vadd.f32 %v3899_v0, %v3849_v39  ;;  %v7276_v3 = vld [vmem:[#allocation3 + $0x58] sm:$0xf] }
 0x56c   : > { %v3926_v17 = vadd.f32 %v3902_v41, %v3850_v61  ;;  %v3927_v42 = vadd.f32 %v3905_v57, %v3851_v25  ;;  %v3914_v43 = vsel %vm2525_vm7, %v3912_v31, %v3913_v13  ;;  %v3928_v52 = vadd.f32 %v3908_v27, %v3852_v37 }
 0x56d   : > { %v3929_v48 = vadd.f32 %v3911_v5, %v3853_v21  ;;  %v3935_v22 = vmul.f32 %v7212_v14, %v7718_v56  ;;  %v3930_v29 = vadd.f32 %v3914_v43, %v3854_v36  ;;  %v3936_v9 = vmul.f32 %v7718_v56, %v7719_v46 }
 0x56e   : > { %v3937_v1 = vmul.f32 %v7216_v4, %v7718_v56  ;;  %v3938_v39 = vmul.f32 %v7276_v3, %v7718_v56  ;;  %v3939_v61 = vmul.f32 %v7718_v56, %v7698_v44  ;;  %v3940_v25 = vmul.f32 %v7718_v56, %v7200_v51 }
 0x56f   : > { %v3941_v37 = vmul.f32 %v7718_v56, %v7700_v26  ;;  %v3942_v21 = vmul.f32 %v7718_v56, %v7203_v50  ;;  %v3943_v36 = vmul.f32 %v7718_v56, %v6982_v45  ;;  %v3944_v24 = vmul.f32 %v7718_v56, %v7232_v47 }
 0x570   : > { %v3945_v62 = vmul.f32 %v7718_v56, %v6925_v11  ;;  %v3946_v10 = vmul.f32 %v7718_v56, %v7234_v34  ;;  %v3947_v19 = vmul.f32 %v7718_v56, %v7676_v59  ;;  %v3948_v26 = vmul.f32 %v7718_v56, %v7240_v63 }
 0x571   : > { %v3949_v8 = vmul.f32 %v7718_v56, %v7206_v20  ;;  %v3950_v23 = vmul.f32 %v7718_v56, %v7242_v16  ;;  %v3967_v40 = vrot.slane %v3935_v22, 2  ;;  %v3968_v54 = vrot.slane %v3936_v9, 2 }
 0x572   : > { %v3970_v2 = vrot.slane %v3937_v1, 2  ;;  %v3971_v60 = vrot.slane %v3938_v39, 2  ;;  %v3973_v30 = vrot.slane %v3939_v61, 2  ;;  %v3974_v15 = vrot.slane %v3940_v25, 2  ;;  %v7720_v25 = vld [vmem:[#allocation20_spill] sm:$0xff] }
 0x573   : > { %v3976_v7 = vrot.slane %v3941_v37, 2  ;;  %v3977_v33 = vrot.slane %v3942_v21, 2  ;;  %v3969_v28 = vsel %vm2602_vm8, %v3967_v40, %v3968_v54  ;;  %v3979_v18 = vrot.slane %v3943_v36, 2  ;;  %v5193_v36 = vld [vmem:[#allocation3 + $0x48] sm:$0xf] }
 0x574   : > { %v3972_v55 = vsel %vm2602_vm8, %v3970_v2, %v3971_v60  ;;  %v3980_v49 = vrot.slane %v3944_v24, 2  ;;  %v3975_v0 = vsel %vm2602_vm8, %v3973_v30, %v3974_v15  ;;  %v3982_v38 = vrot.slane %v3945_v62, 2 }
 0x575   : > { %v3978_v41 = vsel %vm2602_vm8, %v3976_v7, %v3977_v33  ;;  %v3983_v53 = vrot.slane %v3946_v10, 2  ;;  %v3985_v6 = vrot.slane %v3947_v19, 2  ;;  %v3986_v35 = vrot.slane %v3948_v26, 2 }
 0x576   : > { %v3981_v57 = vsel %vm2602_vm8, %v3979_v18, %v3980_v49  ;;  %v3988_v31 = vrot.slane %v3949_v8, 2  ;;  %v3989_v13 = vrot.slane %v3950_v23, 2  ;;  %v3999_v5 = vadd.f32 %v3969_v28, %v3923_v32 }
 0x577   : > { %v3984_v27 = vsel %vm2602_vm8, %v3982_v38, %v3983_v53  ;;  %v4000_v43 = vadd.f32 %v3972_v55, %v3924_v12  ;;  %v3987_v56 = vsel %vm2602_vm8, %v3985_v6, %v3986_v35  ;;  %v4001_v22 = vadd.f32 %v3975_v0, %v3925_v58 }
 0x578   : > { %v4002_v46 = vadd.f32 %v3978_v41, %v3926_v17  ;;  %v4003_v9 = vadd.f32 %v3981_v57, %v3927_v42  ;;  %v3990_v1 = vsel %vm2602_vm8, %v3988_v31, %v3989_v13  ;;  %v4004_v39 = vadd.f32 %v3984_v27, %v3928_v52  ;;  %v5194_v42 = vld [vmem:[#allocation3 + $0x70] sm:$0xff]  ;;  %v4725_v27 = vld [vmem:[%s7494_s15 + $0x18] ss:$0 sm:$0xff] }
 0x579   : > { %v4005_v61 = vadd.f32 %v3987_v56, %v3929_v48  ;;  %v4011_v37 = vmul.f32 %v7212_v14, %v7720_v25  ;;  %v4006_v21 = vadd.f32 %v3990_v1, %v3930_v29  ;;  %v4012_v24 = vmul.f32 %v5193_v36, %v7720_v25 }
 0x57a   : > { %v4013_v32 = vmul.f32 %v7216_v4, %v7720_v25  ;;  %v4014_v12 = vmul.f32 %v7276_v3, %v7720_v25  ;;  %v4015_v58 = vmul.f32 %v7720_v25, %v7698_v44  ;;  %v4016_v17 = vmul.f32 %v7720_v25, %v7200_v51 }
 0x57b   : > { %v4017_v52 = vmul.f32 %v5194_v42, %v7720_v25  ;;  %v4018_v48 = vmul.f32 %v7720_v25, %v7203_v50  ;;  %v4019_v29 = vmul.f32 %v7720_v25, %v6982_v45  ;;  %v4020_v62 = vmul.f32 %v7720_v25, %v7232_v47 }
 0x57c   : > { %v4021_v10 = vmul.f32 %v7720_v25, %v6925_v11  ;;  %v4022_v19 = vmul.f32 %v7720_v25, %v7234_v34  ;;  %v4023_v26 = vmul.f32 %v7720_v25, %v7676_v59  ;;  %v4024_v8 = vmul.f32 %v7720_v25, %v7240_v63 }
 0x57d   : > { %v4025_v23 = vmul.f32 %v7720_v25, %v7206_v20  ;;  %v4026_v40 = vmul.f32 %v7720_v25, %v7242_v16  ;;  %v4043_v54 = vrot.slane %v4011_v37, 3  ;;  %v4044_v2 = vrot.slane %v4012_v24, 3 }
 0x57e   : > { %v4046_v60 = vrot.slane %v4013_v32, 3  ;;  %v4047_v30 = vrot.slane %v4014_v12, 3  ;;  %v4049_v15 = vrot.slane %v4015_v58, 3  ;;  %v4050_v7 = vrot.slane %v4016_v17, 3 }
 0x57f   : > { %v4052_v33 = vrot.slane %v4017_v52, 3  ;;  %v4053_v28 = vrot.slane %v4018_v48, 3  ;;  %v4045_v55 = vsel %vm2679_vm9, %v4043_v54, %v4044_v2  ;;  %v4055_v18 = vrot.slane %v4019_v29, 3 }
 0x580   : > { %v4048_v59 = vsel %vm2679_vm9, %v4046_v60, %v4047_v30  ;;  %v4056_v49 = vrot.slane %v4020_v62, 3  ;;  %v4051_v0 = vsel %vm2679_vm9, %v4049_v15, %v4050_v7  ;;  %v4058_v38 = vrot.slane %v4021_v10, 3 }
 0x581   : > { %v4054_v41 = vsel %vm2679_vm9, %v4052_v33, %v4053_v28  ;;  %v4059_v53 = vrot.slane %v4022_v19, 3  ;;  %v4061_v6 = vrot.slane %v4023_v26, 3  ;;  %v4062_v35 = vrot.slane %v4024_v8, 3  ;;  %v4726_v33 = vld [vmem:[%s7495_s16] ss:$0 sm:$0xff] }
 0x582   : > { %v4057_v57 = vsel %vm2679_vm9, %v4055_v18, %v4056_v49  ;;  %v4064_v31 = vrot.slane %v4025_v23, 3  ;;  %v4065_v56 = vrot.slane %v4026_v40, 3  ;;  %v4075_v1 = vadd.f32 %v4045_v55, %v3999_v5 }
 0x583   : > { %v4060_v13 = vsel %vm2679_vm9, %v4058_v38, %v4059_v53  ;;  %v4076_v25 = vadd.f32 %v4048_v59, %v4000_v43  ;;  %v4063_v37 = vsel %vm2679_vm9, %v4061_v6, %v4062_v35  ;;  %v4077_v24 = vadd.f32 %v4051_v0, %v4001_v22 }
 0x584   : > { %v4078_v32 = vadd.f32 %v4054_v41, %v4002_v46  ;;  %v4079_v12 = vadd.f32 %v4057_v57, %v4003_v9  ;;  %v4066_v58 = vsel %vm2679_vm9, %v4064_v31, %v4065_v56  ;;  %v4080_v17 = vadd.f32 %v4060_v13, %v4004_v39 }
 0x585   : > { %v4081_v52 = vadd.f32 %v4063_v37, %v4005_v61  ;;  %v4087_v48 = vmul.f32 %v7212_v14, %v4725_v27  ;;  %v4082_v29 = vadd.f32 %v4066_v58, %v4006_v21  ;;  %v4088_v62 = vmul.f32 %v5193_v36, %v4725_v27  ;;  %v5195_v61 = vld [vmem:[#allocation3 + $0xa0] sm:$0xff] }
 0x586   : > { %v4089_v10 = vmul.f32 %v7216_v4, %v4725_v27  ;;  %v4090_v19 = vmul.f32 %v7276_v3, %v4725_v27  ;;  %v4091_v5 = vmul.f32 %v4725_v27, %v7698_v44  ;;  %v4092_v43 = vmul.f32 %v4725_v27, %v7200_v51 }
 0x587   : > { %v4093_v26 = vmul.f32 %v5194_v42, %v4725_v27  ;;  %v4094_v22 = vmul.f32 %v4725_v27, %v7203_v50  ;;  %v4095_v46 = vmul.f32 %v4725_v27, %v6982_v45  ;;  %v4096_v9 = vmul.f32 %v4725_v27, %v7232_v47 }
 0x588   : > { %v4097_v39 = vmul.f32 %v4725_v27, %v6925_v11  ;;  %v4098_v14 = vmul.f32 %v4725_v27, %v7234_v34  ;;  %v4099_v21 = vmul.f32 %v5195_v61, %v4725_v27  ;;  %v4100_v4 = vmul.f32 %v4725_v27, %v7240_v63 }
 0x589   : > { %v4101_v3 = vmul.f32 %v4725_v27, %v7206_v20  ;;  %v4102_v44 = vmul.f32 %v4725_v27, %v7242_v16  ;;  %v4119_v51 = vrot.slane %v4087_v48, 4  ;;  %v4120_v36 = vrot.slane %v4088_v62, 4 }
 0x58a   : > { %v4122_v42 = vrot.slane %v4089_v10, 4  ;;  %v4123_v50 = vrot.slane %v4090_v19, 4  ;;  %v4125_v8 = vrot.slane %v4091_v5, 4  ;;  %v4126_v45 = vrot.slane %v4092_v43, 4 }
 0x58b   : > { %v4128_v23 = vrot.slane %v4093_v26, 4  ;;  %v4129_v47 = vrot.slane %v4094_v22, 4  ;;  %v4121_v11 = vsel %vm850_vm0, %v4119_v51, %v4120_v36  ;;  %v4131_v40 = vrot.slane %v4095_v46, 4 }
 0x58c   : > { %v4124_v34 = vsel %vm850_vm0, %v4122_v42, %v4123_v50  ;;  %v4132_v54 = vrot.slane %v4096_v9, 4  ;;  %v4127_v63 = vsel %vm850_vm0, %v4125_v8, %v4126_v45  ;;  %v4134_v2 = vrot.slane %v4097_v39, 4 }
 0x58d   : > { %v4130_v20 = vsel %vm850_vm0, %v4128_v23, %v4129_v47  ;;  %v4135_v16 = vrot.slane %v4098_v14, 4  ;;  %v4137_v30 = vrot.slane %v4099_v21, 4  ;;  %v4138_v15 = vrot.slane %v4100_v4, 4 }
 0x58e   : > { %v4133_v60 = vsel %vm850_vm0, %v4131_v40, %v4132_v54  ;;  %v4140_v7 = vrot.slane %v4101_v3, 4  ;;  %v4141_v55 = vrot.slane %v4102_v44, 4  ;;  %v4151_v59 = vadd.f32 %v4121_v11, %v4075_v1 }
 0x58f   : > { %v4136_v28 = vsel %vm850_vm0, %v4134_v2, %v4135_v16  ;;  %v4152_v18 = vadd.f32 %v4124_v34, %v4076_v25  ;;  %v4139_v49 = vsel %vm850_vm0, %v4137_v30, %v4138_v15  ;;  %v4153_v0 = vadd.f32 %v4127_v63, %v4077_v24 }
 0x590   : > { %v4154_v41 = vadd.f32 %v4130_v20, %v4078_v32  ;;  %v4155_v38 = vadd.f32 %v4133_v60, %v4079_v12  ;;  %v4142_v53 = vsel %vm850_vm0, %v4140_v7, %v4141_v55  ;;  %v4156_v57 = vadd.f32 %v4136_v28, %v4080_v17 }
 0x591   : > { %v4157_v6 = vadd.f32 %v4139_v49, %v4081_v52  ;;  %v4166_v35 = vadd.f32 %v4726_v33, %v4151_v59  ;;  %v4158_v31 = vadd.f32 %v4142_v53, %v4082_v29  ;;  %v4167_v27 = vadd.f32 %v4726_v33, %v4152_v18 }
 0x592   : > { %v4168_v13 = vadd.f32 %v4726_v33, %v4153_v0  ;;  %v4169_v56 = vadd.f32 %v4726_v33, %v4154_v41  ;;  %v4170_v37 = vadd.f32 %v4726_v33, %v4155_v38  ;;  %v4171_v58 = vadd.f32 %v4726_v33, %v4156_v57 }
 0x593   : > { %v4172_v48 = vadd.f32 %v4726_v33, %v4157_v6  ;;  %v4727_v62 = vmul.f32 -1.442695, %v4166_v35  ;;  %v7377_v1 = vadd.f32 %v4726_v33, %v4158_v31  ;;  %v4728_v25 = vmul.f32 -1.442695, %v4167_v27 }
 0x594   : > { %v4729_v10 = vmul.f32 -1.442695, %v4168_v13  ;;  %v4730_v24 = vmul.f32 -1.442695, %v4169_v56  ;;  %v4731_v32 = vmul.f32 -1.442695, %v4170_v37 }
 0x595   : > { %5149 = vpow2.f32 %v4727_v62  ;;  %v4732_v12 = vmul.f32 -1.442695, %v4171_v58  ;;  %v4733_v17 = vmul.f32 -1.442695, %v4172_v48  ;;  %v4734_v52 = vmul.f32 -1.442695, %v7377_v1 }
 0x596   : > { %5151 = vpow2.f32 %v4728_v25  ;;  %v4257_v25 = vld [vmem:[%s7497_s18] sm:$0x3] }
 0x597   : > { %5153 = vpow2.f32 %v4729_v10 }
 0x598   : > { %5155 = vpow2.f32 %v4730_v24 }
 0x599   : > { %5157 = vpow2.f32 %v4731_v32 }
 0x59a   : > { %5159 = vpow2.f32 %v4732_v12 }
 0x59b   : > { %5161 = vpow2.f32 %v4733_v17 }
 0x59c   : > { %5163 = vpow2.f32 %v4734_v52 }
 0x5a2   : > { %v5150_v29 = vpop.eup %5149 }
 0x5a3   : > { %v5152_v19 = vpop.eup %5151  ;;  %v4198_v5 = vadd.f32 1.0, %v5150_v29 }
 0x5a4   : > { %v5154_v43 = vpop.eup %5153  ;;  %v4199_v26 = vadd.f32 1.0, %v5152_v19  ;;  %v4302_v19 = vld [vmem:[%s7500_s21 + $0x10] sm:$0xff] }
 0x5a5   : > { %v5156_v22 = vpop.eup %5155  ;;  %v4200_v46 = vadd.f32 1.0, %v5154_v43  ;;  %5165 = vrcp.f32 %v4198_v5  ;;  %v4301_v5 = vld [vmem:[%s7500_s21 + $0x8] sm:$0xff]  ;;  %4919 = vmatprep.subr.mxu1 %v4302_v19  ;;  %v4300_v43 = vld [vmem:[%s7500_s21] sm:$0xff] }
 0x5a6   : > { %v5158_v9 = vpop.eup %5157  ;;  %v4201_v39 = vadd.f32 1.0, %v5156_v22  ;;  %5167 = vrcp.f32 %v4199_v26  ;;  %4920 = vmatpush3.msra.mxu1 %v4302_v19  ;;  %v4266_v26 = vld [vmem:[%s7498_s19] sm:$0x3] }
 0x5a7   : > { %v5160_v14 = vpop.eup %5159  ;;  %v4202_v61 = vadd.f32 1.0, %v5158_v9  ;;  %5169 = vrcp.f32 %v4200_v46  ;;  %4921 = vmatprep.subr.mxu1 %v4301_v5 }
 0x5a8   : > { %v5162_v21 = vpop.eup %5161  ;;  %v4203_v4 = vadd.f32 1.0, %v5160_v14  ;;  %5171 = vrcp.f32 %v4201_v39  ;;  %4922 = vmatpush3.msra.mxu1 %v4301_v5 }
 0x5a9   : > { %v5164_v3 = vpop.eup %5163  ;;  %v4204_v44 = vadd.f32 1.0, %v5162_v21  ;;  %5173 = vrcp.f32 %v4202_v61  ;;  %4923 = vmatprep.subr.mxu1 %v4300_v43 }
 0x5aa   : > { %v4205_v51 = vadd.f32 1.0, %v5164_v3  ;;  %5175 = vrcp.f32 %v4203_v4  ;;  %4924 = vmatpush3.msra.mxu1 %v4300_v43  ;;  %v4280_v3 = vld [vmem:[%s7499_s20] sm:$0x1] }
 0x5ab   : > { %5177 = vrcp.f32 %v4204_v44 }
 0x5ac   : > { %5179 = vrcp.f32 %v4205_v51 }
 0x5b2   : > { %v5166_v36 = vpop.eup %5165 }
 0x5b3   : > { %v5168_v42 = vpop.eup %5167  ;;  %v7380_v50 = vmul.f32 %v5166_v36, %v4166_v35 }
 0x5b4   : > { %v5170_v8 = vpop.eup %5169  ;;  %v7382_v45 = vmul.f32 %v5168_v42, %v4167_v27 }
 0x5b5   : > { %v5172_v23 = vpop.eup %5171  ;;  %v7384_v47 = vmul.f32 %v5170_v8, %v4168_v13  ;;  %v4230_v40 = vsel %vm1304_vm2, %v7380_v50, 0.0 }
 0x5b6   : > { %v5174_v11 = vpop.eup %5173  ;;  %v7386_v34 = vmul.f32 %v5172_v23, %v4169_v56  ;;  %v4231_v54 = vsel %vm1304_vm2, %v7382_v45, 0.0 }
 0x5b7   : > { %v5176_v63 = vpop.eup %5175  ;;  %v7392_v20 = vmul.f32 %v5174_v11, %v4170_v37  ;;  %v4232_v2 = vadd.f32 %v4231_v54, %v4230_v40  ;;  %v4233_v16 = vsel %vm1304_vm2, %v7384_v47, 0.0  ;;  %v7721_v11 = vld [vmem:[#allocation5_spill] sm:$0xff] }
 0x5b8   : > { %v5178_v60 = vpop.eup %5177  ;;  %v7396_v15 = vmul.f32 %v5176_v63, %v4171_v58  ;;  %v4235_v33 = vsel %vm1304_vm2, %v7386_v34, 0.0  ;;  %v4252_v58 = vld [vmem:[%s7496_s17] sm:$0x3] }
 0x5b9   : > { %v4234_v30 = vadd.f32 %v4233_v16, %v4232_v2  ;;  %v7398_v7 = vmul.f32 %v5178_v60, %v4172_v48  ;;  %v4237_v28 = vsel %vm1304_vm2, %v7392_v20, 0.0  ;;  %v5180_v55 = vpop.eup %5179 }
 0x5ba   : > { %v7405_v49 = vmul.f32 %v5180_v55, %v7377_v1  ;;  %v4239_v0 = vsel %vm1304_vm2, %v7396_v15, 0.0 }
 0x5bb   : > { %v4236_v59 = vadd.f32 %v4235_v33, %v4234_v30  ;;  %v4241_v41 = vsel %vm1304_vm2, %v7398_v7, 0.0 }
 0x5bc   : > { %v4243_v57 = vsel %vm1304_vm2, %v7405_v49, 0.0 }
 0x5bd   : > { %v4238_v18 = vadd.f32 %v4237_v28, %v4236_v59  ;;  %v7723_v59 = vld [vmem:[#allocation7_spill] sm:$0xff] }
 0x5bf   : > { %v4240_v38 = vadd.f32 %v4239_v0, %v4238_v18 }
 0x5c1   : > { %v4242_v53 = vadd.f32 %v4241_v41, %v4240_v38  ;;  %v7724_v41 = vld [vmem:[#allocation10_spill] sm:$0xff] }
 0x5c3   : > { %v4244_v6 = vadd.f32 %v4243_v57, %v4242_v53 }
 0x5c5   : > { %v4245_v35 = vrot.slane %v4244_v6, 4 }
 0x5c7   : > { %v4246_v31 = vadd.f32 %v4245_v35, %v4244_v6  ;;  %v7725_v6 = vld [vmem:[#allocation9_spill] sm:$0xff] }
 0x5c9   : > { %v4247_v27 = vrot.slane %v4246_v31, 2 }
 0x5cb   : > { %v4248_v13 = vadd.f32 %v4247_v27, %v4246_v31 }
 0x5cd   : > { %v4249_v56 = vrot.slane %v4248_v13, 1 }
 0x5cf   : > { %v4250_v37 = vadd.f32 %v4249_v56, %v4248_v13  ;;  %v7726_v13 = vld [vmem:[#allocation12_spill] sm:$0xff] }
 0x5d1   : > { %v4251_v48 = vmul.f32 0.015625, %v4250_v37 }
 0x5d3   : > { %v4253_v62 = vmul.f32 %v4252_v58, %v4251_v48  ;;  %v7727_v48 = vld [vmem:[#allocation11_spill] sm:$0xff] }
 0x5d5   : > { %v4254_v1 = vsel %vm1339_vm4, %v4253_v62, 0.0 }
 0x5d6   : > { %4255 = vadd.xlane.f32.xlu1 %v4254_v1 }
 0x65f   : > { %v4256_v10 = vpop.xlane.xlu1 %4255 }
 0x660   : > { %v4258_v24 = vadd.f32 %v4257_v25, %v4256_v10  ;;  %v7728_v10 = vld [vmem:[#allocation14_spill] sm:$0xff] }
 0x662   : > { %v4735_v32 = vmul.f32 -1.442695, %v4258_v24 }
 0x664   : > { %5181 = vpow2.f32 %v4735_v32 }
 0x671   : > { %v5182_v12 = vpop.eup %5181 }
 0x672   : > { %v4262_v17 = vadd.f32 1.0, %v5182_v12  ;;  %v7729_v12 = vld [vmem:[#allocation13_spill] sm:$0xff] }
 0x674   : > { %5183 = vrcp.f32 %v4262_v17 }
 0x681   : > { %v5184_v52 = vpop.eup %5183 }
 0x682   : > { %v4265_v29 = vmul.f32 %v5184_v52, %v4258_v24 }
 0x684   : > { %4269 = vperm.xlu1 %4948, %v4265_v29  }
 0x6ff   : > { %v4270_v22 = vpop.permute.xlu1 %4269 }
 0x700   : > { %v4272_v46 = vmul.f32 %v4270_v22, %v4266_v26 }
 0x702   : > { %v4273_v9 = vsel %vm1339_vm4, %v4272_v46, 0.0 }
 0x703   : > { %v4274_v39 = vrot.slane %v4273_v9, 4 }
 0x705   : > { %v4275_v14 = vadd.f32 %v4274_v39, %v4273_v9 }
 0x707   : > { %v4276_v61 = vrot.slane %v4275_v14, 2 }
 0x709   : > { %v4277_v21 = vadd.f32 %v4276_v61, %v4275_v14 }
 0x70b   : > { %v4278_v4 = vrot.slane %v4277_v21, 1 }
 0x70d   : > { %v4279_v44 = vadd.f32 %v4278_v4, %v4277_v21 }
 0x70f   : > { %v4281_v51 = vadd.f32 %v4280_v3, %v4279_v44 }
 0x711   : > { %v4736_v36 = vmul.f32 -1.442695, %v4281_v51 }
 0x713   : > { %5185 = vpow2.f32 %v4736_v36 }
 0x720   : > { %v5186_v42 = vpop.eup %5185 }
 0x721   : > { %v4285_v8 = vadd.f32 1.0, %v5186_v42 }
 0x723   : > { %5187 = vrcp.f32 %v4285_v8 }
 0x730   : > { %v5188_v23 = vpop.eup %5187 }
 0x731   : > { %v4291_v40 = vrot.slane %v5188_v23, %v7721_v11 }
 0x733   : > { %v4292_v54 = vmul.f32 %v4291_v40, %v7380_v50  ;;  %v4293_v63 = vmul.f32 %v4291_v40, %v7382_v45  ;;  %v4294_v2 = vmul.f32 %v4291_v40, %v7384_v47  ;;  %v4295_v16 = vmul.f32 %v4291_v40, %v7386_v34  ;;  %v4737_v34 = vld [vmem:[%s7501_s22] ss:$0 sm:$0xff] }
 0x734   : > { %v4296_v60 = vmul.f32 %v4291_v40, %v7392_v20  ;;  %v4297_v50 = vmul.f32 %v4291_v40, %v7396_v15  ;;  %v4298_v45 = vmul.f32 %v4291_v40, %v7398_v7  ;;  %v4299_v47 = vmul.f32 %v4291_v40, %v7405_v49  ;;  %v7722_v7 = vld [vmem:[#allocation8_spill] sm:$0xff] }
 0x735   : > { %4925 = vmatprep.mubr.msk.f32.mxu1 %vm1304_vm2, %v4292_v54 }
 0x736   : > { %4926 = vmatmul.mubr.msk.f32.vlgmr.msra.gmra.mxu1 %vm1304_vm2, %v4293_v63 }
 0x737   : > { %4928 = vmatprep.mubr.msk.f32.mxu1 %vm1304_vm2, %v4294_v2 }
 0x73a   : > { %4929 = vmatmul.mubr.msk.f32.gmra.mxu1 %vm1304_vm2, %v4295_v16 }
 0x73b   : > { %4931 = vmatprep.mubr.msk.f32.mxu1 %vm1304_vm2, %v4296_v60 }
 0x73e   : > { %4932 = vmatmul.mubr.msk.f32.gmra.mxu1 %vm1304_vm2, %v4297_v50 }
 0x73f   : > { %4934 = vmatprep.mubr.msk.f32.mxu1 %vm1304_vm2, %v4298_v45 }
 0x742   : > { %4935 = vmatmul.mubr.msk.f32.gmra.mxu1 %vm1304_vm2, %v4299_v47 }
 0x7f6   : > { %v4927_v20 = vpop.f32.mrf.mxu1 }
 0x7f7   : > { %v4406_v30 = vadd.f32 %v4927_v20, %v4737_v34 }
 0x7f8   : > { %v4400_v15 = vpop.f32.mrf.mxu1 }
 0x7f9   : > { %v4440_v33 = vadd.f32 %v4406_v30, %v7722_v7  ;;  %v4401_v28 = vadd.f32 %v4737_v34, %v4400_v15 }
 0x7fa   : > { %v4930_v55 = vpop.f32.mrf.mxu1 }
 0x7fb   : > { %4448 = vst.msk [vmem:[%s712_s2 + $0x8] sm:$0xff] %vm2228_vm5, %v4440_v33  ;;  %v4439_v18 = vadd.f32 %v4401_v28, %v7723_v59  ;;  %v4416_v49 = vadd.f32 %v4930_v55, %v4737_v34 }
 0x7fc   : > { %v4410_v0 = vpop.f32.mrf.mxu1 }
 0x7fd   : > { %4447 = vst.msk [vmem:[%s712_s2] sm:$0xff] %vm2228_vm5, %v4439_v18  ;;  %v4442_v38 = vadd.f32 %v4416_v49, %v7724_v41  ;;  %v4411_v53 = vadd.f32 %v4737_v34, %v4410_v0 }
 0x7fe   : > { %v4933_v57 = vpop.f32.mrf.mxu1 }
 0x7ff   : > { %4450 = vst.msk [vmem:[%s712_s2 + $0x18] sm:$0xff] %vm2228_vm5, %v4442_v38  ;;  %v4441_v35 = vadd.f32 %v4411_v53, %v7725_v6  ;;  %v4426_v31 = vadd.f32 %v4933_v57, %v4737_v34 }
 0x800   : > { %v4420_v27 = vpop.f32.mrf.mxu1 }
 0x801   : > { %4449 = vst.msk [vmem:[%s712_s2 + $0x10] sm:$0xff] %vm2228_vm5, %v4441_v35  ;;  %v4444_v56 = vadd.f32 %v4426_v31, %v7726_v13  ;;  %v4421_v37 = vadd.f32 %v4737_v34, %v4420_v27 }
 0x802   : > { %v4936_v58 = vpop.f32.mrf.mxu1 }
 0x803   : > { %4452 = vst.msk [vmem:[%s712_s2 + $0x28] sm:$0xff] %vm2228_vm5, %v4444_v56  ;;  %v4443_v62 = vadd.f32 %v4421_v37, %v7727_v48  ;;  %v4436_v1 = vadd.f32 %v4936_v58, %v4737_v34 }
 0x804   : > { %v4430_v25 = vpop.f32.mrf.mxu1 }
 0x805   : > { %4451 = vst.msk [vmem:[%s712_s2 + $0x20] sm:$0xff] %vm2228_vm5, %v4443_v62  ;;  %v4446_v24 = vadd.f32 %v4436_v1, %v7728_v10  ;;  %v4431_v32 = vadd.f32 %v4737_v34, %v4430_v25 }
 0x807   : > { %4454 = vst.msk [vmem:[%s712_s2 + $0x38] sm:$0xff] %vm2228_vm5, %v4446_v24  ;;  %v4445_v17 = vadd.f32 %v4431_v32, %v7729_v12 }
 0x809   : > { %4453 = vst.msk [vmem:[%s712_s2 + $0x30] sm:$0xff] %vm2228_vm5, %v4445_v17 }
 0x80a PF: > { %s35_s25 = sadd.s32 1, %s5202_s25  }
 0x80b   : > { %p32_p4 = scmp.ge.s32.totalorder %s35_s25, 4  }
 0x80d   :  { %34 = sbr.rel (!%p32_p4) target bundleno = 17 (0x11), region = 250 }

</bundles_post_ra>
